<compile_context>
chip_gen: v7x
topology: tpu7x:2x2x1
jax: 0.10.0
libtpu: 0.0.40
codegen_flags: <defaults>
</compile_context>

<pallas_src>
import functools

import jax
import jax.numpy as jnp
from jax import lax
from jax.experimental import pallas as pl
from jax.experimental.pallas import tpu as pltpu


# ---------------------------------------------------------------------------
# helpers
# ---------------------------------------------------------------------------
def _pick_row_tile(h2, rh, lane_width):
    """Largest output-row tile TR that divides H2, is a multiple of the height
    ratio rh and of 8 (sublane), and keeps the folded f32 accumulator
    (TR x lane_width) register-friendly.  Falls back to the full H2."""
    cap = max(8, (64 * 1024) // max(lane_width * 4, 1))
    best = None
    for tr in range(8, min(h2, 256) + 1, 8):
        if h2 % tr == 0 and tr % rh == 0 and tr <= cap:
            best = tr
    return h2 if best is None else best


def _replicate_rows(uw, row0, qin, rh, lanes):
    """Rows [row0, row0+qin) of `uw`, each repeated rh times -> (qin*rh, lanes).
    One in-register expansion (sublane broadcasts + one concat), no tiny stores."""
    if rh == 1:
        return uw[row0:row0 + qin, :]
    pieces = [jnp.broadcast_to(uw[row0 + q:row0 + q + 1, :], (rh, lanes))
              for q in range(qin)]
    return jnp.concatenate(pieces, axis=0)


def _conv3x3_folded(up_ref, wv_ref, bf_ref, o_ref, *, C, TR, W2):
    """3x3 conv (padding=1) with output channels folded into the lane axis.

    up_ref : (C, TR+2, C*W2) f32 scratch: vertically haloed, horizontally
             un-padded upsampled rows, replicated across the C output-channel
             lane segments.
    wv_ref : (C*9, C*W2) folded weights  wv[ci*9+ky*3+kx, co*W2+x] = w[co,ci,ky,kx]
    bf_ref : (1,   C*W2) folded bias     bf[0, co*W2+x]            = b[co]
    o_ref  : (1, C, TR, W2) output block (NCHW).
    """
    CW2 = C * W2
    lane = lax.broadcasted_iota(jnp.int32, (1, CW2), 1)
    not_left = (lane % W2) != 0             # kx == 0: column x-1 invalid at x == 0
    not_right = (lane % W2) != (W2 - 1)     # kx == 2: column x+1 invalid at x == W2-1
    zcol = jnp.zeros((TR, 1), jnp.float32)

    acc = jnp.broadcast_to(bf_ref[...], (TR, CW2))
    # (ci, ky, kx) outermost, fully unrolled: one tap + one accumulator live.
    for ci in range(C):
        for ky in range(3):
            rows = up_ref[ci, ky:ky + TR, :]                        # (TR, CW2)
            for kx in range(3):
                if kx == 1:
                    tap = rows
                elif kx == 0:   # tap[L] = rows[L-1]; zero at each segment's x == 0
                    tap = jnp.concatenate([zcol, rows[:, :CW2 - 1]], axis=1)
                    tap = jnp.where(not_left, tap, 0.0)
                else:           # tap[L] = rows[L+1]; zero at each segment's x == W2-1
                    tap = jnp.concatenate([rows[:, 1:], zcol], axis=1)
                    tap = jnp.where(not_right, tap, 0.0)
                acc = acc + tap * wv_ref[ci * 9 + ky * 3 + kx, :]

    for co in range(C):
        o_ref[0, co] = acc[:, co * W2:(co + 1) * W2].astype(o_ref.dtype)


# ---------------------------------------------------------------------------
# kernels: nearest upsample only
# ---------------------------------------------------------------------------
def _upsample_int_kernel(x_ref, ewt_ref, o_ref, *, C, W, W2, QIN, rh):
    """Integer height ratio: one fused MXU matmul expands W for all channels /
    rows; height expansion is one in-register replication + one dense store
    per channel."""
    t = pl.program_id(1)
    q0 = pl.multiple_of(t * QIN, QIN)
    xm = x_ref[0, :, pl.ds(q0, QIN), :].reshape(C * QIN, W).astype(jnp.float32)
    uw = jnp.dot(xm, ewt_ref[...], preferred_element_type=jnp.float32)   # (C*QIN, W2)
    for c in range(C):
        rows = _replicate_rows(uw, c * QIN, QIN, rh, W2)                 # (TR, W2)
        o_ref[0, c] = rows.astype(o_ref.dtype)


def _upsample_frac_kernel(x_ref, ewt_ref, sh_ref, o_ref, uw_ref, *, C, H, W, W2, TR):
    """Fractional height ratio (row-tiled): width-expand the input rows once,
    then copy per-output-row source rows via the SMEM row table."""
    # TODO(synk): expand only the input rows covered by this tile instead of all H.
    t = pl.program_id(1)
    xm = x_ref[0].reshape(C * H, W).astype(jnp.float32)
    uw_ref[...] = jnp.dot(xm, ewt_ref[...], preferred_element_type=jnp.float32)
    for j in range(TR):
        sy = sh_ref[t * TR + j]
        row = jnp.concatenate(
            [uw_ref[pl.ds(c * H + sy, 1), :] for c in range(C)], axis=0)  # (C, W2)
        o_ref[0, :, j, :] = row.astype(o_ref.dtype)


# ---------------------------------------------------------------------------
# kernels: nearest upsample + 3x3 conv (padding=1)
# ---------------------------------------------------------------------------
def _upsample_conv_int_kernel(x_ref, ewtr_ref, wv_ref, bf_ref, o_ref, up_ref,
                              *, C, H, W, W2, TR, QIN, rh):
    CW2 = C * W2
    t = pl.program_id(1)
    nt = pl.num_programs(1)
    q0 = pl.multiple_of(t * QIN, QIN)

    # width expansion, already replicated across output-channel lane segments
    xm = x_ref[0, :, pl.ds(q0, QIN), :].reshape(C * QIN, W).astype(jnp.float32)
    uw = jnp.dot(xm, ewtr_ref[...], preferred_element_type=jnp.float32)  # (C*QIN, CW2)

    # interior rows: in-register height replication, one dense store per channel
    for c in range(C):
        up_ref[c, 1:1 + TR, :] = _replicate_rows(uw, c * QIN, QIN, rh, CW2)

    # halo rows: real neighbour rows inside the image, zeros (select) at borders
    def expand_row(idx):
        xr = x_ref[0, :, pl.ds(idx, 1), :].reshape(C, W).astype(jnp.float32)
        return jnp.dot(xr, ewtr_ref[...], preferred_element_type=jnp.float32)

    top = expand_row(jnp.maximum(q0 - 1, 0))
    bot = expand_row(jnp.minimum(q0 + QIN, H - 1))
    up_ref[:, 0, :] = jnp.where(t > 0, top, 0.0)
    up_ref[:, TR + 1, :] = jnp.where(t < nt - 1, bot, 0.0)

    _conv3x3_folded(up_ref, wv_ref, bf_ref, o_ref, C=C, TR=TR, W2=W2)


def _upsample_conv_frac_kernel(x_ref, ewtr_ref, sh_ref, wv_ref, bf_ref, o_ref,
                               uw_ref, up_ref, *, C, H, H2, W, W2, TR):
    CW2 = C * W2
    t = pl.program_id(1)
    nt = pl.num_programs(1)

    # TODO(synk): expand only the input rows covered by this tile instead of all H.
    xm = x_ref[0].reshape(C * H, W).astype(jnp.float32)
    uw_ref[...] = jnp.dot(xm, ewtr_ref[...], preferred_element_type=jnp.float32)

    def gather_row(sy):                                  # (C, CW2) for one output row
        return jnp.concatenate(
            [uw_ref[pl.ds(c * H + sy, 1), :] for c in range(C)], axis=0)

    for j in range(TR):
        up_ref[:, 1 + j, :] = gather_row(sh_ref[t * TR + j])

    y0 = t * TR
    top = gather_row(sh_ref[jnp.maximum(y0 - 1, 0)])
    bot = gather_row(sh_ref[jnp.minimum(y0 + TR, H2 - 1)])
    up_ref[:, 0, :] = jnp.where(t > 0, top, 0.0)
    up_ref[:, TR + 1, :] = jnp.where(t < nt - 1, bot, 0.0)

    _conv3x3_folded(up_ref, wv_ref, bf_ref, o_ref, C=C, TR=TR, W2=W2)


# ---------------------------------------------------------------------------
# module wrapper
# ---------------------------------------------------------------------------
class Upsample:
    """JAX/Pallas equivalent of the PyTorch Upsample(channels, use_conv) module."""

    def __init__(self, channels, use_conv, key=None):
        self.channels = channels
        self.use_conv = use_conv
        if use_conv:
            if key is None:
                key = jax.random.PRNGKey(0)
            kw, kb = jax.random.split(key)
            fan_in = channels * 3 * 3
            bound = 1.0 / (fan_in ** 0.5)
            self.weight = jax.random.uniform(
                kw, (channels, channels, 3, 3), jnp.float32, -bound, bound)
            self.bias = jax.random.uniform(
                kb, (channels,), jnp.float32, -bound, bound)

    def __call__(self, x, target_size=None, row_tile=None):
        N, C, H, W = x.shape
        assert C == self.channels
        if target_size is None:
            H2, W2 = 2 * H, 2 * W
        elif isinstance(target_size, int):
            H2, W2 = target_size, target_size
        else:
            H2, W2 = target_size

        CW2 = C * W2
        # Width selection matrix E_w (W, W2): ewt[w, x] = [w == (x*W)//W2].
        # Exact 0/1 f32; handles integer and fractional width ratios alike.
        src_w = (jnp.arange(W2) * W) // W2
        ewt = (jnp.arange(W)[:, None] == src_w[None, :]).astype(jnp.float32)

        int_h = (H2 % H == 0)
        rh = H2 // H if int_h else 1
        lane_width = CW2 if self.use_conv else W2
        TR = row_tile if row_tile is not None else _pick_row_tile(H2, rh, lane_width)
        assert H2 % TR == 0 and (TR % 8 == 0 or TR == H2), (H2, TR)
        if int_h:
            assert TR % rh == 0, (TR, rh)
            QIN = TR // rh
        grid = (N, H2 // TR)

        # Megacore: prefer sharding over batch so the per-batch x block stays
        # resident on one core; the row-tile axis is then "arbitrary".
        sem = ("parallel", "arbitrary") if N > 1 else ("arbitrary", "parallel")

        x_spec = pl.BlockSpec((1, C, H, W), lambda n, t: (n, 0, 0, 0))
        out_spec = pl.BlockSpec((1, C, TR, W2), lambda n, t: (n, 0, t, 0))
        out_shape = jax.ShapeDtypeStruct((N, C, H2, W2), x.dtype)
        itemsize = x.dtype.itemsize

        def cparams(extra_bytes):
            blocks = C * H * W * itemsize + C * TR * W2 * itemsize + extra_bytes
            limit = int(min(max(3 * blocks + (8 << 20), 16 << 20), 48 << 20))
            return pltpu.CompilerParams(
                dimension_semantics=sem, vmem_limit_bytes=limit)

        smem = pltpu.MemorySpace.SMEM

        # -------------------- pure nearest upsample --------------------
        if not self.use_conv:
            ewt_spec = pl.BlockSpec((W, W2), lambda n, t: (0, 0))
            if int_h:
                kernel = functools.partial(
                    _upsample_int_kernel, C=C, W=W, W2=W2, QIN=QIN, rh=rh)
                return pl.pallas_call(
                    kernel, out_shape=out_shape, grid=grid,
                    in_specs=[x_spec, ewt_spec], out_specs=out_spec,
                    compiler_params=cparams(W * W2 * 4),
                )(x, ewt)
            sh = ((jnp.arange(H2) * H) // H2).astype(jnp.int32)
            sh_spec = pl.BlockSpec((H2,), lambda n, t: (0,), memory_space=smem)
            kernel = functools.partial(
                _upsample_frac_kernel, C=C, H=H, W=W, W2=W2, TR=TR)
            return pl.pallas_call(
                kernel, out_shape=out_shape, grid=grid,
                in_specs=[x_spec, ewt_spec, sh_spec], out_specs=out_spec,
                scratch_shapes=[pltpu.VMEM((C * H, W2), jnp.float32)],
                compiler_params=cparams((W + C * H) * W2 * 4),
            )(x, ewt, sh)

        # -------------------- upsample + 3x3 conv --------------------
        # Folded (lane-dense) weights / bias and channel-replicated E_w.
        ewt_rep = jnp.tile(ewt, (1, C))                                # (W, C*W2)
        wv = jnp.repeat(
            jnp.transpose(self.weight, (1, 2, 3, 0)).reshape(C * 9, C),
            W2, axis=1)                                                # (C*9, C*W2)
        bf = jnp.repeat(self.bias, W2)[None, :]                        # (1, C*W2)

        ewtr_spec = pl.BlockSpec((W, CW2), lambda n, t: (0, 0))
        wv_spec = pl.BlockSpec((C * 9, CW2), lambda n, t: (0, 0))
        bf_spec = pl.BlockSpec((1, CW2), lambda n, t: (0, 0))
        up_scratch = pltpu.VMEM((C, TR + 2, CW2), jnp.float32)
        wbytes = (W + C * 9 + 1) * CW2 * 4

        if int_h:
            kernel = functools.partial(
                _upsample_conv_int_kernel,
                C=C, H=H, W=W, W2=W2, TR=TR, QIN=QIN, rh=rh)
            return pl.pallas_call(
                kernel, out_shape=out_shape, grid=grid,
                in_specs=[x_spec, ewtr_spec, wv_spec, bf_spec],
                out_specs=out_spec,
                scratch_shapes=[up_scratch],
                compiler_params=cparams(wbytes + C * (TR + 2) * CW2 * 4),
            )(x, ewt_rep, wv, bf)

        sh = ((jnp.arange(H2) * H) // H2).astype(jnp.int32)
        sh_spec = pl.BlockSpec((H2,), lambda n, t: (0,), memory_space=smem)
        kernel = functools.partial(
            _upsample_conv_frac_kernel, C=C, H=H, H2=H2, W=W, W2=W2, TR=TR)
        return pl.pallas_call(
            kernel, out_shape=out_shape, grid=grid,
            in_specs=[x_spec, ewtr_spec, sh_spec, wv_spec, bf_spec],
            out_specs=out_spec,
            scratch_shapes=[pltpu.VMEM((C * H, CW2), jnp.float32), up_scratch],
            compiler_params=cparams(wbytes + (C * H + C * (TR + 2)) * CW2 * 4),
        )(x, ewt_rep, sh, wv, bf)


# ---------------------------------------------------------------------------
# pure-JAX reference for verification
# ---------------------------------------------------------------------------
def _reference(x, module, target_size=None):
    N, C, H, W = x.shape
    if target_size is None:
        H2, W2 = 2 * H, 2 * W
    elif isinstance(target_size, int):
        H2, W2 = target_size, target_size
    else:
        H2, W2 = target_size
    sh = (jnp.arange(H2) * H) // H2
    sw = (jnp.arange(W2) * W) // W2
    up = x[:, :, sh, :][:, :, :, sw]
    if not module.use_conv:
        return up
    out = lax.conv_general_dilated(
        up.astype(jnp.float32), module.weight, window_strides=(1, 1),
        padding="SAME", dimension_numbers=("NCHW", "OIHW", "NCHW"))
    return (out + module.bias[None, :, None, None]).astype(x.dtype)


# ---------------------------------------------------------------------------
if __name__ == "__main__":
    key = jax.random.PRNGKey(0)
    kx, kp = jax.random.split(key)

    N, C, H, W = 2, 4, 16, 16
    x = jax.random.normal(kx, (N, C, H, W), jnp.float32)

    up_conv = Upsample(C, use_conv=True, key=kp)

    # default scale_factor=2, auto row tile
    out = jax.block_until_ready(up_conv(x))
    ref = _reference(x, up_conv)
    assert out.shape == (N, C, 2 * H, 2 * W), out.shape
    assert jnp.allclose(out, ref, atol=1e-4, rtol=1e-4), (
        float(jnp.max(jnp.abs(out - ref))))

    # forced smaller row tile -> grid (N, 2), exercises the vertical halo path
    out_t = jax.block_until_ready(up_conv(x, row_tile=16))
    assert jnp.allclose(out_t, ref, atol=1e-4, rtol=1e-4), (
        float(jnp.max(jnp.abs(out_t - ref))))

    # explicit target_size with non-integer H ratio (row-tiled fallback + halos)
    out_ts = jax.block_until_ready(up_conv(x, target_size=(24, 40), row_tile=8))
    ref_ts = _reference(x, up_conv, target_size=(24, 40))
    assert out_ts.shape == (N, C, 24, 40), out_ts.shape
    assert jnp.allclose(out_ts, ref_ts, atol=1e-4, rtol=1e-4), (
        float(jnp.max(jnp.abs(out_ts - ref_ts))))

    # use_conv=False paths (pure nearest upsample: integer and fractional ratios)
    up_plain = Upsample(C, use_conv=False)
    out2 = jax.block_until_ready(up_plain(x))
    ref2 = _reference(x, up_plain)
    assert out2.shape == (N, C, 2 * H, 2 * W), out2.shape
    assert jnp.allclose(out2, ref2, atol=1e-5, rtol=1e-5), (
        float(jnp.max(jnp.abs(out2 - ref2))))

    out3 = jax.block_until_ready(up_plain(x, target_size=(24, 40)))
    ref3 = _reference(x, up_plain, target_size=(24, 40))
    assert jnp.allclose(out3, ref3, atol=1e-5, rtol=1e-5), (
        float(jnp.max(jnp.abs(out3 - ref3))))

    print("KERNEL_OK")
</pallas_src>

<mosaic_0001>
module attributes {stable_mosaic.version = 11 : i64} {
  func.func @_upsample_conv_int_kernel(%arg0: i32, %arg1: i32, %arg2: memref<1x4x16x16xf32, #tpu.memory_space<vmem>>, %arg3: memref<16x128xf32, #tpu.memory_space<vmem>>, %arg4: memref<36x128xf32, #tpu.memory_space<vmem>>, %arg5: memref<1x128xf32, #tpu.memory_space<vmem>>, %arg6: memref<1x4x32x32xf32, #tpu.memory_space<vmem>>, %arg7: memref<4x34x128xf32, #tpu.memory_space<vmem>>) attributes {dimension_semantics = [#tpu.dimension_semantics<parallel>, #tpu.dimension_semantics<arbitrary>], iteration_bounds = array<i64: 2, 1>, scalar_prefetch = 0 : i64, scratch_operands = 1 : i64, tpu.core_type = #tpu.core_type<tc>, window_params = [{transform_indices = @transform_0, window_bounds = array<i64: 1, 4, 16, 16>}, {pipeline_mode = #tpu.pipeline_mode<synchronous>, transform_indices = @transform_1, window_bounds = array<i64: 16, 128>}, {pipeline_mode = #tpu.pipeline_mode<synchronous>, transform_indices = @transform_2, window_bounds = array<i64: 36, 128>}, {pipeline_mode = #tpu.pipeline_mode<synchronous>, transform_indices = @transform_3, window_bounds = array<i64: 1, 128>}, {transform_indices = @transform_4, window_bounds = array<i64: 1, 4, 32, 32>}]} {
    %c16_i32 = arith.constant 16 : i32
    %0 = arith.muli %arg1, %c16_i32 : i32
    %1 = tpu.assume_multiple %0, 16 : i32
    %c0 = arith.constant 0 : index
    %c0_0 = arith.constant 0 : index
    %2 = arith.index_cast %1 : i32 to index
    %c0_1 = arith.constant 0 : index
    %3 = vector.load %arg2[%c0, %c0_0, %2, %c0_1] : memref<1x4x16x16xf32, #tpu.memory_space<vmem>>, vector<1x4x16x16xf32>
    %4 = vector.shape_cast %3 : vector<1x4x16x16xf32> to vector<4x16x16xf32>
    %5 = vector.shape_cast %4 : vector<4x16x16xf32> to vector<64x16xf32>
    %c0_2 = arith.constant 0 : index
    %c0_3 = arith.constant 0 : index
    %6 = vector.load %arg3[%c0_2, %c0_3] : memref<16x128xf32, #tpu.memory_space<vmem>>, vector<16x128xf32>
    %cst = arith.constant dense<0.000000e+00> : vector<64x128xf32>
    %7 = tpu.matmul %5, %6, %cst {dimension_numbers = #tpu.dot_dimension_numbers<[1], [0], [0], [1], [0, 0, 1, 1], [], []>} : vector<64x16xf32>, vector<16x128xf32>, vector<64x128xf32> -> vector<64x128xf32>
    %8 = vector.extract_strided_slice %7 {offsets = [0, 0], sizes = [1, 128], strides = [1, 1]} : vector<64x128xf32> to vector<1x128xf32>
    %9 = vector.shape_cast %8 : vector<1x128xf32> to vector<1x128xf32>
    %10 = vector.broadcast %9 : vector<1x128xf32> to vector<2x128xf32>
    %11 = vector.extract_strided_slice %7 {offsets = [1, 0], sizes = [1, 128], strides = [1, 1]} : vector<64x128xf32> to vector<1x128xf32>
    %12 = vector.shape_cast %11 : vector<1x128xf32> to vector<1x128xf32>
    %13 = vector.broadcast %12 : vector<1x128xf32> to vector<2x128xf32>
    %14 = vector.extract_strided_slice %7 {offsets = [2, 0], sizes = [1, 128], strides = [1, 1]} : vector<64x128xf32> to vector<1x128xf32>
    %15 = vector.shape_cast %14 : vector<1x128xf32> to vector<1x128xf32>
    %16 = vector.broadcast %15 : vector<1x128xf32> to vector<2x128xf32>
    %17 = vector.extract_strided_slice %7 {offsets = [3, 0], sizes = [1, 128], strides = [1, 1]} : vector<64x128xf32> to vector<1x128xf32>
    %18 = vector.shape_cast %17 : vector<1x128xf32> to vector<1x128xf32>
    %19 = vector.broadcast %18 : vector<1x128xf32> to vector<2x128xf32>
    %20 = vector.extract_strided_slice %7 {offsets = [4, 0], sizes = [1, 128], strides = [1, 1]} : vector<64x128xf32> to vector<1x128xf32>
    %21 = vector.shape_cast %20 : vector<1x128xf32> to vector<1x128xf32>
    %22 = vector.broadcast %21 : vector<1x128xf32> to vector<2x128xf32>
    %23 = vector.extract_strided_slice %7 {offsets = [5, 0], sizes = [1, 128], strides = [1, 1]} : vector<64x128xf32> to vector<1x128xf32>
    %24 = vector.shape_cast %23 : vector<1x128xf32> to vector<1x128xf32>
    %25 = vector.broadcast %24 : vector<1x128xf32> to vector<2x128xf32>
    %26 = vector.extract_strided_slice %7 {offsets = [6, 0], sizes = [1, 128], strides = [1, 1]} : vector<64x128xf32> to vector<1x128xf32>
    %27 = vector.shape_cast %26 : vector<1x128xf32> to vector<1x128xf32>
    %28 = vector.broadcast %27 : vector<1x128xf32> to vector<2x128xf32>
    %29 = vector.extract_strided_slice %7 {offsets = [7, 0], sizes = [1, 128], strides = [1, 1]} : vector<64x128xf32> to vector<1x128xf32>
    %30 = vector.shape_cast %29 : vector<1x128xf32> to vector<1x128xf32>
    %31 = vector.broadcast %30 : vector<1x128xf32> to vector<2x128xf32>
    %32 = vector.extract_strided_slice %7 {offsets = [8, 0], sizes = [1, 128], strides = [1, 1]} : vector<64x128xf32> to vector<1x128xf32>
    %33 = vector.shape_cast %32 : vector<1x128xf32> to vector<1x128xf32>
    %34 = vector.broadcast %33 : vector<1x128xf32> to vector<2x128xf32>
    %35 = vector.extract_strided_slice %7 {offsets = [9, 0], sizes = [1, 128], strides = [1, 1]} : vector<64x128xf32> to vector<1x128xf32>
    %36 = vector.shape_cast %35 : vector<1x128xf32> to vector<1x128xf32>
    %37 = vector.broadcast %36 : vector<1x128xf32> to vector<2x128xf32>
    %38 = vector.extract_strided_slice %7 {offsets = [10, 0], sizes = [1, 128], strides = [1, 1]} : vector<64x128xf32> to vector<1x128xf32>
    %39 = vector.shape_cast %38 : vector<1x128xf32> to vector<1x128xf32>
    %40 = vector.broadcast %39 : vector<1x128xf32> to vector<2x128xf32>
    %41 = vector.extract_strided_slice %7 {offsets = [11, 0], sizes = [1, 128], strides = [1, 1]} : vector<64x128xf32> to vector<1x128xf32>
    %42 = vector.shape_cast %41 : vector<1x128xf32> to vector<1x128xf32>
    %43 = vector.broadcast %42 : vector<1x128xf32> to vector<2x128xf32>
    %44 = vector.extract_strided_slice %7 {offsets = [12, 0], sizes = [1, 128], strides = [1, 1]} : vector<64x128xf32> to vector<1x128xf32>
    %45 = vector.shape_cast %44 : vector<1x128xf32> to vector<1x128xf32>
    %46 = vector.broadcast %45 : vector<1x128xf32> to vector<2x128xf32>
    %47 = vector.extract_strided_slice %7 {offsets = [13, 0], sizes = [1, 128], strides = [1, 1]} : vector<64x128xf32> to vector<1x128xf32>
    %48 = vector.shape_cast %47 : vector<1x128xf32> to vector<1x128xf32>
    %49 = vector.broadcast %48 : vector<1x128xf32> to vector<2x128xf32>
    %50 = vector.extract_strided_slice %7 {offsets = [14, 0], sizes = [1, 128], strides = [1, 1]} : vector<64x128xf32> to vector<1x128xf32>
    %51 = vector.shape_cast %50 : vector<1x128xf32> to vector<1x128xf32>
    %52 = vector.broadcast %51 : vector<1x128xf32> to vector<2x128xf32>
    %53 = vector.extract_strided_slice %7 {offsets = [15, 0], sizes = [1, 128], strides = [1, 1]} : vector<64x128xf32> to vector<1x128xf32>
    %54 = vector.shape_cast %53 : vector<1x128xf32> to vector<1x128xf32>
    %55 = vector.broadcast %54 : vector<1x128xf32> to vector<2x128xf32>
    %56 = tpu.concatenate %10, %13, %16, %19, %22, %25, %28, %31, %34, %37, %40, %43, %46, %49, %52, %55 in 0 : vector<2x128xf32>, vector<2x128xf32>, vector<2x128xf32>, vector<2x128xf32>, vector<2x128xf32>, vector<2x128xf32>, vector<2x128xf32>, vector<2x128xf32>, vector<2x128xf32>, vector<2x128xf32>, vector<2x128xf32>, vector<2x128xf32>, vector<2x128xf32>, vector<2x128xf32>, vector<2x128xf32>, vector<2x128xf32> -> vector<32x128xf32>
    %c0_4 = arith.constant 0 : index
    %c1 = arith.constant 1 : index
    %c0_5 = arith.constant 0 : index
    %57 = vector.load %arg7[%c0_4, %c1, %c0_5] : memref<4x34x128xf32, #tpu.memory_space<vmem>>, vector<1x32x128xf32>
    %58 = vector.shape_cast %57 : vector<1x32x128xf32> to vector<32x128xf32>
    %59 = vector.shape_cast %56 : vector<32x128xf32> to vector<1x32x128xf32>
    tpu.vector_store %arg7[%c0_4, %c1, %c0_5], %59 {strides = array<i32>} : memref<4x34x128xf32, #tpu.memory_space<vmem>>, vector<1x32x128xf32>,
    %60 = vector.extract_strided_slice %7 {offsets = [16, 0], sizes = [1, 128], strides = [1, 1]} : vector<64x128xf32> to vector<1x128xf32>
    %61 = vector.shape_cast %60 : vector<1x128xf32> to vector<1x128xf32>
    %62 = vector.broadcast %61 : vector<1x128xf32> to vector<2x128xf32>
    %63 = vector.extract_strided_slice %7 {offsets = [17, 0], sizes = [1, 128], strides = [1, 1]} : vector<64x128xf32> to vector<1x128xf32>
    %64 = vector.shape_cast %63 : vector<1x128xf32> to vector<1x128xf32>
    %65 = vector.broadcast %64 : vector<1x128xf32> to vector<2x128xf32>
    %66 = vector.extract_strided_slice %7 {offsets = [18, 0], sizes = [1, 128], strides = [1, 1]} : vector<64x128xf32> to vector<1x128xf32>
    %67 = vector.shape_cast %66 : vector<1x128xf32> to vector<1x128xf32>
    %68 = vector.broadcast %67 : vector<1x128xf32> to vector<2x128xf32>
    %69 = vector.extract_strided_slice %7 {offsets = [19, 0], sizes = [1, 128], strides = [1, 1]} : vector<64x128xf32> to vector<1x128xf32>
    %70 = vector.shape_cast %69 : vector<1x128xf32> to vector<1x128xf32>
    %71 = vector.broadcast %70 : vector<1x128xf32> to vector<2x128xf32>
    %72 = vector.extract_strided_slice %7 {offsets = [20, 0], sizes = [1, 128], strides = [1, 1]} : vector<64x128xf32> to vector<1x128xf32>
    %73 = vector.shape_cast %72 : vector<1x128xf32> to vector<1x128xf32>
    %74 = vector.broadcast %73 : vector<1x128xf32> to vector<2x128xf32>
    %75 = vector.extract_strided_slice %7 {offsets = [21, 0], sizes = [1, 128], strides = [1, 1]} : vector<64x128xf32> to vector<1x128xf32>
    %76 = vector.shape_cast %75 : vector<1x128xf32> to vector<1x128xf32>
    %77 = vector.broadcast %76 : vector<1x128xf32> to vector<2x128xf32>
    %78 = vector.extract_strided_slice %7 {offsets = [22, 0], sizes = [1, 128], strides = [1, 1]} : vector<64x128xf32> to vector<1x128xf32>
    %79 = vector.shape_cast %78 : vector<1x128xf32> to vector<1x128xf32>
    %80 = vector.broadcast %79 : vector<1x128xf32> to vector<2x128xf32>
    %81 = vector.extract_strided_slice %7 {offsets = [23, 0], sizes = [1, 128], strides = [1, 1]} : vector<64x128xf32> to vector<1x128xf32>
    %82 = vector.shape_cast %81 : vector<1x128xf32> to vector<1x128xf32>
    %83 = vector.broadcast %82 : vector<1x128xf32> to vector<2x128xf32>
    %84 = vector.extract_strided_slice %7 {offsets = [24, 0], sizes = [1, 128], strides = [1, 1]} : vector<64x128xf32> to vector<1x128xf32>
    %85 = vector.shape_cast %84 : vector<1x128xf32> to vector<1x128xf32>
    %86 = vector.broadcast %85 : vector<1x128xf32> to vector<2x128xf32>
    %87 = vector.extract_strided_slice %7 {offsets = [25, 0], sizes = [1, 128], strides = [1, 1]} : vector<64x128xf32> to vector<1x128xf32>
    %88 = vector.shape_cast %87 : vector<1x128xf32> to vector<1x128xf32>
    %89 = vector.broadcast %88 : vector<1x128xf32> to vector<2x128xf32>
    %90 = vector.extract_strided_slice %7 {offsets = [26, 0], sizes = [1, 128], strides = [1, 1]} : vector<64x128xf32> to vector<1x128xf32>
    %91 = vector.shape_cast %90 : vector<1x128xf32> to vector<1x128xf32>
    %92 = vector.broadcast %91 : vector<1x128xf32> to vector<2x128xf32>
    %93 = vector.extract_strided_slice %7 {offsets = [27, 0], sizes = [1, 128], strides = [1, 1]} : vector<64x128xf32> to vector<1x128xf32>
    %94 = vector.shape_cast %93 : vector<1x128xf32> to vector<1x128xf32>
    %95 = vector.broadcast %94 : vector<1x128xf32> to vector<2x128xf32>
    %96 = vector.extract_strided_slice %7 {offsets = [28, 0], sizes = [1, 128], strides = [1, 1]} : vector<64x128xf32> to vector<1x128xf32>
    %97 = vector.shape_cast %96 : vector<1x128xf32> to vector<1x128xf32>
    %98 = vector.broadcast %97 : vector<1x128xf32> to vector<2x128xf32>
    %99 = vector.extract_strided_slice %7 {offsets = [29, 0], sizes = [1, 128], strides = [1, 1]} : vector<64x128xf32> to vector<1x128xf32>
    %100 = vector.shape_cast %99 : vector<1x128xf32> to vector<1x128xf32>
    %101 = vector.broadcast %100 : vector<1x128xf32> to vector<2x128xf32>
    %102 = vector.extract_strided_slice %7 {offsets = [30, 0], sizes = [1, 128], strides = [1, 1]} : vector<64x128xf32> to vector<1x128xf32>
    %103 = vector.shape_cast %102 : vector<1x128xf32> to vector<1x128xf32>
    %104 = vector.broadcast %103 : vector<1x128xf32> to vector<2x128xf32>
    %105 = vector.extract_strided_slice %7 {offsets = [31, 0], sizes = [1, 128], strides = [1, 1]} : vector<64x128xf32> to vector<1x128xf32>
    %106 = vector.shape_cast %105 : vector<1x128xf32> to vector<1x128xf32>
    %107 = vector.broadcast %106 : vector<1x128xf32> to vector<2x128xf32>
    %108 = tpu.concatenate %62, %65, %68, %71, %74, %77, %80, %83, %86, %89, %92, %95, %98, %101, %104, %107 in 0 : vector<2x128xf32>, vector<2x128xf32>, vector<2x128xf32>, vector<2x128xf32>, vector<2x128xf32>, vector<2x128xf32>, vector<2x128xf32>, vector<2x128xf32>, vector<2x128xf32>, vector<2x128xf32>, vector<2x128xf32>, vector<2x128xf32>, vector<2x128xf32>, vector<2x128xf32>, vector<2x128xf32>, vector<2x128xf32> -> vector<32x128xf32>
    %c1_6 = arith.constant 1 : index
    %c1_7 = arith.constant 1 : index
    %c0_8 = arith.constant 0 : index
    %109 = vector.load %arg7[%c1_6, %c1_7, %c0_8] : memref<4x34x128xf32, #tpu.memory_space<vmem>>, vector<1x32x128xf32>
    %110 = vector.shape_cast %109 : vector<1x32x128xf32> to vector<32x128xf32>
    %111 = vector.shape_cast %108 : vector<32x128xf32> to vector<1x32x128xf32>
    tpu.vector_store %arg7[%c1_6, %c1_7, %c0_8], %111 {strides = array<i32>} : memref<4x34x128xf32, #tpu.memory_space<vmem>>, vector<1x32x128xf32>,
    %112 = vector.extract_strided_slice %7 {offsets = [32, 0], sizes = [1, 128], strides = [1, 1]} : vector<64x128xf32> to vector<1x128xf32>
    %113 = vector.shape_cast %112 : vector<1x128xf32> to vector<1x128xf32>
    %114 = vector.broadcast %113 : vector<1x128xf32> to vector<2x128xf32>
    %115 = vector.extract_strided_slice %7 {offsets = [33, 0], sizes = [1, 128], strides = [1, 1]} : vector<64x128xf32> to vector<1x128xf32>
    %116 = vector.shape_cast %115 : vector<1x128xf32> to vector<1x128xf32>
    %117 = vector.broadcast %116 : vector<1x128xf32> to vector<2x128xf32>
    %118 = vector.extract_strided_slice %7 {offsets = [34, 0], sizes = [1, 128], strides = [1, 1]} : vector<64x128xf32> to vector<1x128xf32>
    %119 = vector.shape_cast %118 : vector<1x128xf32> to vector<1x128xf32>
    %120 = vector.broadcast %119 : vector<1x128xf32> to vector<2x128xf32>
    %121 = vector.extract_strided_slice %7 {offsets = [35, 0], sizes = [1, 128], strides = [1, 1]} : vector<64x128xf32> to vector<1x128xf32>
    %122 = vector.shape_cast %121 : vector<1x128xf32> to vector<1x128xf32>
    %123 = vector.broadcast %122 : vector<1x128xf32> to vector<2x128xf32>
    %124 = vector.extract_strided_slice %7 {offsets = [36, 0], sizes = [1, 128], strides = [1, 1]} : vector<64x128xf32> to vector<1x128xf32>
    %125 = vector.shape_cast %124 : vector<1x128xf32> to vector<1x128xf32>
    %126 = vector.broadcast %125 : vector<1x128xf32> to vector<2x128xf32>
    %127 = vector.extract_strided_slice %7 {offsets = [37, 0], sizes = [1, 128], strides = [1, 1]} : vector<64x128xf32> to vector<1x128xf32>
    %128 = vector.shape_cast %127 : vector<1x128xf32> to vector<1x128xf32>
    %129 = vector.broadcast %128 : vector<1x128xf32> to vector<2x128xf32>
    %130 = vector.extract_strided_slice %7 {offsets = [38, 0], sizes = [1, 128], strides = [1, 1]} : vector<64x128xf32> to vector<1x128xf32>
    %131 = vector.shape_cast %130 : vector<1x128xf32> to vector<1x128xf32>
    %132 = vector.broadcast %131 : vector<1x128xf32> to vector<2x128xf32>
    %133 = vector.extract_strided_slice %7 {offsets = [39, 0], sizes = [1, 128], strides = [1, 1]} : vector<64x128xf32> to vector<1x128xf32>
    %134 = vector.shape_cast %133 : vector<1x128xf32> to vector<1x128xf32>
    %135 = vector.broadcast %134 : vector<1x128xf32> to vector<2x128xf32>
    %136 = vector.extract_strided_slice %7 {offsets = [40, 0], sizes = [1, 128], strides = [1, 1]} : vector<64x128xf32> to vector<1x128xf32>
    %137 = vector.shape_cast %136 : vector<1x128xf32> to vector<1x128xf32>
    %138 = vector.broadcast %137 : vector<1x128xf32> to vector<2x128xf32>
    %139 = vector.extract_strided_slice %7 {offsets = [41, 0], sizes = [1, 128], strides = [1, 1]} : vector<64x128xf32> to vector<1x128xf32>
    %140 = vector.shape_cast %139 : vector<1x128xf32> to vector<1x128xf32>
    %141 = vector.broadcast %140 : vector<1x128xf32> to vector<2x128xf32>
    %142 = vector.extract_strided_slice %7 {offsets = [42, 0], sizes = [1, 128], strides = [1, 1]} : vector<64x128xf32> to vector<1x128xf32>
    %143 = vector.shape_cast %142 : vector<1x128xf32> to vector<1x128xf32>
    %144 = vector.broadcast %143 : vector<1x128xf32> to vector<2x128xf32>
    %145 = vector.extract_strided_slice %7 {offsets = [43, 0], sizes = [1, 128], strides = [1, 1]} : vector<64x128xf32> to vector<1x128xf32>
    %146 = vector.shape_cast %145 : vector<1x128xf32> to vector<1x128xf32>
    %147 = vector.broadcast %146 : vector<1x128xf32> to vector<2x128xf32>
    %148 = vector.extract_strided_slice %7 {offsets = [44, 0], sizes = [1, 128], strides = [1, 1]} : vector<64x128xf32> to vector<1x128xf32>
    %149 = vector.shape_cast %148 : vector<1x128xf32> to vector<1x128xf32>
    %150 = vector.broadcast %149 : vector<1x128xf32> to vector<2x128xf32>
    %151 = vector.extract_strided_slice %7 {offsets = [45, 0], sizes = [1, 128], strides = [1, 1]} : vector<64x128xf32> to vector<1x128xf32>
    %152 = vector.shape_cast %151 : vector<1x128xf32> to vector<1x128xf32>
    %153 = vector.broadcast %152 : vector<1x128xf32> to vector<2x128xf32>
    %154 = vector.extract_strided_slice %7 {offsets = [46, 0], sizes = [1, 128], strides = [1, 1]} : vector<64x128xf32> to vector<1x128xf32>
    %155 = vector.shape_cast %154 : vector<1x128xf32> to vector<1x128xf32>
    %156 = vector.broadcast %155 : vector<1x128xf32> to vector<2x128xf32>
    %157 = vector.extract_strided_slice %7 {offsets = [47, 0], sizes = [1, 128], strides = [1, 1]} : vector<64x128xf32> to vector<1x128xf32>
    %158 = vector.shape_cast %157 : vector<1x128xf32> to vector<1x128xf32>
    %159 = vector.broadcast %158 : vector<1x128xf32> to vector<2x128xf32>
    %160 = tpu.concatenate %114, %117, %120, %123, %126, %129, %132, %135, %138, %141, %144, %147, %150, %153, %156, %159 in 0 : vector<2x128xf32>, vector<2x128xf32>, vector<2x128xf32>, vector<2x128xf32>, vector<2x128xf32>, vector<2x128xf32>, vector<2x128xf32>, vector<2x128xf32>, vector<2x128xf32>, vector<2x128xf32>, vector<2x128xf32>, vector<2x128xf32>, vector<2x128xf32>, vector<2x128xf32>, vector<2x128xf32>, vector<2x128xf32> -> vector<32x128xf32>
    %c2 = arith.constant 2 : index
    %c1_9 = arith.constant 1 : index
    %c0_10 = arith.constant 0 : index
    %161 = vector.load %arg7[%c2, %c1_9, %c0_10] : memref<4x34x128xf32, #tpu.memory_space<vmem>>, vector<1x32x128xf32>
    %162 = vector.shape_cast %161 : vector<1x32x128xf32> to vector<32x128xf32>
    %163 = vector.shape_cast %160 : vector<32x128xf32> to vector<1x32x128xf32>
    tpu.vector_store %arg7[%c2, %c1_9, %c0_10], %163 {strides = array<i32>} : memref<4x34x128xf32, #tpu.memory_space<vmem>>, vector<1x32x128xf32>,
    %164 = vector.extract_strided_slice %7 {offsets = [48, 0], sizes = [1, 128], strides = [1, 1]} : vector<64x128xf32> to vector<1x128xf32>
    %165 = vector.shape_cast %164 : vector<1x128xf32> to vector<1x128xf32>
    %166 = vector.broadcast %165 : vector<1x128xf32> to vector<2x128xf32>
    %167 = vector.extract_strided_slice %7 {offsets = [49, 0], sizes = [1, 128], strides = [1, 1]} : vector<64x128xf32> to vector<1x128xf32>
    %168 = vector.shape_cast %167 : vector<1x128xf32> to vector<1x128xf32>
    %169 = vector.broadcast %168 : vector<1x128xf32> to vector<2x128xf32>
    %170 = vector.extract_strided_slice %7 {offsets = [50, 0], sizes = [1, 128], strides = [1, 1]} : vector<64x128xf32> to vector<1x128xf32>
    %171 = vector.shape_cast %170 : vector<1x128xf32> to vector<1x128xf32>
    %172 = vector.broadcast %171 : vector<1x128xf32> to vector<2x128xf32>
    %173 = vector.extract_strided_slice %7 {offsets = [51, 0], sizes = [1, 128], strides = [1, 1]} : vector<64x128xf32> to vector<1x128xf32>
    %174 = vector.shape_cast %173 : vector<1x128xf32> to vector<1x128xf32>
    %175 = vector.broadcast %174 : vector<1x128xf32> to vector<2x128xf32>
    %176 = vector.extract_strided_slice %7 {offsets = [52, 0], sizes = [1, 128], strides = [1, 1]} : vector<64x128xf32> to vector<1x128xf32>
    %177 = vector.shape_cast %176 : vector<1x128xf32> to vector<1x128xf32>
    %178 = vector.broadcast %177 : vector<1x128xf32> to vector<2x128xf32>
    %179 = vector.extract_strided_slice %7 {offsets = [53, 0], sizes = [1, 128], strides = [1, 1]} : vector<64x128xf32> to vector<1x128xf32>
    %180 = vector.shape_cast %179 : vector<1x128xf32> to vector<1x128xf32>
    %181 = vector.broadcast %180 : vector<1x128xf32> to vector<2x128xf32>
    %182 = vector.extract_strided_slice %7 {offsets = [54, 0], sizes = [1, 128], strides = [1, 1]} : vector<64x128xf32> to vector<1x128xf32>
    %183 = vector.shape_cast %182 : vector<1x128xf32> to vector<1x128xf32>
    %184 = vector.broadcast %183 : vector<1x128xf32> to vector<2x128xf32>
    %185 = vector.extract_strided_slice %7 {offsets = [55, 0], sizes = [1, 128], strides = [1, 1]} : vector<64x128xf32> to vector<1x128xf32>
    %186 = vector.shape_cast %185 : vector<1x128xf32> to vector<1x128xf32>
    %187 = vector.broadcast %186 : vector<1x128xf32> to vector<2x128xf32>
    %188 = vector.extract_strided_slice %7 {offsets = [56, 0], sizes = [1, 128], strides = [1, 1]} : vector<64x128xf32> to vector<1x128xf32>
    %189 = vector.shape_cast %188 : vector<1x128xf32> to vector<1x128xf32>
    %190 = vector.broadcast %189 : vector<1x128xf32> to vector<2x128xf32>
    %191 = vector.extract_strided_slice %7 {offsets = [57, 0], sizes = [1, 128], strides = [1, 1]} : vector<64x128xf32> to vector<1x128xf32>
    %192 = vector.shape_cast %191 : vector<1x128xf32> to vector<1x128xf32>
    %193 = vector.broadcast %192 : vector<1x128xf32> to vector<2x128xf32>
    %194 = vector.extract_strided_slice %7 {offsets = [58, 0], sizes = [1, 128], strides = [1, 1]} : vector<64x128xf32> to vector<1x128xf32>
    %195 = vector.shape_cast %194 : vector<1x128xf32> to vector<1x128xf32>
    %196 = vector.broadcast %195 : vector<1x128xf32> to vector<2x128xf32>
    %197 = vector.extract_strided_slice %7 {offsets = [59, 0], sizes = [1, 128], strides = [1, 1]} : vector<64x128xf32> to vector<1x128xf32>
    %198 = vector.shape_cast %197 : vector<1x128xf32> to vector<1x128xf32>
    %199 = vector.broadcast %198 : vector<1x128xf32> to vector<2x128xf32>
    %200 = vector.extract_strided_slice %7 {offsets = [60, 0], sizes = [1, 128], strides = [1, 1]} : vector<64x128xf32> to vector<1x128xf32>
    %201 = vector.shape_cast %200 : vector<1x128xf32> to vector<1x128xf32>
    %202 = vector.broadcast %201 : vector<1x128xf32> to vector<2x128xf32>
    %203 = vector.extract_strided_slice %7 {offsets = [61, 0], sizes = [1, 128], strides = [1, 1]} : vector<64x128xf32> to vector<1x128xf32>
    %204 = vector.shape_cast %203 : vector<1x128xf32> to vector<1x128xf32>
    %205 = vector.broadcast %204 : vector<1x128xf32> to vector<2x128xf32>
    %206 = vector.extract_strided_slice %7 {offsets = [62, 0], sizes = [1, 128], strides = [1, 1]} : vector<64x128xf32> to vector<1x128xf32>
    %207 = vector.shape_cast %206 : vector<1x128xf32> to vector<1x128xf32>
    %208 = vector.broadcast %207 : vector<1x128xf32> to vector<2x128xf32>
    %209 = vector.extract_strided_slice %7 {offsets = [63, 0], sizes = [1, 128], strides = [1, 1]} : vector<64x128xf32> to vector<1x128xf32>
    %210 = vector.shape_cast %209 : vector<1x128xf32> to vector<1x128xf32>
    %211 = vector.broadcast %210 : vector<1x128xf32> to vector<2x128xf32>
    %212 = tpu.concatenate %166, %169, %172, %175, %178, %181, %184, %187, %190, %193, %196, %199, %202, %205, %208, %211 in 0 : vector<2x128xf32>, vector<2x128xf32>, vector<2x128xf32>, vector<2x128xf32>, vector<2x128xf32>, vector<2x128xf32>, vector<2x128xf32>, vector<2x128xf32>, vector<2x128xf32>, vector<2x128xf32>, vector<2x128xf32>, vector<2x128xf32>, vector<2x128xf32>, vector<2x128xf32>, vector<2x128xf32>, vector<2x128xf32> -> vector<32x128xf32>
    %c3 = arith.constant 3 : index
    %c1_11 = arith.constant 1 : index
    %c0_12 = arith.constant 0 : index
    %213 = vector.load %arg7[%c3, %c1_11, %c0_12] : memref<4x34x128xf32, #tpu.memory_space<vmem>>, vector<1x32x128xf32>
    %214 = vector.shape_cast %213 : vector<1x32x128xf32> to vector<32x128xf32>
    %215 = vector.shape_cast %212 : vector<32x128xf32> to vector<1x32x128xf32>
    tpu.vector_store %arg7[%c3, %c1_11, %c0_12], %215 {strides = array<i32>} : memref<4x34x128xf32, #tpu.memory_space<vmem>>, vector<1x32x128xf32>,
    %c1_i32 = arith.constant 1 : i32
    %216 = arith.subi %1, %c1_i32 : i32
    %c0_i32 = arith.constant 0 : i32
    %217 = arith.maxsi %216, %c0_i32 : i32
    %c0_13 = arith.constant 0 : index
    %c0_14 = arith.constant 0 : index
    %218 = arith.index_cast %217 : i32 to index
    %c0_15 = arith.constant 0 : index
    %219 = vector.load %arg2[%c0_13, %c0_14, %218, %c0_15] : memref<1x4x16x16xf32, #tpu.memory_space<vmem>>, vector<1x4x1x16xf32>
    %220 = vector.shape_cast %219 : vector<1x4x1x16xf32> to vector<4x1x16xf32>
    %221 = vector.shape_cast %220 : vector<4x1x16xf32> to vector<4x16xf32>
    %c0_16 = arith.constant 0 : index
    %c0_17 = arith.constant 0 : index
    %222 = vector.load %arg3[%c0_16, %c0_17] : memref<16x128xf32, #tpu.memory_space<vmem>>, vector<16x128xf32>
    %cst_18 = arith.constant dense<0.000000e+00> : vector<4x128xf32>
    %223 = tpu.matmul %221, %222, %cst_18 {dimension_numbers = #tpu.dot_dimension_numbers<[1], [0], [0], [1], [0, 0, 1, 1], [], []>} : vector<4x16xf32>, vector<16x128xf32>, vector<4x128xf32> -> vector<4x128xf32>
    %c16_i32_19 = arith.constant 16 : i32
    %224 = arith.addi %1, %c16_i32_19 : i32
    %c15_i32 = arith.constant 15 : i32
    %225 = arith.minsi %224, %c15_i32 : i32
    %c0_20 = arith.constant 0 : index
    %c0_21 = arith.constant 0 : index
    %226 = arith.index_cast %225 : i32 to index
    %c0_22 = arith.constant 0 : index
    %227 = vector.load %arg2[%c0_20, %c0_21, %226, %c0_22] : memref<1x4x16x16xf32, #tpu.memory_space<vmem>>, vector<1x4x1x16xf32>
    %228 = vector.shape_cast %227 : vector<1x4x1x16xf32> to vector<4x1x16xf32>
    %229 = vector.shape_cast %228 : vector<4x1x16xf32> to vector<4x16xf32>
    %c0_23 = arith.constant 0 : index
    %c0_24 = arith.constant 0 : index
    %230 = vector.load %arg3[%c0_23, %c0_24] : memref<16x128xf32, #tpu.memory_space<vmem>>, vector<16x128xf32>
    %cst_25 = arith.constant dense<0.000000e+00> : vector<4x128xf32>
    %231 = tpu.matmul %229, %230, %cst_25 {dimension_numbers = #tpu.dot_dimension_numbers<[1], [0], [0], [1], [0, 0, 1, 1], [], []>} : vector<4x16xf32>, vector<16x128xf32>, vector<4x128xf32> -> vector<4x128xf32>
    %c0_i32_26 = arith.constant 0 : i32
    %232 = arith.cmpi sgt, %arg1, %c0_i32_26 : i32
    %cst_27 = arith.constant 0.000000e+00 : f32
    %233 = vector.broadcast %cst_27 : f32 to vector<4x128xf32>
    %234 = arith.select %232, %223, %233 : vector<4x128xf32>
    %c0_28 = arith.constant 0 : index
    %c0_29 = arith.constant 0 : index
    %c0_30 = arith.constant 0 : index
    %235 = vector.load %arg7[%c0_28, %c0_29, %c0_30] : memref<4x34x128xf32, #tpu.memory_space<vmem>>, vector<4x1x128xf32>
    %236 = vector.shape_cast %235 : vector<4x1x128xf32> to vector<4x128xf32>
    %237 = vector.shape_cast %234 : vector<4x128xf32> to vector<4x1x128xf32>
    tpu.vector_store %arg7[%c0_28, %c0_29, %c0_30], %237 {strides = array<i32>} : memref<4x34x128xf32, #tpu.memory_space<vmem>>, vector<4x1x128xf32>,
    %c0_i32_31 = arith.constant 0 : i32
    %238 = arith.cmpi slt, %arg1, %c0_i32_31 : i32
    %cst_32 = arith.constant 0.000000e+00 : f32
    %239 = vector.broadcast %cst_32 : f32 to vector<4x128xf32>
    %240 = arith.select %238, %231, %239 : vector<4x128xf32>
    %c0_33 = arith.constant 0 : index
    %c33 = arith.constant 33 : index
    %c0_34 = arith.constant 0 : index
    %241 = vector.load %arg7[%c0_33, %c33, %c0_34] : memref<4x34x128xf32, #tpu.memory_space<vmem>>, vector<4x1x128xf32>
    %242 = vector.shape_cast %241 : vector<4x1x128xf32> to vector<4x128xf32>
    %243 = vector.shape_cast %240 : vector<4x128xf32> to vector<4x1x128xf32>
    tpu.vector_store %arg7[%c0_33, %c33, %c0_34], %243 {strides = array<i32>} : memref<4x34x128xf32, #tpu.memory_space<vmem>>, vector<4x1x128xf32>,
    %244 = tpu.iota {dimensions = array<i32: 1>} : vector<1x128xi32>
    %c32_i32 = arith.constant 32 : i32
    %c0_i32_35 = arith.constant 0 : i32
    %245 = arith.cmpi eq, %c32_i32, %c0_i32_35 : i32
    %c1_i32_36 = arith.constant 1 : i32
    %246 = arith.select %245, %c1_i32_36, %c32_i32 : i32
    %247 = vector.broadcast %246 : i32 to vector<1x128xi32>
    %248 = arith.remsi %244, %247 : vector<1x128xi32>
    %c0_i32_37 = arith.constant 0 : i32
    %249 = vector.broadcast %c0_i32_37 : i32 to vector<1x128xi32>
    %250 = arith.cmpi ne, %248, %249 : vector<1x128xi32>
    %c0_i32_38 = arith.constant 0 : i32
    %251 = vector.broadcast %c0_i32_38 : i32 to vector<1x128xi32>
    %252 = arith.cmpi slt, %248, %251 : vector<1x128xi32>
    %c0_i32_39 = arith.constant 0 : i32
    %253 = arith.cmpi slt, %246, %c0_i32_39 : i32
    %254 = vector.broadcast %253 : i1 to vector<1x128xi1>
    %255 = vector.broadcast %254 : vector<1x128xi1> to vector<1x128xi1>
    %256 = arith.xori %252, %255 : vector<1x128xi1>
    %257 = arith.andi %256, %250 : vector<1x128xi1>
    %258 = vector.broadcast %246 : i32 to vector<1x128xi32>
    %259 = arith.addi %248, %258 : vector<1x128xi32>
    %260 = arith.select %257, %259, %248 : vector<1x128xi1>, vector<1x128xi32>
    %c0_i32_40 = arith.constant 0 : i32
    %261 = vector.broadcast %c0_i32_40 : i32 to vector<1x128xi32>
    %262 = arith.cmpi ne, %260, %261 : vector<1x128xi32>
    %c32_i32_41 = arith.constant 32 : i32
    %c0_i32_42 = arith.constant 0 : i32
    %263 = arith.cmpi eq, %c32_i32_41, %c0_i32_42 : i32
    %c1_i32_43 = arith.constant 1 : i32
    %264 = arith.select %263, %c1_i32_43, %c32_i32_41 : i32
    %265 = vector.broadcast %264 : i32 to vector<1x128xi32>
    %266 = arith.remsi %244, %265 : vector<1x128xi32>
    %c0_i32_44 = arith.constant 0 : i32
    %267 = vector.broadcast %c0_i32_44 : i32 to vector<1x128xi32>
    %268 = arith.cmpi ne, %266, %267 : vector<1x128xi32>
    %c0_i32_45 = arith.constant 0 : i32
    %269 = vector.broadcast %c0_i32_45 : i32 to vector<1x128xi32>
    %270 = arith.cmpi slt, %266, %269 : vector<1x128xi32>
    %c0_i32_46 = arith.constant 0 : i32
    %271 = arith.cmpi slt, %264, %c0_i32_46 : i32
    %272 = vector.broadcast %271 : i1 to vector<1x128xi1>
    %273 = vector.broadcast %272 : vector<1x128xi1> to vector<1x128xi1>
    %274 = arith.xori %270, %273 : vector<1x128xi1>
    %275 = arith.andi %274, %268 : vector<1x128xi1>
    %276 = vector.broadcast %264 : i32 to vector<1x128xi32>
    %277 = arith.addi %266, %276 : vector<1x128xi32>
    %278 = arith.select %275, %277, %266 : vector<1x128xi1>, vector<1x128xi32>
    %c31_i32 = arith.constant 31 : i32
    %279 = vector.broadcast %c31_i32 : i32 to vector<1x128xi32>
    %280 = arith.cmpi ne, %278, %279 : vector<1x128xi32>
    %cst_47 = arith.constant 0.000000e+00 : f32
    %281 = vector.broadcast %cst_47 : f32 to vector<32x1xf32>
    %c0_48 = arith.constant 0 : index
    %c0_49 = arith.constant 0 : index
    %282 = vector.load %arg5[%c0_48, %c0_49] : memref<1x128xf32, #tpu.memory_space<vmem>>, vector<1x128xf32>
    %283 = vector.shape_cast %282 : vector<1x128xf32> to vector<1x128xf32>
    %284 = vector.broadcast %283 : vector<1x128xf32> to vector<32x128xf32>
    %c0_50 = arith.constant 0 : index
    %c0_51 = arith.constant 0 : index
    %c0_52 = arith.constant 0 : index
    %285 = vector.load %arg7[%c0_50, %c0_51, %c0_52] : memref<4x34x128xf32, #tpu.memory_space<vmem>>, vector<1x32x128xf32>
    %286 = vector.shape_cast %285 : vector<1x32x128xf32> to vector<32x128xf32>
    %287 = vector.extract_strided_slice %286 {offsets = [0, 0], sizes = [32, 127], strides = [1, 1]} : vector<32x128xf32> to vector<32x127xf32>
    %288 = tpu.concatenate %281, %287 in 1 : vector<32x1xf32>, vector<32x127xf32> -> vector<32x128xf32>
    %cst_53 = arith.constant 0.000000e+00 : f32
    %289 = vector.shape_cast %262 : vector<1x128xi1> to vector<1x128xi1>
    %290 = vector.broadcast %289 : vector<1x128xi1> to vector<32x128xi1>
    %291 = vector.broadcast %cst_53 : f32 to vector<32x128xf32>
    %292 = arith.select %290, %288, %291 : vector<32x128xi1>, vector<32x128xf32>
    %c0_54 = arith.constant 0 : index
    %c0_55 = arith.constant 0 : index
    %293 = vector.load %arg4[%c0_54, %c0_55] : memref<36x128xf32, #tpu.memory_space<vmem>>, vector<1x128xf32>
    %294 = vector.shape_cast %293 : vector<1x128xf32> to vector<128xf32>
    %295 = vector.shape_cast %294 : vector<128xf32> to vector<1x128xf32>
    %296 = vector.broadcast %295 : vector<1x128xf32> to vector<32x128xf32>
    %297 = arith.mulf %292, %296 : vector<32x128xf32>
    %298 = arith.addf %284, %297 : vector<32x128xf32>
    %c1_56 = arith.constant 1 : index
    %c0_57 = arith.constant 0 : index
    %299 = vector.load %arg4[%c1_56, %c0_57] : memref<36x128xf32, #tpu.memory_space<vmem>>, vector<1x128xf32>
    %300 = vector.shape_cast %299 : vector<1x128xf32> to vector<128xf32>
    %301 = vector.shape_cast %300 : vector<128xf32> to vector<1x128xf32>
    %302 = vector.broadcast %301 : vector<1x128xf32> to vector<32x128xf32>
    %303 = arith.mulf %286, %302 : vector<32x128xf32>
    %304 = arith.addf %298, %303 : vector<32x128xf32>
    %305 = vector.extract_strided_slice %286 {offsets = [0, 1], sizes = [32, 127], strides = [1, 1]} : vector<32x128xf32> to vector<32x127xf32>
    %306 = tpu.concatenate %305, %281 in 1 : vector<32x127xf32>, vector<32x1xf32> -> vector<32x128xf32>
    %cst_58 = arith.constant 0.000000e+00 : f32
    %307 = vector.shape_cast %280 : vector<1x128xi1> to vector<1x128xi1>
    %308 = vector.broadcast %307 : vector<1x128xi1> to vector<32x128xi1>
    %309 = vector.broadcast %cst_58 : f32 to vector<32x128xf32>
    %310 = arith.select %308, %306, %309 : vector<32x128xi1>, vector<32x128xf32>
    %c2_59 = arith.constant 2 : index
    %c0_60 = arith.constant 0 : index
    %311 = vector.load %arg4[%c2_59, %c0_60] : memref<36x128xf32, #tpu.memory_space<vmem>>, vector<1x128xf32>
    %312 = vector.shape_cast %311 : vector<1x128xf32> to vector<128xf32>
    %313 = vector.shape_cast %312 : vector<128xf32> to vector<1x128xf32>
    %314 = vector.broadcast %313 : vector<1x128xf32> to vector<32x128xf32>
    %315 = arith.mulf %310, %314 : vector<32x128xf32>
    %316 = arith.addf %304, %315 : vector<32x128xf32>
    %c0_61 = arith.constant 0 : index
    %c1_62 = arith.constant 1 : index
    %c0_63 = arith.constant 0 : index
    %317 = vector.load %arg7[%c0_61, %c1_62, %c0_63] : memref<4x34x128xf32, #tpu.memory_space<vmem>>, vector<1x32x128xf32>
    %318 = vector.shape_cast %317 : vector<1x32x128xf32> to vector<32x128xf32>
    %319 = vector.extract_strided_slice %318 {offsets = [0, 0], sizes = [32, 127], strides = [1, 1]} : vector<32x128xf32> to vector<32x127xf32>
    %320 = tpu.concatenate %281, %319 in 1 : vector<32x1xf32>, vector<32x127xf32> -> vector<32x128xf32>
    %cst_64 = arith.constant 0.000000e+00 : f32
    %321 = vector.shape_cast %262 : vector<1x128xi1> to vector<1x128xi1>
    %322 = vector.broadcast %321 : vector<1x128xi1> to vector<32x128xi1>
    %323 = vector.broadcast %cst_64 : f32 to vector<32x128xf32>
    %324 = arith.select %322, %320, %323 : vector<32x128xi1>, vector<32x128xf32>
    %c3_65 = arith.constant 3 : index
    %c0_66 = arith.constant 0 : index
    %325 = vector.load %arg4[%c3_65, %c0_66] : memref<36x128xf32, #tpu.memory_space<vmem>>, vector<1x128xf32>
    %326 = vector.shape_cast %325 : vector<1x128xf32> to vector<128xf32>
    %327 = vector.shape_cast %326 : vector<128xf32> to vector<1x128xf32>
    %328 = vector.broadcast %327 : vector<1x128xf32> to vector<32x128xf32>
    %329 = arith.mulf %324, %328 : vector<32x128xf32>
    %330 = arith.addf %316, %329 : vector<32x128xf32>
    %c4 = arith.constant 4 : index
    %c0_67 = arith.constant 0 : index
    %331 = vector.load %arg4[%c4, %c0_67] : memref<36x128xf32, #tpu.memory_space<vmem>>, vector<1x128xf32>
    %332 = vector.shape_cast %331 : vector<1x128xf32> to vector<128xf32>
    %333 = vector.shape_cast %332 : vector<128xf32> to vector<1x128xf32>
    %334 = vector.broadcast %333 : vector<1x128xf32> to vector<32x128xf32>
    %335 = arith.mulf %318, %334 : vector<32x128xf32>
    %336 = arith.addf %330, %335 : vector<32x128xf32>
    %337 = vector.extract_strided_slice %318 {offsets = [0, 1], sizes = [32, 127], strides = [1, 1]} : vector<32x128xf32> to vector<32x127xf32>
    %338 = tpu.concatenate %337, %281 in 1 : vector<32x127xf32>, vector<32x1xf32> -> vector<32x128xf32>
    %cst_68 = arith.constant 0.000000e+00 : f32
    %339 = vector.shape_cast %280 : vector<1x128xi1> to vector<1x128xi1>
    %340 = vector.broadcast %339 : vector<1x128xi1> to vector<32x128xi1>
    %341 = vector.broadcast %cst_68 : f32 to vector<32x128xf32>
    %342 = arith.select %340, %338, %341 : vector<32x128xi1>, vector<32x128xf32>
    %c5 = arith.constant 5 : index
    %c0_69 = arith.constant 0 : index
    %343 = vector.load %arg4[%c5, %c0_69] : memref<36x128xf32, #tpu.memory_space<vmem>>, vector<1x128xf32>
    %344 = vector.shape_cast %343 : vector<1x128xf32> to vector<128xf32>
    %345 = vector.shape_cast %344 : vector<128xf32> to vector<1x128xf32>
    %346 = vector.broadcast %345 : vector<1x128xf32> to vector<32x128xf32>
    %347 = arith.mulf %342, %346 : vector<32x128xf32>
    %348 = arith.addf %336, %347 : vector<32x128xf32>
    %c0_70 = arith.constant 0 : index
    %c2_71 = arith.constant 2 : index
    %c0_72 = arith.constant 0 : index
    %349 = vector.load %arg7[%c0_70, %c2_71, %c0_72] : memref<4x34x128xf32, #tpu.memory_space<vmem>>, vector<1x32x128xf32>
    %350 = vector.shape_cast %349 : vector<1x32x128xf32> to vector<32x128xf32>
    %351 = vector.extract_strided_slice %350 {offsets = [0, 0], sizes = [32, 127], strides = [1, 1]} : vector<32x128xf32> to vector<32x127xf32>
    %352 = tpu.concatenate %281, %351 in 1 : vector<32x1xf32>, vector<32x127xf32> -> vector<32x128xf32>
    %cst_73 = arith.constant 0.000000e+00 : f32
    %353 = vector.shape_cast %262 : vector<1x128xi1> to vector<1x128xi1>
    %354 = vector.broadcast %353 : vector<1x128xi1> to vector<32x128xi1>
    %355 = vector.broadcast %cst_73 : f32 to vector<32x128xf32>
    %356 = arith.select %354, %352, %355 : vector<32x128xi1>, vector<32x128xf32>
    %c6 = arith.constant 6 : index
    %c0_74 = arith.constant 0 : index
    %357 = vector.load %arg4[%c6, %c0_74] : memref<36x128xf32, #tpu.memory_space<vmem>>, vector<1x128xf32>
    %358 = vector.shape_cast %357 : vector<1x128xf32> to vector<128xf32>
    %359 = vector.shape_cast %358 : vector<128xf32> to vector<1x128xf32>
    %360 = vector.broadcast %359 : vector<1x128xf32> to vector<32x128xf32>
    %361 = arith.mulf %356, %360 : vector<32x128xf32>
    %362 = arith.addf %348, %361 : vector<32x128xf32>
    %c7 = arith.constant 7 : index
    %c0_75 = arith.constant 0 : index
    %363 = vector.load %arg4[%c7, %c0_75] : memref<36x128xf32, #tpu.memory_space<vmem>>, vector<1x128xf32>
    %364 = vector.shape_cast %363 : vector<1x128xf32> to vector<128xf32>
    %365 = vector.shape_cast %364 : vector<128xf32> to vector<1x128xf32>
    %366 = vector.broadcast %365 : vector<1x128xf32> to vector<32x128xf32>
    %367 = arith.mulf %350, %366 : vector<32x128xf32>
    %368 = arith.addf %362, %367 : vector<32x128xf32>
    %369 = vector.extract_strided_slice %350 {offsets = [0, 1], sizes = [32, 127], strides = [1, 1]} : vector<32x128xf32> to vector<32x127xf32>
    %370 = tpu.concatenate %369, %281 in 1 : vector<32x127xf32>, vector<32x1xf32> -> vector<32x128xf32>
    %cst_76 = arith.constant 0.000000e+00 : f32
    %371 = vector.shape_cast %280 : vector<1x128xi1> to vector<1x128xi1>
    %372 = vector.broadcast %371 : vector<1x128xi1> to vector<32x128xi1>
    %373 = vector.broadcast %cst_76 : f32 to vector<32x128xf32>
    %374 = arith.select %372, %370, %373 : vector<32x128xi1>, vector<32x128xf32>
    %c8 = arith.constant 8 : index
    %c0_77 = arith.constant 0 : index
    %375 = vector.load %arg4[%c8, %c0_77] : memref<36x128xf32, #tpu.memory_space<vmem>>, vector<1x128xf32>
    %376 = vector.shape_cast %375 : vector<1x128xf32> to vector<128xf32>
    %377 = vector.shape_cast %376 : vector<128xf32> to vector<1x128xf32>
    %378 = vector.broadcast %377 : vector<1x128xf32> to vector<32x128xf32>
    %379 = arith.mulf %374, %378 : vector<32x128xf32>
    %380 = arith.addf %368, %379 : vector<32x128xf32>
    %c1_78 = arith.constant 1 : index
    %c0_79 = arith.constant 0 : index
    %c0_80 = arith.constant 0 : index
    %381 = vector.load %arg7[%c1_78, %c0_79, %c0_80] : memref<4x34x128xf32, #tpu.memory_space<vmem>>, vector<1x32x128xf32>
    %382 = vector.shape_cast %381 : vector<1x32x128xf32> to vector<32x128xf32>
    %383 = vector.extract_strided_slice %382 {offsets = [0, 0], sizes = [32, 127], strides = [1, 1]} : vector<32x128xf32> to vector<32x127xf32>
    %384 = tpu.concatenate %281, %383 in 1 : vector<32x1xf32>, vector<32x127xf32> -> vector<32x128xf32>
    %cst_81 = arith.constant 0.000000e+00 : f32
    %385 = vector.shape_cast %262 : vector<1x128xi1> to vector<1x128xi1>
    %386 = vector.broadcast %385 : vector<1x128xi1> to vector<32x128xi1>
    %387 = vector.broadcast %cst_81 : f32 to vector<32x128xf32>
    %388 = arith.select %386, %384, %387 : vector<32x128xi1>, vector<32x128xf32>
    %c9 = arith.constant 9 : index
    %c0_82 = arith.constant 0 : index
    %389 = vector.load %arg4[%c9, %c0_82] : memref<36x128xf32, #tpu.memory_space<vmem>>, vector<1x128xf32>
    %390 = vector.shape_cast %389 : vector<1x128xf32> to vector<128xf32>
    %391 = vector.shape_cast %390 : vector<128xf32> to vector<1x128xf32>
    %392 = vector.broadcast %391 : vector<1x128xf32> to vector<32x128xf32>
    %393 = arith.mulf %388, %392 : vector<32x128xf32>
    %394 = arith.addf %380, %393 : vector<32x128xf32>
    %c10 = arith.constant 10 : index
    %c0_83 = arith.constant 0 : index
    %395 = vector.load %arg4[%c10, %c0_83] : memref<36x128xf32, #tpu.memory_space<vmem>>, vector<1x128xf32>
    %396 = vector.shape_cast %395 : vector<1x128xf32> to vector<128xf32>
    %397 = vector.shape_cast %396 : vector<128xf32> to vector<1x128xf32>
    %398 = vector.broadcast %397 : vector<1x128xf32> to vector<32x128xf32>
    %399 = arith.mulf %382, %398 : vector<32x128xf32>
    %400 = arith.addf %394, %399 : vector<32x128xf32>
    %401 = vector.extract_strided_slice %382 {offsets = [0, 1], sizes = [32, 127], strides = [1, 1]} : vector<32x128xf32> to vector<32x127xf32>
    %402 = tpu.concatenate %401, %281 in 1 : vector<32x127xf32>, vector<32x1xf32> -> vector<32x128xf32>
    %cst_84 = arith.constant 0.000000e+00 : f32
    %403 = vector.shape_cast %280 : vector<1x128xi1> to vector<1x128xi1>
    %404 = vector.broadcast %403 : vector<1x128xi1> to vector<32x128xi1>
    %405 = vector.broadcast %cst_84 : f32 to vector<32x128xf32>
    %406 = arith.select %404, %402, %405 : vector<32x128xi1>, vector<32x128xf32>
    %c11 = arith.constant 11 : index
    %c0_85 = arith.constant 0 : index
    %407 = vector.load %arg4[%c11, %c0_85] : memref<36x128xf32, #tpu.memory_space<vmem>>, vector<1x128xf32>
    %408 = vector.shape_cast %407 : vector<1x128xf32> to vector<128xf32>
    %409 = vector.shape_cast %408 : vector<128xf32> to vector<1x128xf32>
    %410 = vector.broadcast %409 : vector<1x128xf32> to vector<32x128xf32>
    %411 = arith.mulf %406, %410 : vector<32x128xf32>
    %412 = arith.addf %400, %411 : vector<32x128xf32>
    %c1_86 = arith.constant 1 : index
    %c1_87 = arith.constant 1 : index
    %c0_88 = arith.constant 0 : index
    %413 = vector.load %arg7[%c1_86, %c1_87, %c0_88] : memref<4x34x128xf32, #tpu.memory_space<vmem>>, vector<1x32x128xf32>
    %414 = vector.shape_cast %413 : vector<1x32x128xf32> to vector<32x128xf32>
    %415 = vector.extract_strided_slice %414 {offsets = [0, 0], sizes = [32, 127], strides = [1, 1]} : vector<32x128xf32> to vector<32x127xf32>
    %416 = tpu.concatenate %281, %415 in 1 : vector<32x1xf32>, vector<32x127xf32> -> vector<32x128xf32>
    %cst_89 = arith.constant 0.000000e+00 : f32
    %417 = vector.shape_cast %262 : vector<1x128xi1> to vector<1x128xi1>
    %418 = vector.broadcast %417 : vector<1x128xi1> to vector<32x128xi1>
    %419 = vector.broadcast %cst_89 : f32 to vector<32x128xf32>
    %420 = arith.select %418, %416, %419 : vector<32x128xi1>, vector<32x128xf32>
    %c12 = arith.constant 12 : index
    %c0_90 = arith.constant 0 : index
    %421 = vector.load %arg4[%c12, %c0_90] : memref<36x128xf32, #tpu.memory_space<vmem>>, vector<1x128xf32>
    %422 = vector.shape_cast %421 : vector<1x128xf32> to vector<128xf32>
    %423 = vector.shape_cast %422 : vector<128xf32> to vector<1x128xf32>
    %424 = vector.broadcast %423 : vector<1x128xf32> to vector<32x128xf32>
    %425 = arith.mulf %420, %424 : vector<32x128xf32>
    %426 = arith.addf %412, %425 : vector<32x128xf32>
    %c13 = arith.constant 13 : index
    %c0_91 = arith.constant 0 : index
    %427 = vector.load %arg4[%c13, %c0_91] : memref<36x128xf32, #tpu.memory_space<vmem>>, vector<1x128xf32>
    %428 = vector.shape_cast %427 : vector<1x128xf32> to vector<128xf32>
    %429 = vector.shape_cast %428 : vector<128xf32> to vector<1x128xf32>
    %430 = vector.broadcast %429 : vector<1x128xf32> to vector<32x128xf32>
    %431 = arith.mulf %414, %430 : vector<32x128xf32>
    %432 = arith.addf %426, %431 : vector<32x128xf32>
    %433 = vector.extract_strided_slice %414 {offsets = [0, 1], sizes = [32, 127], strides = [1, 1]} : vector<32x128xf32> to vector<32x127xf32>
    %434 = tpu.concatenate %433, %281 in 1 : vector<32x127xf32>, vector<32x1xf32> -> vector<32x128xf32>
    %cst_92 = arith.constant 0.000000e+00 : f32
    %435 = vector.shape_cast %280 : vector<1x128xi1> to vector<1x128xi1>
    %436 = vector.broadcast %435 : vector<1x128xi1> to vector<32x128xi1>
    %437 = vector.broadcast %cst_92 : f32 to vector<32x128xf32>
    %438 = arith.select %436, %434, %437 : vector<32x128xi1>, vector<32x128xf32>
    %c14 = arith.constant 14 : index
    %c0_93 = arith.constant 0 : index
    %439 = vector.load %arg4[%c14, %c0_93] : memref<36x128xf32, #tpu.memory_space<vmem>>, vector<1x128xf32>
    %440 = vector.shape_cast %439 : vector<1x128xf32> to vector<128xf32>
    %441 = vector.shape_cast %440 : vector<128xf32> to vector<1x128xf32>
    %442 = vector.broadcast %441 : vector<1x128xf32> to vector<32x128xf32>
    %443 = arith.mulf %438, %442 : vector<32x128xf32>
    %444 = arith.addf %432, %443 : vector<32x128xf32>
    %c1_94 = arith.constant 1 : index
    %c2_95 = arith.constant 2 : index
    %c0_96 = arith.constant 0 : index
    %445 = vector.load %arg7[%c1_94, %c2_95, %c0_96] : memref<4x34x128xf32, #tpu.memory_space<vmem>>, vector<1x32x128xf32>
    %446 = vector.shape_cast %445 : vector<1x32x128xf32> to vector<32x128xf32>
    %447 = vector.extract_strided_slice %446 {offsets = [0, 0], sizes = [32, 127], strides = [1, 1]} : vector<32x128xf32> to vector<32x127xf32>
    %448 = tpu.concatenate %281, %447 in 1 : vector<32x1xf32>, vector<32x127xf32> -> vector<32x128xf32>
    %cst_97 = arith.constant 0.000000e+00 : f32
    %449 = vector.shape_cast %262 : vector<1x128xi1> to vector<1x128xi1>
    %450 = vector.broadcast %449 : vector<1x128xi1> to vector<32x128xi1>
    %451 = vector.broadcast %cst_97 : f32 to vector<32x128xf32>
    %452 = arith.select %450, %448, %451 : vector<32x128xi1>, vector<32x128xf32>
    %c15 = arith.constant 15 : index
    %c0_98 = arith.constant 0 : index
    %453 = vector.load %arg4[%c15, %c0_98] : memref<36x128xf32, #tpu.memory_space<vmem>>, vector<1x128xf32>
    %454 = vector.shape_cast %453 : vector<1x128xf32> to vector<128xf32>
    %455 = vector.shape_cast %454 : vector<128xf32> to vector<1x128xf32>
    %456 = vector.broadcast %455 : vector<1x128xf32> to vector<32x128xf32>
    %457 = arith.mulf %452, %456 : vector<32x128xf32>
    %458 = arith.addf %444, %457 : vector<32x128xf32>
    %c16 = arith.constant 16 : index
    %c0_99 = arith.constant 0 : index
    %459 = vector.load %arg4[%c16, %c0_99] : memref<36x128xf32, #tpu.memory_space<vmem>>, vector<1x128xf32>
    %460 = vector.shape_cast %459 : vector<1x128xf32> to vector<128xf32>
    %461 = vector.shape_cast %460 : vector<128xf32> to vector<1x128xf32>
    %462 = vector.broadcast %461 : vector<1x128xf32> to vector<32x128xf32>
    %463 = arith.mulf %446, %462 : vector<32x128xf32>
    %464 = arith.addf %458, %463 : vector<32x128xf32>
    %465 = vector.extract_strided_slice %446 {offsets = [0, 1], sizes = [32, 127], strides = [1, 1]} : vector<32x128xf32> to vector<32x127xf32>
    %466 = tpu.concatenate %465, %281 in 1 : vector<32x127xf32>, vector<32x1xf32> -> vector<32x128xf32>
    %cst_100 = arith.constant 0.000000e+00 : f32
    %467 = vector.shape_cast %280 : vector<1x128xi1> to vector<1x128xi1>
    %468 = vector.broadcast %467 : vector<1x128xi1> to vector<32x128xi1>
    %469 = vector.broadcast %cst_100 : f32 to vector<32x128xf32>
    %470 = arith.select %468, %466, %469 : vector<32x128xi1>, vector<32x128xf32>
    %c17 = arith.constant 17 : index
    %c0_101 = arith.constant 0 : index
    %471 = vector.load %arg4[%c17, %c0_101] : memref<36x128xf32, #tpu.memory_space<vmem>>, vector<1x128xf32>
    %472 = vector.shape_cast %471 : vector<1x128xf32> to vector<128xf32>
    %473 = vector.shape_cast %472 : vector<128xf32> to vector<1x128xf32>
    %474 = vector.broadcast %473 : vector<1x128xf32> to vector<32x128xf32>
    %475 = arith.mulf %470, %474 : vector<32x128xf32>
    %476 = arith.addf %464, %475 : vector<32x128xf32>
    %c2_102 = arith.constant 2 : index
    %c0_103 = arith.constant 0 : index
    %c0_104 = arith.constant 0 : index
    %477 = vector.load %arg7[%c2_102, %c0_103, %c0_104] : memref<4x34x128xf32, #tpu.memory_space<vmem>>, vector<1x32x128xf32>
    %478 = vector.shape_cast %477 : vector<1x32x128xf32> to vector<32x128xf32>
    %479 = vector.extract_strided_slice %478 {offsets = [0, 0], sizes = [32, 127], strides = [1, 1]} : vector<32x128xf32> to vector<32x127xf32>
    %480 = tpu.concatenate %281, %479 in 1 : vector<32x1xf32>, vector<32x127xf32> -> vector<32x128xf32>
    %cst_105 = arith.constant 0.000000e+00 : f32
    %481 = vector.shape_cast %262 : vector<1x128xi1> to vector<1x128xi1>
    %482 = vector.broadcast %481 : vector<1x128xi1> to vector<32x128xi1>
    %483 = vector.broadcast %cst_105 : f32 to vector<32x128xf32>
    %484 = arith.select %482, %480, %483 : vector<32x128xi1>, vector<32x128xf32>
    %c18 = arith.constant 18 : index
    %c0_106 = arith.constant 0 : index
    %485 = vector.load %arg4[%c18, %c0_106] : memref<36x128xf32, #tpu.memory_space<vmem>>, vector<1x128xf32>
    %486 = vector.shape_cast %485 : vector<1x128xf32> to vector<128xf32>
    %487 = vector.shape_cast %486 : vector<128xf32> to vector<1x128xf32>
    %488 = vector.broadcast %487 : vector<1x128xf32> to vector<32x128xf32>
    %489 = arith.mulf %484, %488 : vector<32x128xf32>
    %490 = arith.addf %476, %489 : vector<32x128xf32>
    %c19 = arith.constant 19 : index
    %c0_107 = arith.constant 0 : index
    %491 = vector.load %arg4[%c19, %c0_107] : memref<36x128xf32, #tpu.memory_space<vmem>>, vector<1x128xf32>
    %492 = vector.shape_cast %491 : vector<1x128xf32> to vector<128xf32>
    %493 = vector.shape_cast %492 : vector<128xf32> to vector<1x128xf32>
    %494 = vector.broadcast %493 : vector<1x128xf32> to vector<32x128xf32>
    %495 = arith.mulf %478, %494 : vector<32x128xf32>
    %496 = arith.addf %490, %495 : vector<32x128xf32>
    %497 = vector.extract_strided_slice %478 {offsets = [0, 1], sizes = [32, 127], strides = [1, 1]} : vector<32x128xf32> to vector<32x127xf32>
    %498 = tpu.concatenate %497, %281 in 1 : vector<32x127xf32>, vector<32x1xf32> -> vector<32x128xf32>
    %cst_108 = arith.constant 0.000000e+00 : f32
    %499 = vector.shape_cast %280 : vector<1x128xi1> to vector<1x128xi1>
    %500 = vector.broadcast %499 : vector<1x128xi1> to vector<32x128xi1>
    %501 = vector.broadcast %cst_108 : f32 to vector<32x128xf32>
    %502 = arith.select %500, %498, %501 : vector<32x128xi1>, vector<32x128xf32>
    %c20 = arith.constant 20 : index
    %c0_109 = arith.constant 0 : index
    %503 = vector.load %arg4[%c20, %c0_109] : memref<36x128xf32, #tpu.memory_space<vmem>>, vector<1x128xf32>
    %504 = vector.shape_cast %503 : vector<1x128xf32> to vector<128xf32>
    %505 = vector.shape_cast %504 : vector<128xf32> to vector<1x128xf32>
    %506 = vector.broadcast %505 : vector<1x128xf32> to vector<32x128xf32>
    %507 = arith.mulf %502, %506 : vector<32x128xf32>
    %508 = arith.addf %496, %507 : vector<32x128xf32>
    %c2_110 = arith.constant 2 : index
    %c1_111 = arith.constant 1 : index
    %c0_112 = arith.constant 0 : index
    %509 = vector.load %arg7[%c2_110, %c1_111, %c0_112] : memref<4x34x128xf32, #tpu.memory_space<vmem>>, vector<1x32x128xf32>
    %510 = vector.shape_cast %509 : vector<1x32x128xf32> to vector<32x128xf32>
    %511 = vector.extract_strided_slice %510 {offsets = [0, 0], sizes = [32, 127], strides = [1, 1]} : vector<32x128xf32> to vector<32x127xf32>
    %512 = tpu.concatenate %281, %511 in 1 : vector<32x1xf32>, vector<32x127xf32> -> vector<32x128xf32>
    %cst_113 = arith.constant 0.000000e+00 : f32
    %513 = vector.shape_cast %262 : vector<1x128xi1> to vector<1x128xi1>
    %514 = vector.broadcast %513 : vector<1x128xi1> to vector<32x128xi1>
    %515 = vector.broadcast %cst_113 : f32 to vector<32x128xf32>
    %516 = arith.select %514, %512, %515 : vector<32x128xi1>, vector<32x128xf32>
    %c21 = arith.constant 21 : index
    %c0_114 = arith.constant 0 : index
    %517 = vector.load %arg4[%c21, %c0_114] : memref<36x128xf32, #tpu.memory_space<vmem>>, vector<1x128xf32>
    %518 = vector.shape_cast %517 : vector<1x128xf32> to vector<128xf32>
    %519 = vector.shape_cast %518 : vector<128xf32> to vector<1x128xf32>
    %520 = vector.broadcast %519 : vector<1x128xf32> to vector<32x128xf32>
    %521 = arith.mulf %516, %520 : vector<32x128xf32>
    %522 = arith.addf %508, %521 : vector<32x128xf32>
    %c22 = arith.constant 22 : index
    %c0_115 = arith.constant 0 : index
    %523 = vector.load %arg4[%c22, %c0_115] : memref<36x128xf32, #tpu.memory_space<vmem>>, vector<1x128xf32>
    %524 = vector.shape_cast %523 : vector<1x128xf32> to vector<128xf32>
    %525 = vector.shape_cast %524 : vector<128xf32> to vector<1x128xf32>
    %526 = vector.broadcast %525 : vector<1x128xf32> to vector<32x128xf32>
    %527 = arith.mulf %510, %526 : vector<32x128xf32>
    %528 = arith.addf %522, %527 : vector<32x128xf32>
    %529 = vector.extract_strided_slice %510 {offsets = [0, 1], sizes = [32, 127], strides = [1, 1]} : vector<32x128xf32> to vector<32x127xf32>
    %530 = tpu.concatenate %529, %281 in 1 : vector<32x127xf32>, vector<32x1xf32> -> vector<32x128xf32>
    %cst_116 = arith.constant 0.000000e+00 : f32
    %531 = vector.shape_cast %280 : vector<1x128xi1> to vector<1x128xi1>
    %532 = vector.broadcast %531 : vector<1x128xi1> to vector<32x128xi1>
    %533 = vector.broadcast %cst_116 : f32 to vector<32x128xf32>
    %534 = arith.select %532, %530, %533 : vector<32x128xi1>, vector<32x128xf32>
    %c23 = arith.constant 23 : index
    %c0_117 = arith.constant 0 : index
    %535 = vector.load %arg4[%c23, %c0_117] : memref<36x128xf32, #tpu.memory_space<vmem>>, vector<1x128xf32>
    %536 = vector.shape_cast %535 : vector<1x128xf32> to vector<128xf32>
    %537 = vector.shape_cast %536 : vector<128xf32> to vector<1x128xf32>
    %538 = vector.broadcast %537 : vector<1x128xf32> to vector<32x128xf32>
    %539 = arith.mulf %534, %538 : vector<32x128xf32>
    %540 = arith.addf %528, %539 : vector<32x128xf32>
    %c2_118 = arith.constant 2 : index
    %c2_119 = arith.constant 2 : index
    %c0_120 = arith.constant 0 : index
    %541 = vector.load %arg7[%c2_118, %c2_119, %c0_120] : memref<4x34x128xf32, #tpu.memory_space<vmem>>, vector<1x32x128xf32>
    %542 = vector.shape_cast %541 : vector<1x32x128xf32> to vector<32x128xf32>
    %543 = vector.extract_strided_slice %542 {offsets = [0, 0], sizes = [32, 127], strides = [1, 1]} : vector<32x128xf32> to vector<32x127xf32>
    %544 = tpu.concatenate %281, %543 in 1 : vector<32x1xf32>, vector<32x127xf32> -> vector<32x128xf32>
    %cst_121 = arith.constant 0.000000e+00 : f32
    %545 = vector.shape_cast %262 : vector<1x128xi1> to vector<1x128xi1>
    %546 = vector.broadcast %545 : vector<1x128xi1> to vector<32x128xi1>
    %547 = vector.broadcast %cst_121 : f32 to vector<32x128xf32>
    %548 = arith.select %546, %544, %547 : vector<32x128xi1>, vector<32x128xf32>
    %c24 = arith.constant 24 : index
    %c0_122 = arith.constant 0 : index
    %549 = vector.load %arg4[%c24, %c0_122] : memref<36x128xf32, #tpu.memory_space<vmem>>, vector<1x128xf32>
    %550 = vector.shape_cast %549 : vector<1x128xf32> to vector<128xf32>
    %551 = vector.shape_cast %550 : vector<128xf32> to vector<1x128xf32>
    %552 = vector.broadcast %551 : vector<1x128xf32> to vector<32x128xf32>
    %553 = arith.mulf %548, %552 : vector<32x128xf32>
    %554 = arith.addf %540, %553 : vector<32x128xf32>
    %c25 = arith.constant 25 : index
    %c0_123 = arith.constant 0 : index
    %555 = vector.load %arg4[%c25, %c0_123] : memref<36x128xf32, #tpu.memory_space<vmem>>, vector<1x128xf32>
    %556 = vector.shape_cast %555 : vector<1x128xf32> to vector<128xf32>
    %557 = vector.shape_cast %556 : vector<128xf32> to vector<1x128xf32>
    %558 = vector.broadcast %557 : vector<1x128xf32> to vector<32x128xf32>
    %559 = arith.mulf %542, %558 : vector<32x128xf32>
    %560 = arith.addf %554, %559 : vector<32x128xf32>
    %561 = vector.extract_strided_slice %542 {offsets = [0, 1], sizes = [32, 127], strides = [1, 1]} : vector<32x128xf32> to vector<32x127xf32>
    %562 = tpu.concatenate %561, %281 in 1 : vector<32x127xf32>, vector<32x1xf32> -> vector<32x128xf32>
    %cst_124 = arith.constant 0.000000e+00 : f32
    %563 = vector.shape_cast %280 : vector<1x128xi1> to vector<1x128xi1>
    %564 = vector.broadcast %563 : vector<1x128xi1> to vector<32x128xi1>
    %565 = vector.broadcast %cst_124 : f32 to vector<32x128xf32>
    %566 = arith.select %564, %562, %565 : vector<32x128xi1>, vector<32x128xf32>
    %c26 = arith.constant 26 : index
    %c0_125 = arith.constant 0 : index
    %567 = vector.load %arg4[%c26, %c0_125] : memref<36x128xf32, #tpu.memory_space<vmem>>, vector<1x128xf32>
    %568 = vector.shape_cast %567 : vector<1x128xf32> to vector<128xf32>
    %569 = vector.shape_cast %568 : vector<128xf32> to vector<1x128xf32>
    %570 = vector.broadcast %569 : vector<1x128xf32> to vector<32x128xf32>
    %571 = arith.mulf %566, %570 : vector<32x128xf32>
    %572 = arith.addf %560, %571 : vector<32x128xf32>
    %c3_126 = arith.constant 3 : index
    %c0_127 = arith.constant 0 : index
    %c0_128 = arith.constant 0 : index
    %573 = vector.load %arg7[%c3_126, %c0_127, %c0_128] : memref<4x34x128xf32, #tpu.memory_space<vmem>>, vector<1x32x128xf32>
    %574 = vector.shape_cast %573 : vector<1x32x128xf32> to vector<32x128xf32>
    %575 = vector.extract_strided_slice %574 {offsets = [0, 0], sizes = [32, 127], strides = [1, 1]} : vector<32x128xf32> to vector<32x127xf32>
    %576 = tpu.concatenate %281, %575 in 1 : vector<32x1xf32>, vector<32x127xf32> -> vector<32x128xf32>
    %cst_129 = arith.constant 0.000000e+00 : f32
    %577 = vector.shape_cast %262 : vector<1x128xi1> to vector<1x128xi1>
    %578 = vector.broadcast %577 : vector<1x128xi1> to vector<32x128xi1>
    %579 = vector.broadcast %cst_129 : f32 to vector<32x128xf32>
    %580 = arith.select %578, %576, %579 : vector<32x128xi1>, vector<32x128xf32>
    %c27 = arith.constant 27 : index
    %c0_130 = arith.constant 0 : index
    %581 = vector.load %arg4[%c27, %c0_130] : memref<36x128xf32, #tpu.memory_space<vmem>>, vector<1x128xf32>
    %582 = vector.shape_cast %581 : vector<1x128xf32> to vector<128xf32>
    %583 = vector.shape_cast %582 : vector<128xf32> to vector<1x128xf32>
    %584 = vector.broadcast %583 : vector<1x128xf32> to vector<32x128xf32>
    %585 = arith.mulf %580, %584 : vector<32x128xf32>
    %586 = arith.addf %572, %585 : vector<32x128xf32>
    %c28 = arith.constant 28 : index
    %c0_131 = arith.constant 0 : index
    %587 = vector.load %arg4[%c28, %c0_131] : memref<36x128xf32, #tpu.memory_space<vmem>>, vector<1x128xf32>
    %588 = vector.shape_cast %587 : vector<1x128xf32> to vector<128xf32>
    %589 = vector.shape_cast %588 : vector<128xf32> to vector<1x128xf32>
    %590 = vector.broadcast %589 : vector<1x128xf32> to vector<32x128xf32>
    %591 = arith.mulf %574, %590 : vector<32x128xf32>
    %592 = arith.addf %586, %591 : vector<32x128xf32>
    %593 = vector.extract_strided_slice %574 {offsets = [0, 1], sizes = [32, 127], strides = [1, 1]} : vector<32x128xf32> to vector<32x127xf32>
    %594 = tpu.concatenate %593, %281 in 1 : vector<32x127xf32>, vector<32x1xf32> -> vector<32x128xf32>
    %cst_132 = arith.constant 0.000000e+00 : f32
    %595 = vector.shape_cast %280 : vector<1x128xi1> to vector<1x128xi1>
    %596 = vector.broadcast %595 : vector<1x128xi1> to vector<32x128xi1>
    %597 = vector.broadcast %cst_132 : f32 to vector<32x128xf32>
    %598 = arith.select %596, %594, %597 : vector<32x128xi1>, vector<32x128xf32>
    %c29 = arith.constant 29 : index
    %c0_133 = arith.constant 0 : index
    %599 = vector.load %arg4[%c29, %c0_133] : memref<36x128xf32, #tpu.memory_space<vmem>>, vector<1x128xf32>
    %600 = vector.shape_cast %599 : vector<1x128xf32> to vector<128xf32>
    %601 = vector.shape_cast %600 : vector<128xf32> to vector<1x128xf32>
    %602 = vector.broadcast %601 : vector<1x128xf32> to vector<32x128xf32>
    %603 = arith.mulf %598, %602 : vector<32x128xf32>
    %604 = arith.addf %592, %603 : vector<32x128xf32>
    %c3_134 = arith.constant 3 : index
    %c1_135 = arith.constant 1 : index
    %c0_136 = arith.constant 0 : index
    %605 = vector.load %arg7[%c3_134, %c1_135, %c0_136] : memref<4x34x128xf32, #tpu.memory_space<vmem>>, vector<1x32x128xf32>
    %606 = vector.shape_cast %605 : vector<1x32x128xf32> to vector<32x128xf32>
    %607 = vector.extract_strided_slice %606 {offsets = [0, 0], sizes = [32, 127], strides = [1, 1]} : vector<32x128xf32> to vector<32x127xf32>
    %608 = tpu.concatenate %281, %607 in 1 : vector<32x1xf32>, vector<32x127xf32> -> vector<32x128xf32>
    %cst_137 = arith.constant 0.000000e+00 : f32
    %609 = vector.shape_cast %262 : vector<1x128xi1> to vector<1x128xi1>
    %610 = vector.broadcast %609 : vector<1x128xi1> to vector<32x128xi1>
    %611 = vector.broadcast %cst_137 : f32 to vector<32x128xf32>
    %612 = arith.select %610, %608, %611 : vector<32x128xi1>, vector<32x128xf32>
    %c30 = arith.constant 30 : index
    %c0_138 = arith.constant 0 : index
    %613 = vector.load %arg4[%c30, %c0_138] : memref<36x128xf32, #tpu.memory_space<vmem>>, vector<1x128xf32>
    %614 = vector.shape_cast %613 : vector<1x128xf32> to vector<128xf32>
    %615 = vector.shape_cast %614 : vector<128xf32> to vector<1x128xf32>
    %616 = vector.broadcast %615 : vector<1x128xf32> to vector<32x128xf32>
    %617 = arith.mulf %612, %616 : vector<32x128xf32>
    %618 = arith.addf %604, %617 : vector<32x128xf32>
    %c31 = arith.constant 31 : index
    %c0_139 = arith.constant 0 : index
    %619 = vector.load %arg4[%c31, %c0_139] : memref<36x128xf32, #tpu.memory_space<vmem>>, vector<1x128xf32>
    %620 = vector.shape_cast %619 : vector<1x128xf32> to vector<128xf32>
    %621 = vector.shape_cast %620 : vector<128xf32> to vector<1x128xf32>
    %622 = vector.broadcast %621 : vector<1x128xf32> to vector<32x128xf32>
    %623 = arith.mulf %606, %622 : vector<32x128xf32>
    %624 = arith.addf %618, %623 : vector<32x128xf32>
    %625 = vector.extract_strided_slice %606 {offsets = [0, 1], sizes = [32, 127], strides = [1, 1]} : vector<32x128xf32> to vector<32x127xf32>
    %626 = tpu.concatenate %625, %281 in 1 : vector<32x127xf32>, vector<32x1xf32> -> vector<32x128xf32>
    %cst_140 = arith.constant 0.000000e+00 : f32
    %627 = vector.shape_cast %280 : vector<1x128xi1> to vector<1x128xi1>
    %628 = vector.broadcast %627 : vector<1x128xi1> to vector<32x128xi1>
    %629 = vector.broadcast %cst_140 : f32 to vector<32x128xf32>
    %630 = arith.select %628, %626, %629 : vector<32x128xi1>, vector<32x128xf32>
    %c32 = arith.constant 32 : index
    %c0_141 = arith.constant 0 : index
    %631 = vector.load %arg4[%c32, %c0_141] : memref<36x128xf32, #tpu.memory_space<vmem>>, vector<1x128xf32>
    %632 = vector.shape_cast %631 : vector<1x128xf32> to vector<128xf32>
    %633 = vector.shape_cast %632 : vector<128xf32> to vector<1x128xf32>
    %634 = vector.broadcast %633 : vector<1x128xf32> to vector<32x128xf32>
    %635 = arith.mulf %630, %634 : vector<32x128xf32>
    %636 = arith.addf %624, %635 : vector<32x128xf32>
    %c3_142 = arith.constant 3 : index
    %c2_143 = arith.constant 2 : index
    %c0_144 = arith.constant 0 : index
    %637 = vector.load %arg7[%c3_142, %c2_143, %c0_144] : memref<4x34x128xf32, #tpu.memory_space<vmem>>, vector<1x32x128xf32>
    %638 = vector.shape_cast %637 : vector<1x32x128xf32> to vector<32x128xf32>
    %639 = vector.extract_strided_slice %638 {offsets = [0, 0], sizes = [32, 127], strides = [1, 1]} : vector<32x128xf32> to vector<32x127xf32>
    %640 = tpu.concatenate %281, %639 in 1 : vector<32x1xf32>, vector<32x127xf32> -> vector<32x128xf32>
    %cst_145 = arith.constant 0.000000e+00 : f32
    %641 = vector.shape_cast %262 : vector<1x128xi1> to vector<1x128xi1>
    %642 = vector.broadcast %641 : vector<1x128xi1> to vector<32x128xi1>
    %643 = vector.broadcast %cst_145 : f32 to vector<32x128xf32>
    %644 = arith.select %642, %640, %643 : vector<32x128xi1>, vector<32x128xf32>
    %c33_146 = arith.constant 33 : index
    %c0_147 = arith.constant 0 : index
    %645 = vector.load %arg4[%c33_146, %c0_147] : memref<36x128xf32, #tpu.memory_space<vmem>>, vector<1x128xf32>
    %646 = vector.shape_cast %645 : vector<1x128xf32> to vector<128xf32>
    %647 = vector.shape_cast %646 : vector<128xf32> to vector<1x128xf32>
    %648 = vector.broadcast %647 : vector<1x128xf32> to vector<32x128xf32>
    %649 = arith.mulf %644, %648 : vector<32x128xf32>
    %650 = arith.addf %636, %649 : vector<32x128xf32>
    %c34 = arith.constant 34 : index
    %c0_148 = arith.constant 0 : index
    %651 = vector.load %arg4[%c34, %c0_148] : memref<36x128xf32, #tpu.memory_space<vmem>>, vector<1x128xf32>
    %652 = vector.shape_cast %651 : vector<1x128xf32> to vector<128xf32>
    %653 = vector.shape_cast %652 : vector<128xf32> to vector<1x128xf32>
    %654 = vector.broadcast %653 : vector<1x128xf32> to vector<32x128xf32>
    %655 = arith.mulf %638, %654 : vector<32x128xf32>
    %656 = arith.addf %650, %655 : vector<32x128xf32>
    %657 = vector.extract_strided_slice %638 {offsets = [0, 1], sizes = [32, 127], strides = [1, 1]} : vector<32x128xf32> to vector<32x127xf32>
    %658 = tpu.concatenate %657, %281 in 1 : vector<32x127xf32>, vector<32x1xf32> -> vector<32x128xf32>
    %cst_149 = arith.constant 0.000000e+00 : f32
    %659 = vector.shape_cast %280 : vector<1x128xi1> to vector<1x128xi1>
    %660 = vector.broadcast %659 : vector<1x128xi1> to vector<32x128xi1>
    %661 = vector.broadcast %cst_149 : f32 to vector<32x128xf32>
    %662 = arith.select %660, %658, %661 : vector<32x128xi1>, vector<32x128xf32>
    %c35 = arith.constant 35 : index
    %c0_150 = arith.constant 0 : index
    %663 = vector.load %arg4[%c35, %c0_150] : memref<36x128xf32, #tpu.memory_space<vmem>>, vector<1x128xf32>
    %664 = vector.shape_cast %663 : vector<1x128xf32> to vector<128xf32>
    %665 = vector.shape_cast %664 : vector<128xf32> to vector<1x128xf32>
    %666 = vector.broadcast %665 : vector<1x128xf32> to vector<32x128xf32>
    %667 = arith.mulf %662, %666 : vector<32x128xf32>
    %668 = arith.addf %656, %667 : vector<32x128xf32>
    %669 = vector.extract_strided_slice %668 {offsets = [0, 0], sizes = [32, 32], strides = [1, 1]} : vector<32x128xf32> to vector<32x32xf32>
    %c0_151 = arith.constant 0 : index
    %c0_152 = arith.constant 0 : index
    %c0_153 = arith.constant 0 : index
    %c0_154 = arith.constant 0 : index
    %670 = vector.load %arg6[%c0_151, %c0_152, %c0_153, %c0_154] : memref<1x4x32x32xf32, #tpu.memory_space<vmem>>, vector<1x1x32x32xf32>
    %671 = vector.shape_cast %670 : vector<1x1x32x32xf32> to vector<32x32xf32>
    %672 = vector.shape_cast %669 : vector<32x32xf32> to vector<1x1x32x32xf32>
    tpu.vector_store %arg6[%c0_151, %c0_152, %c0_153, %c0_154], %672 {strides = array<i32>} : memref<1x4x32x32xf32, #tpu.memory_space<vmem>>, vector<1x1x32x32xf32>,
    %673 = vector.extract_strided_slice %668 {offsets = [0, 32], sizes = [32, 32], strides = [1, 1]} : vector<32x128xf32> to vector<32x32xf32>
    %c0_155 = arith.constant 0 : index
    %c1_156 = arith.constant 1 : index
    %c0_157 = arith.constant 0 : index
    %c0_158 = arith.constant 0 : index
    %674 = vector.load %arg6[%c0_155, %c1_156, %c0_157, %c0_158] : memref<1x4x32x32xf32, #tpu.memory_space<vmem>>, vector<1x1x32x32xf32>
    %675 = vector.shape_cast %674 : vector<1x1x32x32xf32> to vector<32x32xf32>
    %676 = vector.shape_cast %673 : vector<32x32xf32> to vector<1x1x32x32xf32>
    tpu.vector_store %arg6[%c0_155, %c1_156, %c0_157, %c0_158], %676 {strides = array<i32>} : memref<1x4x32x32xf32, #tpu.memory_space<vmem>>, vector<1x1x32x32xf32>,
    %677 = vector.extract_strided_slice %668 {offsets = [0, 64], sizes = [32, 32], strides = [1, 1]} : vector<32x128xf32> to vector<32x32xf32>
    %c0_159 = arith.constant 0 : index
    %c2_160 = arith.constant 2 : index
    %c0_161 = arith.constant 0 : index
    %c0_162 = arith.constant 0 : index
    %678 = vector.load %arg6[%c0_159, %c2_160, %c0_161, %c0_162] : memref<1x4x32x32xf32, #tpu.memory_space<vmem>>, vector<1x1x32x32xf32>
    %679 = vector.shape_cast %678 : vector<1x1x32x32xf32> to vector<32x32xf32>
    %680 = vector.shape_cast %677 : vector<32x32xf32> to vector<1x1x32x32xf32>
    tpu.vector_store %arg6[%c0_159, %c2_160, %c0_161, %c0_162], %680 {strides = array<i32>} : memref<1x4x32x32xf32, #tpu.memory_space<vmem>>, vector<1x1x32x32xf32>,
    %681 = vector.extract_strided_slice %668 {offsets = [0, 96], sizes = [32, 32], strides = [1, 1]} : vector<32x128xf32> to vector<32x32xf32>
    %c0_163 = arith.constant 0 : index
    %c3_164 = arith.constant 3 : index
    %c0_165 = arith.constant 0 : index
    %c0_166 = arith.constant 0 : index
    %682 = vector.load %arg6[%c0_163, %c3_164, %c0_165, %c0_166] : memref<1x4x32x32xf32, #tpu.memory_space<vmem>>, vector<1x1x32x32xf32>
    %683 = vector.shape_cast %682 : vector<1x1x32x32xf32> to vector<32x32xf32>
    %684 = vector.shape_cast %681 : vector<32x32xf32> to vector<1x1x32x32xf32>
    tpu.vector_store %arg6[%c0_163, %c3_164, %c0_165, %c0_166], %684 {strides = array<i32>} : memref<1x4x32x32xf32, #tpu.memory_space<vmem>>, vector<1x1x32x32xf32>,
    return
  }
  func.func @transform_0(%arg0: i32, %arg1: i32) -> (i32, i32, i32, i32) {
    %c0_i32 = arith.constant 0 : i32
    %c0_i32_0 = arith.constant 0 : i32
    %c0_i32_1 = arith.constant 0 : i32
    %c0_i32_2 = arith.constant 0 : i32
    return %arg0, %c0_i32, %c0_i32_0, %c0_i32_1 : i32, i32, i32, i32
  }
  func.func @transform_1(%arg0: i32, %arg1: i32) -> (i32, i32) {
    %c0_i32 = arith.constant 0 : i32
    %c0_i32_0 = arith.constant 0 : i32
    %c0_i32_1 = arith.constant 0 : i32
    return %c0_i32, %c0_i32_0 : i32, i32
  }
  func.func @transform_2(%arg0: i32, %arg1: i32) -> (i32, i32) {
    %c0_i32 = arith.constant 0 : i32
    %c0_i32_0 = arith.constant 0 : i32
    %c0_i32_1 = arith.constant 0 : i32
    return %c0_i32, %c0_i32_0 : i32, i32
  }
  func.func @transform_3(%arg0: i32, %arg1: i32) -> (i32, i32) {
    %c0_i32 = arith.constant 0 : i32
    %c0_i32_0 = arith.constant 0 : i32
    %c0_i32_1 = arith.constant 0 : i32
    return %c0_i32, %c0_i32_0 : i32, i32
  }
  func.func @transform_4(%arg0: i32, %arg1: i32) -> (i32, i32, i32, i32) {
    %c0_i32 = arith.constant 0 : i32
    %c0_i32_0 = arith.constant 0 : i32
    %c0_i32_1 = arith.constant 0 : i32
    return %arg0, %c0_i32, %arg1, %c0_i32_0 : i32, i32, i32, i32
  }
}

</mosaic_0001>

<bundles_post_ra>
// kernel: tpu_custom_call.1
= control target key start
LH: loop header
LB: loop body
LE: loop exit
PB: predicated region body
PF: predicated region fallthrough
CT: control target
= control target key end

     0   :  { %9 = vsyncpa [#allocation4], 0  ;;  %s4275_s0 = inlined_call_operand.hbm [shape: f32[2,4,16,16], index: 0, kind: input, shape index: {}]   ;;  %s4276_s1 = inlined_call_operand.hbm [shape: f32[16,128], index: 1, kind: input, shape index: {}]   ;;  %s4277_s2 = inlined_call_operand.hbm [shape: f32[36,128], index: 2, kind: input, shape index: {}]   ;;  %s4278_s3 = inlined_call_operand.vmem [shape: f32[1,128], index: 3, kind: input, shape index: {}]   ;;  %s4279_s4 = inlined_call_operand.hbm [shape: f32[2,4,32,32], index: 4, kind: output, shape index: {}]  }
   0x1   :  { %11 = vsyncpa [#allocation4 + $0x1], 0 }
   0x2   :  { %12 = vsyncpa [#allocation7], 0 }
   0x3   :  { %13 = vsyncpa [#allocation5], 0 }
   0x4   :  { %15 = vsyncpa [#allocation5 + $0x1], 0  ;;  %s2703_s15 = smov 0   ;;  %s2705_s16 = smov 0  }
   0x5   :  { %s2707_s17 = smov 0   ;;  %s2709_s18 = smov 0  }
   0x6   :  { %s2711_s19 = smov 0   ;;  %s2713_s20 = smov 0  }
   0x7 LB: > { %s2245_s21 = sadd.s32 4294967295, %s2659_s20   ;;  %s2246_s22 = sadd.s32 4294967294, %s2659_s20   ;;  %s2659_s20 = sphi %s2713_s20, %s21_s20   ;;  %s2655_s19 = sphi %s2711_s19, %s4368_s19   ;;  %s2651_s18 = sphi %s2709_s18, %s4367_s18   ;;  %s2647_s17 = sphi %s2707_s17, %s4366_s17   ;;  %s2643_s16 = sphi %s2705_s16, %s4365_s16   ;;  %s2639_s15 = sphi %s2703_s15, %s4364_s15  }
   0x8   : > { %p53_p0 = scmp.ne.s32.totalorder %s2643_s16, %s2639_s15  ;;  %p2737_p1 = scmp.eq.s32.totalorder %s2245_s21, 0 }
   0x9   : > { %p2741_p2 = scmp.eq.s32.totalorder %s2245_s21, 1  ;;  %p148_p3 = scmp.eq.s32.totalorder %s2246_s22, 1 }
   0xa   : > { %s4295_s23 = scalar_select %p2737_p1, 1, 0 }
   0xb   : > { %p2747_p4 = por %p2737_p1, %p53_p0  ;;  %p2247_p5 = scmp.ge.s32.totalorder %s2659_s20, 1 }
   0xc   : > { %p2752_p6 = por %p148_p3, %p53_p0  ;;  %p155_p7 = scmp.lt.s32.totalorder %s2659_s20, 3 }
   0xd   : > { %s4297_s25 = scalar_select %p2747_p4, 1, 0 }
   0xe   : > { %s4298_s26 = scalar_select %p2752_p6, 1, 0 }
   0xf   : > { %p2757_p8 = pnand %p2247_p5, %p155_p7  ;;  %s2661_s28 = smov [#allocation6]  }
  0x10   : > { %s167_s29 = sshll.u32 %s2661_s28, 4  ;;  %s2662_s5 = smov [#allocation8]   ;;  %s2761_s29 = int_to_ptr.vmem [resolvable:$true] %s167_s29 }
  0x11   : > { %p2403_p9 = pneg %p2757_p8  ;;  %s180_s6 = sshll.u32 %s2662_s5, 4  ;;  %s2772_s6 = int_to_ptr.vmem [resolvable:$true] %s180_s6 }
  0x12   : > { %s2487_s9 = scalar_lea.hbm %s4276_s1, 256 }
  0x13   : > { %p2768_p11 = pnand %p2403_p9, %p2737_p1  ;;  %p2488_p12 = scmp.ne.s32.totalorder %s4276_s1, %s2487_s9 }
  0x14   : > { %p2494_p5 = scmp.lt.u32.totalorder %s2487_s9, %s4276_s1 }
  0x15   : > { %p2489_p13 = pneg %p2768_p11 }
  0x17   : > { %p2490_p0 = pnand %p2489_p13, %p2488_p12 }
  0x19   : > { %p2491_p3 = pneg %p2490_p0 }
  0x1b   : > { %p2496_p7 = pnand %p2494_p5, %p2491_p3 }
  0x1d   : > { %2499 = shalt.err (!%p2496_p7)
}
  0x1e   : > { %s2500_s14 = scalar_lea.vmem %s2761_s29, 256  ;;  %p2508_p1 = scmp.lt.s32.totalorder %s2761_s29, %s2761_s29 }
  0x1f   : > { %p2501_p9 = scmp.ne.s32.totalorder %s2761_s29, %s2500_s14  ;;  %p2509_p12 = scmp.lt.s32.totalorder %s2500_s14, %s2500_s14 }
  0x21   : > { %p2503_p10 = pnand %p2501_p9, %p2489_p13  ;;  %p2510_p0 = por %p2509_p12, %p2508_p1 }
  0x23   : > { %p2504_p6 = pneg %p2503_p10 }
  0x25   : > { %p2511_p4 = pnand %p2510_p0, %p2504_p6 }
  0x27   : > { %2514 = shalt.err (!%p2511_p4)
}
  0x28   : > { %s2663_s21 = smov 128   ;;  %s2664_s22 = smov 8  }
  0x29   : > { %2406 = dma.hbm_to_vmem [thread:$0]  (!%p2768_p11), %s4276_s1, 256, %s2761_s29, [#allocation7], %s2663_s21, %s2663_s21, %s2664_s22  }
  0x2a   : > { %s2515_s9 = scalar_lea.hbm %s4277_s2, 640 }
  0x2b   : > { %p2516_p1 = scmp.ne.s32.totalorder %s4277_s2, %s2515_s9  ;;  %p2522_p10 = scmp.lt.u32.totalorder %s2515_s9, %s4277_s2 }
  0x2d   : > { %p2518_p4 = pnand %p2516_p1, %p2489_p13 }
  0x2f   : > { %p2519_p6 = pneg %p2518_p4 }
  0x31   : > { %p2524_p3 = pnand %p2522_p10, %p2519_p6 }
  0x33   : > { %2527 = shalt.err (!%p2524_p3)
}
  0x34   : > { %s2528_s29 = scalar_lea.vmem %s2772_s6, 640  ;;  %p2536_p12 = scmp.lt.s32.totalorder %s2772_s6, %s2772_s6 }
  0x35   : > { %p2529_p5 = scmp.ne.s32.totalorder %s2772_s6, %s2528_s29  ;;  %p2537_p0 = scmp.lt.s32.totalorder %s2528_s29, %s2528_s29 }
  0x37   : > { %p2531_p7 = pnand %p2529_p5, %p2489_p13  ;;  %p2538_p1 = por %p2537_p0, %p2536_p12 }
  0x39   : > { %p2532_p9 = pneg %p2531_p7 }
  0x3b   : > { %p2539_p4 = pnand %p2538_p1, %p2532_p9 }
  0x3d   : > { %2542 = shalt.err (!%p2539_p4)
}
  0x3e   : > { %2409 = dma.hbm_to_vmem [thread:$0]  (!%p2768_p11), %s4277_s2, 640, %s2772_s6, [#allocation7], %s2663_s21, %s2663_s21, %s2664_s22  }
  0x3f   : > { %s33_s30 = sadd.s32 1, %s2655_s19  ;;  %s40_s5 = sadd.s32 1, %s2647_s17 }
  0x40   : > { %p35_p13 = scmp.ge.s32.totalorder %s33_s30, 2  ;;  %p47_p6 = scmp.ne.s32.totalorder %s2647_s17, %s2643_s16 }
  0x41   : > { %p48_p10 = scmp.eq.s32.totalorder %s2659_s20, 0  ;;  %p2420_p3 = scmp.lt.s32.totalorder %s2659_s20, 2 }
  0x42   : > { %s4370_s30 = smov (%p35_p13, %s33_s30), 0  ;;  %p2842_p7 = por %p2741_p2, %p47_p6 }
  0x43   : > { %p49_p5 = por %p48_p10, %p47_p6  ;;  %s37_s8 = ssub.s32 %s2655_s19, %s4370_s30 }
  0x44   : > { %s4301_s7 = scalar_select %p2842_p7, 1, 0 }
  0x45   : > { %s197_s9 = sand.u32 1, %s2647_s17   ;;  %p38_p9 = scmp.eq.s32.totalorder %s37_s8, 0 }
  0x46   : > { %s2251_s6 = sshll.u32 %s197_s9, 6  ;;  %s2331_s10 = sshll.u32 %s2655_s19, 10 }
  0x47   : > { %s2851_s11 = scalar_select %p38_p9, %s2647_s17, %s40_s5  }
  0x48   : > { %s2856_s29 = scalar_lea.hbm %s4275_s0, %s2331_s10  ;;  %s201_s24 = scalar_lea.vmem [#allocation3], %s2251_s6 }
  0x49   : > { %s208_s14 = sshll.u32 %s201_s24, 4  ;;  %p2860_p2 = pnand %p2420_p3, %p49_p5  ;;  %s2864_s14 = int_to_ptr.vmem [resolvable:$true] %s208_s14 }
  0x4a   : > { %s2866_s5 = scalar_lea.sflag [#allocation4], %s197_s9  ;;  %s2543_s8 = scalar_lea.hbm %s2856_s29, 1024 }
  0x4b   : > { %p2544_p11 = scmp.ne.s32.totalorder %s2856_s29, %s2543_s8  ;;  %p2545_p12 = pneg %p2860_p2 }
  0x4c   : > { %s2548_s12 = scalar_lea.hbm %s4275_s0, 2048  ;;  %p2549_p4 = scmp.lt.u32.totalorder %s2856_s29, %s4275_s0 }
  0x4d   : > { %p2546_p0 = pnand %p2545_p12, %p2544_p11  ;;  %p2550_p13 = scmp.lt.u32.totalorder %s2548_s12, %s2543_s8 }
  0x4e   : > { %p2552_p10 = scmp.lt.u32.totalorder %s2543_s8, %s2856_s29 }
  0x4f   : > { %p2547_p1 = pneg %p2546_p0  ;;  %p2551_p6 = por %p2550_p13, %p2549_p4 }
  0x51   : > { %p2553_p3 = por %p2552_p10, %p2551_p6 }
  0x53   : > { %p2554_p5 = pnand %p2553_p3, %p2547_p1 }
  0x55   : > { %2557 = shalt.err (!%p2554_p5)
}
  0x56   : > { %s2558_s9 = scalar_lea.vmem %s2864_s14, 1024  ;;  %s2665_s6 = smov [#allocation3]  }
  0x57   : > { %p2559_p9 = scmp.ne.s32.totalorder %s2864_s14, %s2558_s9  ;;  %s2563_s10 = sshll.u32 %s2665_s6, 4  ;;  %s2564_s10 = int_to_ptr.vmem [resolvable:$false] %s2563_s10 }
  0x58   : > { %s2565_s13 = scalar_lea.vmem %s2564_s10, 2048  ;;  %p2566_p7 = scmp.lt.s32.totalorder %s2864_s14, %s2564_s10 }
  0x59   : > { %p2561_p11 = pnand %p2559_p9, %p2545_p12  ;;  %p2567_p4 = scmp.lt.s32.totalorder %s2565_s13, %s2558_s9 }
  0x5b   : > { %p2562_p0 = pneg %p2561_p11  ;;  %p2568_p13 = por %p2567_p4, %p2566_p7 }
  0x5d   : > { %p2569_p6 = pnand %p2568_p13, %p2562_p0 }
  0x5f   : > { %2572 = shalt.err (!%p2569_p6)
}
  0x60   : > { %2413 = dma.hbm_to_vmem [thread:$0]  (!%p2860_p2), %s2856_s29, 1024, %s2864_s14, %s2866_s5, %s2663_s21, %s2663_s21, %s2664_s22  }
  0x61   : > { %220 = sbr.rel (%p2757_p8) target bundleno = 803 (0x323), region = 36 }
  0x68   : > { %s2900_s8 = sand.u32 1, %s2643_s16   ;;  %p4303_p7 = scmp.ne.s32.totalorder %s4297_s25, 0 }
  0x69   : > { %s2255_s12 = sshll.u32 %s2900_s8, 6  ;;  %s223_s24 = scalar_lea.sflag [#allocation4], %s2900_s8 }
  0x6a   : > { %s2904_s9 = scalar_lea.vmem [#allocation3], %s2255_s12 }
  0x6b   : > { %2626 = dma.done.wait (%p4303_p7), %s223_s24, 1024  }
  0x6c   : > { %2628 = vsyncadd (%p4303_p7), %s223_s24, 4294966272  ;;  %p4304_p2 = scmp.ne.s32.totalorder %s4295_s23, 0 }
  0x6e   : > { %2630 = dma.done.wait (%p4304_p2), [#allocation7], 896  }
  0x6f   : > { %2632 = vsyncadd (%p4304_p2), [#allocation7], 4294966400  ;;  %vm272_vm0 = vcmask 130048   ;;  %v270_v0 = vld [vmem:[#allocation6] sm:$0xff]  ;;  %v271_v1 = vld [vmem:[#allocation6 + $0x8] sm:$0xff]  ;;  %v402_v11 = vlaneseq  ;;  %v2667_v17 = vmov 0.0  }
  0x70   : > { %v262_v2 = vld [vmem:[%s2904_s9] sm:$0xff]  ;;  %v2379_v3 = vpack.c.bf16 %v271_v1, %v270_v0  ;;  %v268_v4 = vld [vmem:[%s2904_s9 + $0x30] sm:$0xff]  ;;  %v263_v5 = vld [vmem:[%s2904_s9 + $0x8] sm:$0xff]  ;;  %v2666_v12 = vmov 1966171168   ;;  %vm466_vm1 = vcmask 1041408  }
  0x71   : > { %2353 = vmatprep.mubr.msk.f32.mxu0 %vm272_vm0, %v262_v2  ;;  %2362 = vmatprep.mubr.msk.f32.mxu1 %vm272_vm0, %v268_v4  ;;  %v269_v6 = vld [vmem:[%s2904_s9 + $0x38] sm:$0xff]  ;;  %v264_v7 = vld [vmem:[%s2904_s9 + $0x10] sm:$0xff]  ;;  %v266_v9 = vld [vmem:[%s2904_s9 + $0x20] sm:$0xff]  ;;  %v920_v13 = vunpack.c.l.s4 %v2666_v12  ;;  %v403_v14 = vshrl.u32 %v402_v11, 7  ;;  %vm468_vm2 = vcmask 1043456   ;;  %vm470_vm3 = vcmask 1045504  }
  0x72   : > { %2380 = vmatprep.subr.bf16.mxu0 %v2379_v3  ;;  %2389 = vmatprep.subr.bf16.mxu1 %v2379_v3  ;;  %v265_v8 = vld [vmem:[%s2904_s9 + $0x18] sm:$0xff]  ;;  %v267_v10 = vld [vmem:[%s2904_s9 + $0x28] sm:$0xff]  ;;  %s2668_s23 = smov 1   ;;  %s2669_s25 = smov 127   ;;  %vm743_vm4 = vcmask 1041409   ;;  %vm2671_vm5 = vmmov 0  }
  0x73   : > { %2382 = vmatpush3.bf16.msra.mxu0 %v2379_v3  ;;  %2390 = vmatpush3.bf16.msra.mxu1 %v2379_v3  ;;  %v921_v15 = vunpack.c.0.s8 %v920_v13  ;;  %v2942_v22 = vsub.s32 0, %v403_v14  ;;  %v2944_v23 = vsub.s32 1, %v403_v14  ;;  %v2946_v24 = vsub.s32 2, %v403_v14  ;;  %s2258_s22 = sshll.u32 %s2900_s8, 7  ;;  %s2672_s14 = smov 96  }
  0x74   : > { %v2948_v25 = vsub.s32 3, %v403_v14  ;;  %v2950_v26 = vsub.s32 4, %v403_v14  ;;  %v2952_v27 = vsub.s32 5, %v403_v14  ;;  %v2954_v28 = vsub.s32 6, %v403_v14  ;;  %s4178_s29 = scalar_lea.vmem [#allocation9], %s2258_s22  ;;  %s2673_s28 = smov 64  }
  0x75   : > { %v2931_v16 = vsub.s32 %v921_v15, %v403_v14  ;;  %v2956_v29 = vsub.s32 7, %v403_v14  ;;  %vm746_vm6 = vcmask 1042434   ;;  %vm749_vm7 = vcmask 1043459   ;;  %s2674_s5 = smov 32   ;;  %s2332_s6 = sshll.u32 %s2651_s18, 11 }
  0x76   : > { %2354 = vmatmul.mubr.msk.f32.vlgmr.msra.gmra.mrb[0].mxu0 %vm272_vm0, %v263_v5  ;;  %2363 = vmatmul.mubr.msk.f32.vlgmr.msra.gmra.mrb[0].mxu1 %vm272_vm0, %v269_v6  ;;  %vm1032_vm8 = vcmask 7168   ;;  %vm1081_vm10 = vcmask 1039360   ;;  %vm2062_vm12 = vcmask 261120   ;;  %s2138_s10 = sshll.u32 %s4178_s29, 4  ;;  %s4222_s24 = scalar_lea.hbm %s4279_s4, %s2332_s6  ;;  %s4224_s10 = int_to_ptr.vmem [resolvable:$true] %s2138_s10 }
  0x77   : > { %2356 = vmatprep.mubr.msk.f32.mxu0 %vm272_vm0, %v264_v7  ;;  %v2935_v18 = vrot.slane %v2667_v17, %v2931_v16  ;;  %2369 = vmatprep.mubr.msk.f32.mxu1 %vm2671_vm5, %v2667_v17  ;;  %p4361_p12 = scmp.ne.s32.totalorder %s4301_s7, 0  ;;  %s2675_s18 = smov [#allocation9]  }
  0x79   : > { %2275 = vst.sshfl [vmem:[#allocation2 + $0x21] sm:$0x1 pattern:$0x73625140] %v2935_v18  ;;  %v926_v19 = vcombine.high %v2935_v18, %v2935_v18 }
  0x7a   : > { %2357 = vmatmul.mubr.msk.f32.gmra.mrb[2].mxu0 %vm272_vm0, %v265_v8  ;;  %2273 = vst.sshfl [vmem:[#allocation2] sm:$0x1 pattern:$0x73625140] %v2935_v18 }
  0x7b   : > { %2359 = vmatprep.mubr.msk.f32.mxu0 %vm272_vm0, %v266_v9  ;;  %v940_v20 = vrot.slane %v926_v19, %v2931_v16  ;;  %2274 = vst.sshfl [vmem:[#allocation2 + $0x28] sm:$0x1 pattern:$0x73625140] %v926_v19 }
  0x7c   : > { %2276 = vst.sshfl [vmem:[#allocation2 + $0x49] sm:$0x1 pattern:$0x73625140] %v926_v19 }
  0x7d   : > { %v942_v21 = vcombine.high %v940_v20, %v940_v20 }
  0x7e   : > { %2360 = vmatmul.mubr.msk.f32.gmra.mrb[4].mxu0 %vm272_vm0, %v267_v10 }
  0x7f   : > { %950 = vst [vmem:[#allocation2 + $0x78] sm:$0x1] %v942_v21  ;;  %988 = vst [vmem:[#allocation2 + $0x99] sm:$0x1] %v942_v21 }
 0x149   : > { %v2355_v30 = vpop.f32.mrb[0].mxu0  ;;  %v2958_v31 = vpop.f32.mrb[0].mxu1 }
 0x14a   : > { %v437_v32 = vrot.slane %v2355_v30, %v2942_v22  ;;  %v441_v33 = vrot.slane %v2355_v30, %v2944_v23  ;;  %v445_v34 = vrot.slane %v2355_v30, %v2946_v24  ;;  %v449_v35 = vrot.slane %v2355_v30, %v2948_v25  ;;  %v363_v36 = vpop.f32.mrb[1].mxu0  ;;  %v2964_v37 = vpop.f32.mrb[1].mxu1 }
 0x14b   : > { %v453_v38 = vrot.slane %v2355_v30, %v2950_v26  ;;  %v457_v39 = vrot.slane %v2355_v30, %v2952_v27  ;;  %v461_v40 = vrot.slane %v2355_v30, %v2954_v28  ;;  %v465_v41 = vrot.slane %v2355_v30, %v2956_v29 }
 0x14c   : > { %v475_v42 = vsel %vm466_vm1, %v437_v32, %v441_v33  ;;  %v405_v43 = vrot.slane %v363_v36, %v2942_v22  ;;  %v409_v44 = vrot.slane %v363_v36, %v2944_v23  ;;  %v413_v45 = vrot.slane %v363_v36, %v2946_v24 }
 0x14d   : > { %v476_v46 = vsel %vm468_vm2, %v475_v42, %v445_v34  ;;  %v478_v47 = vsel %vm466_vm1, %v453_v38, %v457_v39  ;;  %v417_v48 = vrot.slane %v363_v36, %v2948_v25  ;;  %v421_v49 = vrot.slane %v363_v36, %v2950_v26  ;;  %v2978_v50 = vpop.f32.mrb[2].mxu0 }
 0x14e   : > { %v2981_v51 = vsel %vm470_vm3, %v476_v46, %v449_v35  ;;  %v479_v52 = vsel %vm468_vm2, %v478_v47, %v461_v40  ;;  %v425_v53 = vrot.slane %v363_v36, %v2952_v27  ;;  %v429_v54 = vrot.slane %v363_v36, %v2954_v28  ;;  %v2986_v55 = vpop.f32.mrb[3].mxu0 }
 0x14f   : > { %v2989_v56 = vsel %vm470_vm3, %v479_v52, %v465_v41  ;;  %483 = vst [vmem:[#allocation2 + $0x11] sm:$0xff] %v2981_v51  ;;  %v433_v57 = vrot.slane %v363_v36, %v2956_v29  ;;  %v467_v58 = vsel %vm466_vm1, %v405_v43, %v409_v44  ;;  %1117 = vrot.lane.b32.xlu0 %v2981_v51, %s2668_s23 }
 0x150   : > { %484 = vst [vmem:[#allocation2 + $0x19] sm:$0xff] %v2989_v56  ;;  %v469_v59 = vsel %vm468_vm2, %v467_v58, %v413_v45  ;;  %v472_v60 = vsel %vm466_vm1, %v421_v49, %v425_v53  ;;  %v682_v61 = vrot.slane %v2958_v31, %v2942_v22  ;;  %v686_v62 = vrot.slane %v2958_v31, %v2944_v23 }
 0x151   : > { %v3004_v63 = vsel %vm470_vm3, %v469_v59, %v417_v48  ;;  %v473_v0 = vsel %vm468_vm2, %v472_v60, %v429_v54  ;;  %v690_v1 = vrot.slane %v2958_v31, %v2946_v24  ;;  %v694_v2 = vrot.slane %v2958_v31, %v2948_v25  ;;  %v3011_v3 = vpop.f32.mrb[4].mxu0 }
 0x152   : > { %v3014_v4 = vsel %vm470_vm3, %v473_v0, %v433_v57  ;;  %481 = vst [vmem:[#allocation2 + $0x1] sm:$0xff] %v3004_v63  ;;  %v698_v5 = vrot.slane %v2958_v31, %v2950_v26  ;;  %v702_v6 = vrot.slane %v2958_v31, %v2952_v27  ;;  %v706_v7 = vrot.slane %v2958_v31, %v2954_v28  ;;  %v3023_v8 = vpop.f32.mrb[5].mxu0 }
 0x153   : > { %482 = vst [vmem:[#allocation2 + $0x9] sm:$0xff] %v3014_v4  ;;  %v710_v9 = vrot.slane %v2958_v31, %v2956_v29  ;;  %v717_v10 = vsel %vm466_vm1, %v682_v61, %v686_v62  ;;  %v650_v12 = vrot.slane %v2964_v37, %v2942_v22  ;;  %v654_v13 = vrot.slane %v2964_v37, %v2944_v23 }
 0x154   : > { %1163 = vrot.lane.b32.xlu0 %v2981_v51, %s2669_s25  ;;  %v718_v14 = vsel %vm468_vm2, %v717_v10, %v690_v1  ;;  %v720_v15 = vsel %vm466_vm1, %v698_v5, %v702_v6  ;;  %v658_v19 = vrot.slane %v2964_v37, %v2946_v24  ;;  %v662_v20 = vrot.slane %v2964_v37, %v2948_v25 }
 0x155   : > { %v3042_v21 = vsel %vm470_vm3, %v718_v14, %v694_v2  ;;  %v721_v30 = vsel %vm468_vm2, %v720_v15, %v706_v7  ;;  %v666_v31 = vrot.slane %v2964_v37, %v2950_v26  ;;  %v670_v32 = vrot.slane %v2964_v37, %v2952_v27 }
 0x156   : > { %v3050_v33 = vsel %vm470_vm3, %v721_v30, %v710_v9  ;;  %726 = vst [vmem:[#allocation2 + $0x89] sm:$0xff] %v3042_v21  ;;  %v674_v34 = vrot.slane %v2964_v37, %v2954_v28  ;;  %v678_v35 = vrot.slane %v2964_v37, %v2956_v29  ;;  %v711_v36 = vsel %vm466_vm1, %v650_v12, %v654_v13 }
 0x157   : > { %v3058_v38 = vld [vmem:[#allocation2 + $0x18] sm:$0xff]  ;;  %727 = vst [vmem:[#allocation2 + $0x91] sm:$0xff] %v3050_v33  ;;  %v712_v39 = vsel %vm468_vm2, %v711_v36, %v658_v19  ;;  %v714_v40 = vsel %vm466_vm1, %v666_v31, %v670_v32  ;;  %v520_v44 = vrot.slane %v2978_v50, %v2942_v22  ;;  %v524_v45 = vrot.slane %v2978_v50, %v2944_v23 }
 0x158   : > { %v3063_v41 = vld [vmem:[#allocation2 + $0x12] sm:$0xff]  ;;  %1026 = vrot.lane.b32.xlu1 %v3058_v38, %s2668_s23  ;;  %v3068_v42 = vsel %vm470_vm3, %v712_v39, %v662_v20  ;;  %v715_v37 = vsel %vm468_vm2, %v714_v40, %v674_v34  ;;  %v528_v46 = vrot.slane %v2978_v50, %v2946_v24  ;;  %v532_v47 = vrot.slane %v2978_v50, %v2948_v25  ;;  %v3165_v40 = vld [vmem:[#allocation2 + $0x1a] sm:$0xff] }
 0x159   : > { %v3072_v43 = vsel %vm470_vm3, %v715_v37, %v678_v35  ;;  %724 = vst [vmem:[#allocation2 + $0x79] sm:$0xff] %v3068_v42  ;;  %1204 = vrot.lane.b32.xlu0 %v3063_v41, %s2668_s23  ;;  %v536_v48 = vrot.slane %v2978_v50, %v2950_v26  ;;  %v540_v49 = vrot.slane %v2978_v50, %v2952_v27  ;;  %v3139_v15 = vld [vmem:[#allocation2] sm:$0xff] }
 0x15a   : > { %725 = vst [vmem:[#allocation2 + $0x81] sm:$0xff] %v3072_v43  ;;  %v544_v52 = vrot.slane %v2978_v50, %v2954_v28  ;;  %v548_v53 = vrot.slane %v2978_v50, %v2956_v29  ;;  %v555_v54 = vsel %vm466_vm1, %v520_v44, %v524_v45  ;;  %v488_v57 = vrot.slane %v2986_v55, %v2942_v22 }
 0x15b   : > { %v556_v58 = vsel %vm468_vm2, %v555_v54, %v528_v46  ;;  %v558_v59 = vsel %vm466_vm1, %v536_v48, %v540_v49  ;;  %v492_v60 = vrot.slane %v2986_v55, %v2944_v23  ;;  %v496_v61 = vrot.slane %v2986_v55, %v2946_v24  ;;  %v3173_v46 = vld [vmem:[#allocation2 + $0x8] sm:$0xff] }
 0x15c   : > { %1075 = vrot.lane.b32.xlu1 %v3058_v38, %s2669_s25  ;;  %v3108_v62 = vsel %vm470_vm3, %v556_v58, %v532_v47  ;;  %v559_v50 = vsel %vm468_vm2, %v558_v59, %v544_v52  ;;  %v500_v0 = vrot.slane %v2986_v55, %v2948_v25  ;;  %v504_v2 = vrot.slane %v2986_v55, %v2950_v26  ;;  %v3222_v59 = vld [vmem:[#allocation2 + $0x10] sm:$0xff] }
 0x15d   : > { %1250 = vrot.lane.b32.xlu0 %v3063_v41, %s2669_s25  ;;  %v3116_v1 = vsel %vm470_vm3, %v559_v50, %v548_v53  ;;  %564 = vst [vmem:[#allocation2 + $0x39] sm:$0xff] %v3108_v62  ;;  %v508_v5 = vrot.slane %v2986_v55, %v2952_v27  ;;  %v512_v6 = vrot.slane %v2986_v55, %v2954_v28  ;;  %v3256_v50 = vld [vmem:[#allocation2 + $0xa] sm:$0xff] }
 0x15e   : > { %565 = vst [vmem:[#allocation2 + $0x41] sm:$0xff] %v3116_v1  ;;  %v516_v7 = vrot.slane %v2986_v55, %v2956_v29  ;;  %v549_v9 = vsel %vm466_vm1, %v488_v57, %v492_v60  ;;  %v601_v55 = vrot.slane %v3011_v3, %v2942_v22  ;;  %v605_v20 = vrot.slane %v3011_v3, %v2944_v23 }
 0x15f   : > { %v550_v10 = vsel %vm468_vm2, %v549_v9, %v496_v61  ;;  %v552_v12 = vsel %vm466_vm1, %v504_v2, %v508_v5  ;;  %v609_v30 = vrot.slane %v3011_v3, %v2946_v24  ;;  %v613_v31 = vrot.slane %v3011_v3, %v2948_v25 }
 0x160   : > { %1119 = vrot.lane.b32.xlu1 %v2989_v56, %s2668_s23  ;;  %v3134_v13 = vsel %vm470_vm3, %v550_v10, %v500_v0  ;;  %v553_v14 = vsel %vm468_vm2, %v552_v12, %v512_v6  ;;  %v617_v32 = vrot.slane %v3011_v3, %v2950_v26  ;;  %v621_v34 = vrot.slane %v3011_v3, %v2952_v27  ;;  %v736_v12 = vld [vmem:[#allocation6] sm:$0xff] }
 0x161   : > { %1900 = vrot.lane.b32.xlu0 %v3042_v21, %s2668_s23  ;;  %v3142_v19 = vsel %vm470_vm3, %v553_v14, %v516_v7  ;;  %562 = vst [vmem:[#allocation2 + $0x29] sm:$0xff] %v3134_v13  ;;  %v625_v35 = vrot.slane %v3011_v3, %v2954_v28  ;;  %v629_v36 = vrot.slane %v3011_v3, %v2956_v29  ;;  %v3252_v61 = vld [vmem:[#allocation2 + $0x88] sm:$0xff]  ;;  %v3266_v0 = vld [vmem:[#allocation2 + $0x80] sm:$0xff] }
 0x162   : > { %563 = vst [vmem:[#allocation2 + $0x31] sm:$0xff] %v3142_v19  ;;  %v636_v39 = vsel %vm466_vm1, %v601_v55, %v605_v20  ;;  %v639_v44 = vsel %vm466_vm1, %v617_v32, %v621_v34  ;;  %v569_v45 = vrot.slane %v3023_v8, %v2942_v22  ;;  %v573_v48 = vrot.slane %v3023_v8, %v2944_v23  ;;  %v737_v14 = vld [vmem:[#allocation6 + $0x8] sm:$0xff]  ;;  %v734_v32 = vld [vmem:[%s2904_s9 + $0x20] sm:$0x1]  ;;  %v735_v34 = vld [vmem:[%s2904_s9 + $0x30] sm:$0x1] }
 0x163   : > { %v637_v37 = vsel %vm468_vm2, %v636_v39, %v609_v30  ;;  %v640_v3 = vsel %vm468_vm2, %v639_v44, %v625_v35  ;;  %v577_v49 = vrot.slane %v3023_v8, %v2946_v24  ;;  %v581_v52 = vrot.slane %v3023_v8, %v2948_v25  ;;  %v732_v30 = vld [vmem:[%s2904_s9] sm:$0x1] }
 0x164   : > { %1165 = vrot.lane.b32.xlu1 %v2989_v56, %s2669_s25  ;;  %v3176_v47 = vsel %vm470_vm3, %v637_v37, %v613_v31  ;;  %v3186_v22 = vsel %vm470_vm3, %v640_v3, %v629_v36  ;;  %v585_v53 = vrot.slane %v3023_v8, %v2950_v26  ;;  %v589_v23 = vrot.slane %v3023_v8, %v2952_v27  ;;  %v733_v31 = vld [vmem:[%s2904_s9 + $0x10] sm:$0x1] }
 0x165   : > { %1020 = vrot.lane.b32.xlu0 %v3139_v15, %s2668_s23  ;;  %645 = vst [vmem:[#allocation2 + $0x61] sm:$0xff] %v3176_v47  ;;  %646 = vst [vmem:[#allocation2 + $0x69] sm:$0xff] %v3186_v22  ;;  %v593_v24 = vrot.slane %v3023_v8, %v2954_v28  ;;  %v597_v54 = vrot.slane %v3023_v8, %v2956_v29  ;;  %v630_v57 = vsel %vm466_vm1, %v569_v45, %v573_v48  ;;  %v3217_v8 = vld [vmem:[#allocation2 + $0x90] sm:$0xff]  ;;  %v3284_v2 = vld [vmem:[#allocation2 + $0x40] sm:$0xff]  ;;  %v2670_v55 = vmov 0.0|0.0  }
 0x166   : > { %v631_v58 = vsel %vm468_vm2, %v630_v57, %v577_v49  ;;  %v633_v25 = vsel %vm466_vm1, %v585_v53, %v589_v23  ;;  %v933_v29 = vrot.slane %v2935_v18, %v2931_v16  ;;  %v3236_v16 = vld [vmem:[#allocation2 + $0x2] sm:$0xff]  ;;  %v3246_v18 = vld [vmem:[#allocation2 + $0x78] sm:$0xff]  ;;  %2383 = vmatprep.subr.bf16.mxu1 %v2670_v55  ;;  %v2384_v20 = vpack.c.bf16 %v737_v14, %v736_v12  ;;  %v2268_v48 = vld [vmem:[%s2904_s9 + $0xf] sm:$0x1] }
 0x167   : > { %v3208_v26 = vsel %vm470_vm3, %v631_v58, %v581_v52  ;;  %v634_v27 = vsel %vm468_vm2, %v633_v25, %v593_v24  ;;  %v3288_v5 = vld [vmem:[#allocation2 + $0x3a] sm:$0xff]  ;;  %v3308_v9 = vld [vmem:[#allocation2 + $0x42] sm:$0xff]  ;;  %v742_v35 = vrot.slane %v733_v31, 7  ;;  %v745_v39 = vrot.slane %v734_v32, 6  ;;  %v2270_v23 = vld [vmem:[%s2904_s9 + $0x2f] sm:$0x1] }
 0x168   : > { %1206 = vrot.lane.b32.xlu1 %v3165_v40, %s2668_s23  ;;  %v3212_v28 = vsel %vm470_vm3, %v634_v27, %v597_v54  ;;  %643 = vst [vmem:[#allocation2 + $0x51] sm:$0xff] %v3208_v26  ;;  %v941_v60 = vcombine.high %v933_v29, %v933_v29  ;;  %v3298_v6 = vld [vmem:[#allocation2 + $0x28] sm:$0xff]  ;;  %2385 = vmatpush3.bf16.msra.mxu1 %v2384_v20  ;;  %v748_v37 = vrot.slane %v735_v34, 5  ;;  %v990_v45 = vand.u32 127, %v402_v11  ;;  %v2269_v49 = vld [vmem:[%s2904_s9 + $0x1f] sm:$0x1] }
 0x169   : > { %1022 = vrot.lane.b32.xlu0 %v3173_v46, %s2668_s23  ;;  %644 = vst [vmem:[#allocation2 + $0x59] sm:$0xff] %v3212_v28  ;;  %v3304_v7 = vld [vmem:[#allocation2 + $0x38] sm:$0xff]  ;;  %v3318_v10 = vld [vmem:[#allocation2 + $0x30] sm:$0xff]  ;;  %2386 = vmatprep.subr.bf16.mxu1 %v2670_v55  ;;  %v744_v44 = vsel %vm743_vm4, %v742_v35, %v732_v30  ;;  %v835_v54 = vrot.slane %v2269_v49, 7  ;;  %v837_v11 = vrot.slane %v2270_v23, 6 }
 0x16a   : > { %987 = vst [vmem:[#allocation2 + $0x71] sm:$0x1] %v941_v60  ;;  %949 = vst [vmem:[#allocation2 + $0x50] sm:$0x1] %v941_v60  ;;  %v747_v3 = vsel %vm746_vm6, %v745_v39, %v744_v44  ;;  %v3343_v52 = vld [vmem:[#allocation2 + $0x2a] sm:$0xff]  ;;  %v995_v27 = vand.u32 31, %v990_v45 }
 0x16b   : > { %4305 = vst [vmem:[#allocation13_spill] sm:$0xff] %v3343_v52  ;;  %v750_v53 = vsel %vm749_vm7, %v748_v37, %v747_v3  ;;  %v2271_v24 = vld [vmem:[%s2904_s9 + $0x3f] sm:$0x1]  ;;  %v836_v25 = vsel %vm743_vm4, %v835_v54, %v2268_v48  ;;  %v3363_v12 = vld [vmem:[#allocation8] ss:$0 sm:$0xff]  ;;  %s2123_s9 = scalar_lea.sflag [#allocation5], %s2900_s8 }
 0x16c   : > { %1252 = vrot.lane.b32.xlu1 %v3165_v40, %s2669_s25  ;;  %2370 = vmatmul.mubr.msk.f32.vlgmr.msra.gmra.mrb[2].mxu1 %vm272_vm0, %v750_v53  ;;  %v839_v58 = vrot.slane %v2271_v24, 5  ;;  %v838_v29 = vsel %vm746_vm6, %v837_v11, %v836_v25  ;;  %vm3365_vm9 = vcmp.ne.s32.totalorder %v995_v27, 0  ;;  %v3374_v31 = vld [vmem:[#allocation8 + $0x1] ss:$0 sm:$0xff]  ;;  %v3379_v32 = vld [vmem:[%s4278_s3] ss:$0 sm:$0xff] }
 0x16d   : > { %1069 = vrot.lane.b32.xlu0 %v3139_v15, %s2669_s25  ;;  %2388 = vmatpush3.bf16.msra.mxu1 %v2384_v20  ;;  %v3370_v20 = vld [vmem:[#allocation2 + $0x32] sm:$0xff]  ;;  %vm3390_vm11 = vcmp.ne.s32.totalorder %v995_v27, 31  ;;  %v1064_v45 = vmul.f32 %v3374_v31, %v3058_v38  ;;  %v3408_v11 = vld [vmem:[#allocation2 + $0x68] sm:$0xff] }
 0x16e   : > { %2376 = vmatprep.mubr.msk.f32.mxu1 %vm2671_vm5, %v2667_v17  ;;  %v840_v60 = vsel %vm749_vm7, %v839_v58, %v838_v29  ;;  %v3388_v39 = vld [vmem:[#allocation8 + $0x2] ss:$0 sm:$0xff]  ;;  %4310 = vst [vmem:[#allocation14_spill] sm:$0xff] %v3408_v11  ;;  %v3412_v25 = vld [vmem:[#allocation8 + $0x4] ss:$0 sm:$0xff] }
 0x16f   : > { %v3414_v27 = vld [vmem:[#allocation8 + $0x3] ss:$0 sm:$0xff] }
 0x170   : > { %1815 = vrot.lane.b32.xlu1 %v3217_v8, %s2668_s23  ;;  %2377 = vmatmul.mubr.msk.f32.vlgmr.msra.gmra.mrb[4].mxu1 %vm272_vm0, %v840_v60  ;;  %v3420_v60 = vld [vmem:[#allocation2 + $0x62] sm:$0xff] }
 0x171   : > { %1073 = vrot.lane.b32.xlu0 %v3222_v59, %s2669_s25  ;;  %4312 = vst [vmem:[#allocation16_spill] sm:$0xff] %v3420_v60 }
 0x174   : > { %1861 = vrot.lane.b32.xlu1 %v3217_v8, %s2669_s25 }
 0x175   : > { %1113 = vrot.lane.b32.xlu0 %v3004_v63, %s2668_s23 }
 0x178   : > { %1902 = vrot.lane.b32.xlu1 %v3050_v33, %s2668_s23 }
 0x179   : > { %1159 = vrot.lane.b32.xlu0 %v3004_v63, %s2669_s25 }
 0x17c   : > { %1024 = vrot.lane.b32.xlu1 %v3222_v59, %s2668_s23 }
 0x17d   : > { %1200 = vrot.lane.b32.xlu0 %v3236_v16, %s2668_s23 }
 0x180   : > { %1071 = vrot.lane.b32.xlu1 %v3173_v46, %s2669_s25 }
 0x181   : > { %1246 = vrot.lane.b32.xlu0 %v3236_v16, %s2669_s25 }
 0x184   : > { %1115 = vrot.lane.b32.xlu1 %v3014_v4, %s2668_s23 }
 0x185   : > { %1809 = vrot.lane.b32.xlu0 %v3246_v18, %s2668_s23 }
 0x188   : > { %1161 = vrot.lane.b32.xlu1 %v3014_v4, %s2669_s25 }
 0x189   : > { %1813 = vrot.lane.b32.xlu0 %v3252_v61, %s2668_s23 }
 0x18c   : > { %1202 = vrot.lane.b32.xlu1 %v3256_v50, %s2668_s23 }
 0x18d   : > { %1855 = vrot.lane.b32.xlu0 %v3246_v18, %s2669_s25 }
 0x190   : > { %1248 = vrot.lane.b32.xlu1 %v3256_v50, %s2669_s25 }
 0x191   : > { %1859 = vrot.lane.b32.xlu0 %v3252_v61, %s2669_s25 }
 0x194   : > { %1811 = vrot.lane.b32.xlu1 %v3266_v0, %s2668_s23 }
 0x195   : > { %1896 = vrot.lane.b32.xlu0 %v3068_v42, %s2668_s23 }
 0x198   : > { %1857 = vrot.lane.b32.xlu1 %v3266_v0, %s2669_s25 }
 0x199   : > { %1942 = vrot.lane.b32.xlu0 %v3068_v42, %s2669_s25 }
 0x19c   : > { %1898 = vrot.lane.b32.xlu1 %v3072_v43, %s2668_s23 }
 0x19d   : > { %1378 = vrot.lane.b32.xlu0 %v3108_v62, %s2668_s23 }
 0x1a0   : > { %1944 = vrot.lane.b32.xlu1 %v3072_v43, %s2669_s25 }
 0x1a1   : > { %1424 = vrot.lane.b32.xlu0 %v3108_v62, %s2669_s25 }
 0x1a4   : > { %1293 = vrot.lane.b32.xlu1 %v3284_v2, %s2668_s23 }
 0x1a5   : > { %1465 = vrot.lane.b32.xlu0 %v3288_v5, %s2668_s23 }
 0x1a8   : > { %1339 = vrot.lane.b32.xlu1 %v3284_v2, %s2669_s25 }
 0x1a9   : > { %1511 = vrot.lane.b32.xlu0 %v3288_v5, %s2669_s25 }
 0x1ac   : > { %1380 = vrot.lane.b32.xlu1 %v3116_v1, %s2668_s23 }
 0x1ad   : > { %1287 = vrot.lane.b32.xlu0 %v3298_v6, %s2668_s23 }
 0x1b0   : > { %1426 = vrot.lane.b32.xlu1 %v3116_v1, %s2669_s25 }
 0x1b1   : > { %1291 = vrot.lane.b32.xlu0 %v3304_v7, %s2668_s23 }
 0x1b4   : > { %1467 = vrot.lane.b32.xlu1 %v3308_v9, %s2668_s23 }
 0x1b5   : > { %1333 = vrot.lane.b32.xlu0 %v3298_v6, %s2669_s25 }
 0x1b8   : > { %1513 = vrot.lane.b32.xlu1 %v3308_v9, %s2669_s25 }
 0x1b9   : > { %1337 = vrot.lane.b32.xlu0 %v3304_v7, %s2669_s25 }
 0x1bc   : > { %1289 = vrot.lane.b32.xlu1 %v3318_v10, %s2668_s23 }
 0x1bd   : > { %1374 = vrot.lane.b32.xlu0 %v3134_v13, %s2668_s23 }
 0x1c0   : > { %1335 = vrot.lane.b32.xlu1 %v3318_v10, %s2669_s25 }
 0x1c1   : > { %1420 = vrot.lane.b32.xlu0 %v3134_v13, %s2669_s25  ;;  %v3334_v36 = vpop.permute.xlu0 %1117 }
 0x1c4   : > { %1376 = vrot.lane.b32.xlu1 %v3142_v19, %s2668_s23 }
 0x1c5   : > { %1461 = vrot.lane.b32.xlu0 %v3343_v52, %s2668_s23 }
 0x1c6   : > { %v3350_v57 = vpop.permute.xlu0 %1163 }
 0x1c8   : > { %1422 = vrot.lane.b32.xlu1 %v3142_v19, %s2669_s25 }
 0x1c9   : > { %1507 = vrot.lane.b32.xlu0 %v3343_v52, %s2669_s25 }
 0x1ca   : > { %v1027_v14 = vpop.permute.xlu1 %1026 }
 0x1cb   : > { %v1036_v55 = vsel %vm1032_vm8, 0.0, %v1027_v14  ;;  %v3372_v30 = vpop.permute.xlu0 %1204 }
 0x1cc   : > { %v1042_v34 = vsel %vm3365_vm9, %v1036_v55, 0.0  ;;  %1463 = vrot.lane.b32.xlu1 %v3370_v20, %s2668_s23 }
 0x1cd   : > { %v1051_v35 = vmul.f32 %v3363_v12, %v1042_v34  ;;  %1639 = vrot.lane.b32.xlu0 %v3176_v47, %s2668_s23 }
 0x1ce   : > { %v1076_v37 = vpop.permute.xlu1 %1075 }
 0x1cf   : > { %v1055_v3 = vadd.f32 %v3379_v32, %v1051_v35  ;;  %v1085_v48 = vsel %vm1081_vm10, %v1076_v37, 0.0  ;;  %v3398_v49 = vpop.permute.xlu0 %1250  ;;  %v1154_v35 = vmul.f32 %v3412_v25, %v2989_v56 }
 0x1d0   : > { %v1091_v53 = vsel %vm3390_vm11, %v1085_v48, 0.0  ;;  %1509 = vrot.lane.b32.xlu1 %v3370_v20, %s2669_s25  ;;  %v3428_v48 = vld [vmem:[#allocation8 + $0x5] ss:$0 sm:$0xff] }
 0x1d1   : > { %v1068_v23 = vadd.f32 %v1064_v45, %v1055_v3  ;;  %v1100_v24 = vmul.f32 %v3388_v39, %v1091_v53  ;;  %1685 = vrot.lane.b32.xlu0 %v3176_v47, %s2669_s25 }
 0x1d2   : > { %v1120_v54 = vpop.permute.xlu1 %1119 }
 0x1d3   : > { %v1128_v38 = vsel %vm1032_vm8, 0.0, %v1120_v54  ;;  %v3410_v58 = vpop.permute.xlu0 %1900  ;;  %v1104_v14 = vadd.f32 %v1100_v24, %v1068_v23 }
 0x1d4   : > { %4311 = vst [vmem:[#allocation15_spill] sm:$0xff] %v3410_v58  ;;  %v1132_v29 = vsel %vm3365_vm9, %v1128_v38, 0.0  ;;  %1554 = vrot.lane.b32.xlu1 %v3408_v11, %s2668_s23 }
 0x1d5   : > { %v1141_v55 = vmul.f32 %v3414_v27, %v1132_v29  ;;  %1726 = vrot.lane.b32.xlu0 %v3420_v60, %s2668_s23 }
 0x1d6   : > { %v1166_v34 = vpop.permute.xlu1 %1165 }
 0x1d7   : > { %v1145_v37 = vadd.f32 %v1141_v55, %v1104_v14  ;;  %v1174_v45 = vsel %vm1081_vm10, %v1166_v34, 0.0  ;;  %v1021_v3 = vpop.permute.xlu0 %1020  ;;  %v3441_v14 = vld [vmem:[#allocation8 + $0x7] ss:$0 sm:$0xff] }
 0x1d8   : > { %v1178_v53 = vsel %vm3390_vm11, %v1174_v45, 0.0  ;;  %1600 = vrot.lane.b32.xlu1 %v3408_v11, %s2669_s25  ;;  %v1033_v23 = vsel %vm1032_vm8, 0.0, %v1021_v3  ;;  %v1061_v45 = vmul.f32 %v3374_v31, %v3139_v15 }
 0x1d9   : > { %v1158_v24 = vadd.f32 %v1154_v35, %v1145_v37  ;;  %v1187_v54 = vmul.f32 %v3428_v48, %v1178_v53  ;;  %v1039_v56 = vsel %vm3365_vm9, %v1033_v23, 0.0  ;;  %1772 = vrot.lane.b32.xlu0 %v3420_v60, %s2669_s25  ;;  %v3446_v35 = vld [vmem:[#allocation8 + $0x6] ss:$0 sm:$0xff] }
 0x1da   : > { %v1207_v38 = vpop.permute.xlu1 %1206  ;;  %v1048_v29 = vmul.f32 %v3363_v12, %v1039_v56  ;;  %v3454_v23 = vld [vmem:[#allocation2 + $0x50] sm:$0xff] }
 0x1db   : > { %v1215_v55 = vsel %vm1032_vm8, 0.0, %v1207_v38  ;;  %v1023_v34 = vpop.permute.xlu0 %1022  ;;  %4313 = vst [vmem:[#allocation17_spill] sm:$0xff] %v3454_v23  ;;  %v1191_v56 = vadd.f32 %v1187_v54, %v1158_v24  ;;  %v1062_v24 = vmul.f32 %v3374_v31, %v3173_v46  ;;  %v3467_v54 = vld [vmem:[#allocation8 + $0x8] ss:$0 sm:$0xff] }
 0x1dc   : > { %v1219_v37 = vsel %vm3365_vm9, %v1215_v55, 0.0  ;;  %1641 = vrot.lane.b32.xlu1 %v3186_v22, %s2668_s23  ;;  %v1052_v3 = vadd.f32 %v3379_v32, %v1048_v29  ;;  %v1034_v53 = vsel %vm1032_vm8, 0.0, %v1023_v34  ;;  %v1241_v29 = vmul.f32 %v3441_v14, %v3165_v40  ;;  %v3475_v40 = vld [vmem:[#allocation2 + $0x60] sm:$0xff] }
 0x1dd   : > { %v1228_v38 = vmul.f32 %v3446_v35, %v1219_v37  ;;  %v1040_v15 = vsel %vm3365_vm9, %v1034_v53, 0.0  ;;  %1548 = vrot.lane.b32.xlu0 %v3454_v23, %s2668_s23 }
 0x1de   : > { %v1253_v58 = vpop.permute.xlu1 %1252  ;;  %v1049_v55 = vmul.f32 %v3363_v12, %v1040_v15  ;;  %v1065_v60 = vadd.f32 %v1061_v45, %v1052_v3 }
 0x1df   : > { %v1232_v11 = vadd.f32 %v1228_v38, %v1191_v56  ;;  %v1261_v34 = vsel %vm1081_vm10, %v1253_v58, 0.0  ;;  %v1070_v52 = vpop.permute.xlu0 %1069 }
 0x1e0   : > { %v1265_v37 = vsel %vm3390_vm11, %v1261_v34, 0.0  ;;  %1687 = vrot.lane.b32.xlu1 %v3186_v22, %s2669_s25  ;;  %v1053_v45 = vadd.f32 %v3379_v32, %v1049_v55  ;;  %v1082_v3 = vsel %vm1081_vm10, %v1070_v52, 0.0  ;;  %v3489_v52 = vld [vmem:[#allocation2 + $0x6a] sm:$0xff] }
 0x1e1   : > { %v1245_v53 = vadd.f32 %v1241_v29, %v1232_v11  ;;  %v1274_v58 = vmul.f32 %v3467_v54, %v1265_v37  ;;  %v1088_v46 = vsel %vm3390_vm11, %v1082_v3, 0.0  ;;  %1552 = vrot.lane.b32.xlu0 %v3475_v40, %s2668_s23  ;;  %4315 = vst [vmem:[#allocation19_spill] sm:$0xff] %v3489_v52 }
 0x1e2   : > { %v3482_v56 = vpop.permute.xlu1 %1815  ;;  %v1097_v38 = vmul.f32 %v3388_v39, %v1088_v46  ;;  %v3485_v15 = vadd.f32 %v1062_v24, %v1053_v45  ;;  %v1151_v46 = vmul.f32 %v3412_v25, %v3004_v63 }
 0x1e3   : > { %4314 = vst [vmem:[#allocation18_spill] sm:$0xff] %v3482_v56  ;;  %v3487_v55 = vadd.f32 %v1274_v58, %v1245_v53  ;;  %v1074_v34 = vpop.permute.xlu0 %1073  ;;  %v3507_v53 = vld [vmem:[#allocation2 + $0x58] sm:$0xff] }
 0x1e4   : > { %1728 = vrot.lane.b32.xlu1 %v3489_v52, %s2668_s23  ;;  %v1101_v11 = vadd.f32 %v1097_v38, %v1065_v60  ;;  %4318 = vst [vmem:[#allocation22_spill] sm:$0xff] %v3507_v53 }
 0x1e5   : > { %1594 = vrot.lane.b32.xlu0 %v3454_v23, %s2669_s25 }
 0x1e6   : > { %v3495_v29 = vpop.permute.xlu1 %1861 }
 0x1e7   : > { %4316 = vst [vmem:[#allocation20_spill] sm:$0xff] %v3495_v29  ;;  %v1114_v37 = vpop.permute.xlu0 %1113 }
 0x1e8   : > { %1774 = vrot.lane.b32.xlu1 %v3489_v52, %s2669_s25  ;;  %v1125_v24 = vsel %vm1032_vm8, 0.0, %v1114_v37  ;;  %v1084_v52 = vsel %vm1081_vm10, %v1074_v34, 0.0 }
 0x1e9   : > { %v1129_v45 = vsel %vm3365_vm9, %v1125_v24, 0.0  ;;  %1598 = vrot.lane.b32.xlu0 %v3475_v40, %s2669_s25 }
 0x1ea   : > { %v3504_v3 = vpop.permute.xlu1 %1902  ;;  %v1138_v60 = vmul.f32 %v3414_v27, %v1129_v45 }
 0x1eb   : > { %4317 = vst [vmem:[#allocation21_spill] sm:$0xff] %v3504_v3  ;;  %v1160_v58 = vpop.permute.xlu0 %1159 }
 0x1ec   : > { %1550 = vrot.lane.b32.xlu1 %v3507_v53, %s2668_s23  ;;  %v1142_v38 = vadd.f32 %v1138_v60, %v1101_v11  ;;  %v1171_v37 = vsel %vm1081_vm10, %v1160_v58, 0.0  ;;  %v1127_v11 = vsel %vm1032_vm8, 0.0, %v3334_v36  ;;  %v1063_v36 = vmul.f32 %v3374_v31, %v3222_v59 }
 0x1ed   : > { %v1175_v24 = vsel %vm3390_vm11, %v1171_v37, 0.0  ;;  %1635 = vrot.lane.b32.xlu0 %v3208_v26, %s2668_s23  ;;  %v1173_v59 = vsel %vm1081_vm10, %v3350_v57, 0.0 }
 0x1ee   : > { %v1025_v3 = vpop.permute.xlu1 %1024  ;;  %v1155_v45 = vadd.f32 %v1151_v46, %v1142_v38  ;;  %v1184_v23 = vmul.f32 %v3428_v48, %v1175_v24 }
 0x1ef   : > { %v1035_v63 = vsel %vm1032_vm8, 0.0, %v1025_v3  ;;  %v1201_v29 = vpop.permute.xlu0 %1200  ;;  %v1090_v3 = vsel %vm3390_vm11, %v1084_v52, 0.0 }
 0x1f0   : > { %v1041_v60 = vsel %vm3365_vm9, %v1035_v63, 0.0  ;;  %1596 = vrot.lane.b32.xlu1 %v3507_v53, %s2669_s25  ;;  %v1188_v58 = vadd.f32 %v1184_v23, %v1155_v45  ;;  %v1212_v37 = vsel %vm1032_vm8, 0.0, %v1201_v29  ;;  %v1238_v23 = vmul.f32 %v3441_v14, %v3236_v16  ;;  %v3732_v53 = vld [vmem:[#allocation8 + $0x11] ss:$0 sm:$0xff] }
 0x1f1   : > { %v1050_v46 = vmul.f32 %v3363_v12, %v1041_v60  ;;  %v1216_v34 = vsel %vm3365_vm9, %v1212_v37, 0.0  ;;  %1681 = vrot.lane.b32.xlu0 %v3208_v26, %s2669_s25  ;;  %v1131_v12 = vsel %vm3365_vm9, %v1127_v11, 0.0  ;;  %v3551_v60 = vld [vmem:[#allocation2 + $0x52] sm:$0xff]  ;;  %v1099_v11 = vmul.f32 %v3388_v39, %v1090_v3 }
 0x1f2   : > { %v1072_v38 = vpop.permute.xlu1 %1071  ;;  %v1225_v24 = vmul.f32 %v3446_v35, %v1216_v34  ;;  %4319 = vst [vmem:[#allocation23_spill] sm:$0xff] %v3551_v60  ;;  %v1140_v57 = vmul.f32 %v3414_v27, %v1131_v12 }
 0x1f3   : > { %v1054_v29 = vadd.f32 %v3379_v32, %v1050_v46  ;;  %v1083_v45 = vsel %vm1081_vm10, %v1072_v38, 0.0  ;;  %v1247_v63 = vpop.permute.xlu0 %1246 }
 0x1f4   : > { %v1089_v31 = vsel %vm3390_vm11, %v1083_v45, 0.0  ;;  %1637 = vrot.lane.b32.xlu1 %v3212_v28, %s2668_s23  ;;  %v1229_v52 = vadd.f32 %v1225_v24, %v1188_v58  ;;  %v1258_v16 = vsel %vm1081_vm10, %v1247_v63, 0.0  ;;  %v1214_v24 = vsel %vm1032_vm8, 0.0, %v3372_v30 }
 0x1f5   : > { %v1067_v32 = vadd.f32 %v1063_v36, %v1054_v29  ;;  %v1098_v37 = vmul.f32 %v3388_v39, %v1089_v31  ;;  %v1262_v46 = vsel %vm3390_vm11, %v1258_v16, 0.0  ;;  %1722 = vrot.lane.b32.xlu0 %v3551_v60, %s2668_s23  ;;  %v1177_v29 = vsel %vm3390_vm11, %v1173_v59, 0.0 }
 0x1f6   : > { %v1116_v34 = vpop.permute.xlu1 %1115  ;;  %v1242_v38 = vadd.f32 %v1238_v23, %v1229_v52  ;;  %v1271_v58 = vmul.f32 %v3467_v54, %v1262_v46  ;;  %v1153_v30 = vmul.f32 %v3412_v25, %v2981_v51  ;;  %v1152_v59 = vmul.f32 %v3412_v25, %v3014_v4  ;;  %v3586_v51 = vld [vmem:[#allocation2 + $0x5a] sm:$0xff] }
 0x1f7   : > { %v1103_v45 = vadd.f32 %v1099_v11, %v1067_v32  ;;  %v1102_v36 = vadd.f32 %v1098_v37, %v3485_v15  ;;  %v1126_v39 = vsel %vm1032_vm8, 0.0, %v1116_v34  ;;  %v3565_v3 = vpop.permute.xlu0 %1809  ;;  %v1218_v31 = vsel %vm3365_vm9, %v1214_v24, 0.0  ;;  %4321 = vst [vmem:[#allocation25_spill] sm:$0xff] %v3586_v51 }
 0x1f8   : > { %4320 = vst [vmem:[#allocation24_spill] sm:$0xff] %v3565_v3  ;;  %v1130_v12 = vsel %vm3365_vm9, %v1126_v39, 0.0  ;;  %1683 = vrot.lane.b32.xlu1 %v3212_v28, %s2669_s25  ;;  %v3573_v23 = vadd.f32 %v1271_v58, %v1242_v38  ;;  %v1186_v16 = vmul.f32 %v3428_v48, %v1177_v29  ;;  %v1227_v4 = vmul.f32 %v3446_v35, %v1218_v31  ;;  %v3723_v3 = vld [vmem:[#allocation8 + $0x10] ss:$0 sm:$0xff] }
 0x1f9   : > { %v1144_v63 = vadd.f32 %v1140_v57, %v1103_v45  ;;  %v1139_v15 = vmul.f32 %v3414_v27, %v1130_v12  ;;  %1768 = vrot.lane.b32.xlu0 %v3551_v60, %s2669_s25  ;;  %v1240_v58 = vmul.f32 %v3441_v14, %v3063_v41  ;;  %v2306_v60 = vld [vmem:[#allocation8 + $0x1c] ss:$0 sm:$0xff] }
 0x1fa   : > { %v1162_v52 = vpop.permute.xlu1 %1161 }
 0x1fb   : > { %v1157_v11 = vadd.f32 %v1153_v30, %v1144_v63  ;;  %v1143_v32 = vadd.f32 %v1139_v15, %v1102_v36  ;;  %v1172_v37 = vsel %vm1081_vm10, %v1162_v52, 0.0  ;;  %v3588_v46 = vpop.permute.xlu0 %1813  ;;  %v1239_v63 = vmul.f32 %v3441_v14, %v3256_v50 }
 0x1fc   : > { %4322 = vst [vmem:[#allocation26_spill] sm:$0xff] %v3588_v46  ;;  %v1176_v27 = vsel %vm3390_vm11, %v1172_v37, 0.0  ;;  %1724 = vrot.lane.b32.xlu1 %v3586_v51, %s2668_s23 }
 0x1fd   : > { %v1156_v25 = vadd.f32 %v1152_v59, %v1143_v32  ;;  %v1185_v57 = vmul.f32 %v3428_v48, %v1176_v27  ;;  %1946 = vrot.lane.b32.xlu0 %v3042_v21, %s2669_s25  ;;  %v1190_v34 = vadd.f32 %v1186_v16, %v1157_v11  ;;  %v3607_v48 = vld [vmem:[#allocation2 + $0x7a] sm:$0xff]  ;;  %v3630_v32 = vld [vmem:[#allocation2 + $0x82] sm:$0xff] }
 0x1fe   : > { %v1203_v38 = vpop.permute.xlu1 %1202  ;;  %4327 = vst [vmem:[#allocation31_spill] sm:$0xff] %v3630_v32 }
 0x1ff   : > { %v1189_v24 = vadd.f32 %v1185_v57, %v1156_v25  ;;  %v1213_v45 = vsel %vm1032_vm8, 0.0, %v1203_v38  ;;  %v3601_v36 = vpop.permute.xlu0 %1855  ;;  %v1231_v39 = vadd.f32 %v1227_v4, %v1190_v34  ;;  %v3640_v4 = vld [vmem:[#allocation2 + $0x92] sm:$0xff] }
 0x200   : > { %4323 = vst [vmem:[#allocation27_spill] sm:$0xff] %v3601_v36  ;;  %v1217_v29 = vsel %vm3365_vm9, %v1213_v45, 0.0  ;;  %1770 = vrot.lane.b32.xlu1 %v3586_v51, %s2669_s25  ;;  %4330 = vst [vmem:[#allocation34_spill] sm:$0xff] %v3640_v4  ;;  %v3704_v36 = vld [vmem:[#allocation8 + $0xe] ss:$0 sm:$0xff] }
 0x201   : > { %v1226_v12 = vmul.f32 %v3446_v35, %v1217_v29  ;;  %1983 = vrot.lane.b32.xlu0 %v3607_v48, %s2668_s23  ;;  %v1244_v41 = vadd.f32 %v1240_v58, %v1231_v39  ;;  %v3621_v35 = vld [vmem:[#allocation2 + $0x8a] sm:$0xff] }
 0x202   : > { %v1249_v30 = vpop.permute.xlu1 %1248  ;;  %4325 = vst [vmem:[#allocation29_spill] sm:$0xff] %v3621_v35 }
 0x203   : > { %v1230_v15 = vadd.f32 %v1226_v12, %v1189_v24  ;;  %v1259_v59 = vsel %vm1081_vm10, %v1249_v30, 0.0  ;;  %v3615_v31 = vpop.permute.xlu0 %1859  ;;  %v3656_v24 = vld [vmem:[#allocation8 + $0x9] ss:$0 sm:$0xff]  ;;  %v3659_v12 = vld [vmem:[#allocation8 + $0xa] ss:$0 sm:$0xff] }
 0x204   : > { %4324 = vst [vmem:[#allocation28_spill] sm:$0xff] %v3615_v31  ;;  %v1263_v52 = vsel %vm3390_vm11, %v1259_v59, 0.0  ;;  %1948 = vrot.lane.b32.xlu1 %v3050_v33, %s2669_s25  ;;  %v1328_v59 = vmul.f32 %v3659_v12, %v3284_v2 }
 0x205   : > { %v1243_v16 = vadd.f32 %v1239_v63, %v1230_v15  ;;  %v1272_v11 = vmul.f32 %v3467_v54, %v1263_v52  ;;  %1987 = vrot.lane.b32.xlu0 %v3621_v35, %s2668_s23 }
 0x206   : > { %v3626_v50 = vpop.permute.xlu1 %1811 }
 0x207   : > { %4326 = vst [vmem:[#allocation30_spill] sm:$0xff] %v3626_v50  ;;  %v3628_v14 = vadd.f32 %v1272_v11, %v1243_v16  ;;  %v3632_v37 = vpop.permute.xlu0 %1896 }
 0x208   : > { %4328 = vst [vmem:[#allocation32_spill] sm:$0xff] %v3632_v37  ;;  %1985 = vrot.lane.b32.xlu1 %v3630_v32, %s2668_s23 }
 0x209   : > { %2029 = vrot.lane.b32.xlu0 %v3607_v48, %s2669_s25 }
 0x20a   : > { %v3638_v27 = vpop.permute.xlu1 %1857 }
 0x20b   : > { %4329 = vst [vmem:[#allocation33_spill] sm:$0xff] %v3638_v27  ;;  %v3642_v25 = vpop.permute.xlu0 %1942 }
 0x20c   : > { %4331 = vst [vmem:[#allocation35_spill] sm:$0xff] %v3642_v25  ;;  %1989 = vrot.lane.b32.xlu1 %v3640_v4, %s2668_s23  ;;  %s2573_s23 = scalar_lea.vmem %s4224_s10, 2048 }
 0x20d   : > { %2033 = vrot.lane.b32.xlu0 %v3621_v35, %s2669_s25  ;;  %p2574_p8 = scmp.ne.s32.totalorder %s4224_s10, %s2573_s23 }
 0x20e   : > { %v3648_v57 = vpop.permute.xlu1 %1898 }
 0x20f   : > { %4332 = vst [vmem:[#allocation36_spill] sm:$0xff] %v3648_v57  ;;  %v1379_v34 = vpop.permute.xlu0 %1378  ;;  %p2575_p1 = pnand %p2574_p8, %p4361_p12 }
 0x210   : > { %2031 = vrot.lane.b32.xlu1 %v3630_v32, %s2669_s25 }
 0x211   : > { %p2576_p10 = pneg %p2575_p1 }
 0x212   : > { %v3652_v38 = vpop.permute.xlu1 %1944 }
 0x213   : > { %4333 = vst [vmem:[#allocation37_spill] sm:$0xff] %v3652_v38  ;;  %v1425_v58 = vpop.permute.xlu0 %1424 }
 0x214   : > { %2035 = vrot.lane.b32.xlu1 %v3640_v4, %s2669_s25  ;;  %s2577_s25 = sshll.u32 %s2675_s18, 4  ;;  %s2578_s25 = int_to_ptr.vmem [resolvable:$false] %s2577_s25 }
 0x215   : > { %s2579_s27 = scalar_lea.vmem %s2578_s25, 4096  ;;  %p2580_p3 = scmp.lt.s32.totalorder %s4224_s10, %s2578_s25 }
 0x216   : > { %v1294_v45 = vpop.permute.xlu1 %1293  ;;  %p2581_p5 = scmp.lt.s32.totalorder %s2579_s27, %s2573_s23 }
 0x217   : > { %v1302_v39 = vsel %vm1032_vm8, 0.0, %v1294_v45  ;;  %v1466_v29 = vpop.permute.xlu0 %1465  ;;  %v1260_v45 = vsel %vm1081_vm10, %v3398_v49, 0.0  ;;  %v1388_v49 = vsel %vm1032_vm8, 0.0, %v1379_v34 }
 0x218   : > { %v1306_v30 = vsel %vm3365_vm9, %v1302_v39, 0.0  ;;  %v1264_v38 = vsel %vm3390_vm11, %v1260_v45, 0.0  ;;  %v1475_v31 = vsel %vm1032_vm8, 0.0, %v1466_v29  ;;  %p2582_p9 = por %p2581_p5, %p2580_p3 }
 0x219   : > { %v1315_v63 = vmul.f32 %v3656_v24, %v1306_v30  ;;  %v1273_v2 = vmul.f32 %v3467_v54, %v1264_v38  ;;  %v3689_v38 = vld [vmem:[#allocation8 + $0xb] ss:$0 sm:$0xff]  ;;  %v1479_v29 = vsel %vm3365_vm9, %v1475_v31, 0.0 }
 0x21a   : > { %v1340_v15 = vpop.permute.xlu1 %1339  ;;  %p2583_p11 = pnand %p2582_p9, %p2576_p10 }
 0x21b   : > { %v1319_v52 = vadd.f32 %v1315_v63, %v3487_v55  ;;  %v1512_v16 = vpop.permute.xlu0 %1511  ;;  %v1348_v45 = vsel %vm1081_vm10, %v1340_v15, 0.0  ;;  %v1434_v15 = vsel %vm1081_vm10, %v1425_v58, 0.0 }
 0x21c   : > { %v1438_v58 = vsel %vm3390_vm11, %v1434_v15, 0.0  ;;  %v2309_v15 = vld [vmem:[#allocation8 + $0x1f] ss:$0 sm:$0xff]  ;;  %v1521_v46 = vsel %vm1081_vm10, %v1512_v16, 0.0 }
 0x21d   : > { %v1332_v11 = vadd.f32 %v1328_v59, %v1319_v52  ;;  %v1277_v52 = vadd.f32 %v1273_v2, %v1244_v41  ;;  %v1352_v2 = vsel %vm3390_vm11, %v1348_v45, 0.0  ;;  %v3730_v51 = vmul.f32 %v2309_v15, %v3042_v21 }
 0x21e   : > { %v1381_v4 = vpop.permute.xlu1 %1380  ;;  %v1525_v16 = vsel %vm3390_vm11, %v1521_v46, 0.0 }
 0x21f   : > { %v1288_v32 = vpop.permute.xlu0 %1287  ;;  %v1389_v41 = vsel %vm1032_vm8, 0.0, %v1381_v4 }
 0x220   : > { %v1393_v4 = vsel %vm3365_vm9, %v1389_v41, 0.0 }
 0x222   : > { %v1427_v35 = vpop.permute.xlu1 %1426 }
 0x223   : > { %v1292_v39 = vpop.permute.xlu0 %1291 }
 0x224   : > { %v1301_v30 = vsel %vm1032_vm8, 0.0, %v1292_v39  ;;  %v1327_v39 = vmul.f32 %v3659_v12, %v3304_v7 }
 0x225   : > { %v1305_v57 = vsel %vm3365_vm9, %v1301_v30, 0.0  ;;  %v3684_v30 = vld [vmem:[#allocation8 + $0xc] ss:$0 sm:$0xff] }
 0x226   : > { %v1468_v55 = vpop.permute.xlu1 %1467  ;;  %v1314_v63 = vmul.f32 %v3656_v24, %v1305_v57  ;;  %v1392_v57 = vsel %vm3365_vm9, %v1388_v49, 0.0  ;;  %v1402_v41 = vmul.f32 %v3684_v30, %v1393_v4 }
 0x227   : > { %v3676_v59 = vpop.permute.xlu0 %1333  ;;  %v1401_v49 = vmul.f32 %v3684_v30, %v1392_v57  ;;  %v3713_v57 = vld [vmem:[#allocation8 + $0xf] ss:$0 sm:$0xff] }
 0x228   : > { %v1318_v27 = vadd.f32 %v1314_v63, %v1277_v52  ;;  %v1488_v31 = vmul.f32 %v3713_v57, %v1479_v29  ;;  %v3745_v29 = vmul.f32 %v2306_v60, %v3217_v8 }
 0x22a   : > { %v3679_v25 = vpop.permute.xlu1 %1513  ;;  %v1331_v63 = vadd.f32 %v1327_v39, %v1318_v27  ;;  %v1361_v27 = vmul.f32 %v3689_v38, %v1352_v2  ;;  %v1447_v2 = vmul.f32 %v3704_v36, %v1438_v58 }
 0x22b   : > { %v1338_v37 = vpop.permute.xlu0 %1337 }
 0x22c   : > { %v1347_v54 = vsel %vm1081_vm10, %v1338_v37, 0.0  ;;  %v3698_v37 = vld [vmem:[#allocation8 + $0xd] ss:$0 sm:$0xff] }
 0x22d   : > { %v1351_v34 = vsel %vm3390_vm11, %v1347_v54, 0.0  ;;  %v1414_v45 = vmul.f32 %v3698_v37, %v3108_v62  ;;  %v1415_v46 = vmul.f32 %v3698_v37, %v3116_v1 }
 0x22e   : > { %v1290_v7 = vpop.permute.xlu1 %1289  ;;  %v1360_v52 = vmul.f32 %v3689_v38, %v1351_v34 }
 0x22f   : > { %v1375_v50 = vpop.permute.xlu0 %1374 }
 0x230   : > { %v1364_v54 = vadd.f32 %v1360_v52, %v1331_v63  ;;  %v1299_v63 = vsel %vm1032_vm8, 0.0, %v1288_v32 }
 0x231   : > { %v1303_v4 = vsel %vm3365_vm9, %v1299_v63, 0.0  ;;  %v1534_v63 = vmul.f32 %v3732_v53, %v1525_v16 }
 0x232   : > { %v3711_v39 = vpop.permute.xlu1 %1335  ;;  %v1405_v34 = vadd.f32 %v1401_v49, %v1364_v54  ;;  %v1365_v49 = vadd.f32 %v1361_v27, %v1332_v11  ;;  %v1435_v54 = vsel %vm1081_vm10, %v1427_v35, 0.0  ;;  %v1476_v11 = vsel %vm1032_vm8, 0.0, %v1468_v55 }
 0x233   : > { %v3719_v52 = vpop.permute.xlu0 %1420  ;;  %v1501_v27 = vmul.f32 %v3723_v3, %v3288_v5  ;;  %v1312_v55 = vmul.f32 %v3656_v24, %v1303_v4  ;;  %v1480_v5 = vsel %vm3365_vm9, %v1476_v11, 0.0  ;;  %v3772_v4 = vmul.f32 %v2309_v15, %v3072_v43 }
 0x234   : > { %v1418_v62 = vadd.f32 %v1414_v45, %v1405_v34  ;;  %v1406_v58 = vadd.f32 %v1402_v41, %v1365_v49  ;;  %v1439_v45 = vsel %vm3390_vm11, %v1435_v54, 0.0  ;;  %v1300_v34 = vsel %vm1032_vm8, 0.0, %v1290_v7 }
 0x235   : > { %v3748_v41 = vmul.f32 %v2309_v15, %v3050_v33  ;;  %v1345_v7 = vsel %vm1081_vm10, %v3676_v59, 0.0  ;;  %v1448_v49 = vmul.f32 %v3704_v36, %v1439_v45  ;;  %v1304_v1 = vsel %vm3365_vm9, %v1300_v34, 0.0 }
 0x236   : > { %v1451_v32 = vadd.f32 %v1447_v2, %v1418_v62  ;;  %v1377_v56 = vpop.permute.xlu1 %1376  ;;  %v3761_v62 = vmul.f32 %v2306_v60, %v3246_v18  ;;  %v1419_v33 = vadd.f32 %v1415_v46, %v1406_v58  ;;  %v1386_v59 = vsel %vm1032_vm8, 0.0, %v1375_v50  ;;  %v2300_v58 = vld [vmem:[#allocation8 + $0x16] ss:$0 sm:$0xff]  ;;  %v3817_v46 = vld [vmem:[#allocation8 + $0x22] ss:$0 sm:$0xff] }
 0x237   : > { %v3737_v35 = vpop.permute.xlu0 %1461  ;;  %v3778_v18 = vmul.f32 %v2306_v60, %v3266_v0  ;;  %v1489_v16 = vmul.f32 %v3713_v57, %v1480_v5  ;;  %v1316_v11 = vadd.f32 %v1312_v55, %v3573_v23  ;;  %v3789_v43 = vmul.f32 %v3698_v37, %v3142_v19 }
 0x238   : > { %v1492_v21 = vadd.f32 %v1488_v31, %v1451_v32  ;;  %v3769_v31 = vmul.f32 %v2306_v60, %v3252_v61  ;;  %v3785_v61 = vmul.f32 %v2309_v15, %v3068_v42  ;;  %v1412_v50 = vmul.f32 %v3698_v37, %v3134_v13 }
 0x239   : > { %v1313_v0 = vmul.f32 %v3656_v24, %v1304_v1  ;;  %v1325_v23 = vmul.f32 %v3659_v12, %v3298_v6  ;;  %v1452_v45 = vadd.f32 %v1448_v49, %v1419_v33  ;;  %v1522_v34 = vsel %vm1081_vm10, %v3679_v25, 0.0  ;;  %v2297_v25 = vld [vmem:[#allocation8 + $0x13] ss:$0 sm:$0xff] }
 0x23a   : > { %v3758_v2 = vpop.permute.xlu1 %1422  ;;  %v1505_v8 = vadd.f32 %v1501_v27, %v1492_v21  ;;  %v1349_v27 = vsel %vm3390_vm11, %v1345_v7, 0.0  ;;  %v1390_v42 = vsel %vm3365_vm9, %v1386_v59, 0.0  ;;  %v1502_v19 = vmul.f32 %v3723_v3, %v3308_v9  ;;  %v4335_v49 = vld [vmem:[#allocation14_spill] sm:$0xff] }
 0x23b   : > { %v3766_v54 = vpop.permute.xlu0 %1507  ;;  %v3807_v13 = vmul.f32 %v2300_v58, %v3176_v47  ;;  %v1358_v24 = vmul.f32 %v3689_v38, %v1349_v27  ;;  %v1346_v6 = vsel %vm1081_vm10, %v3711_v39, 0.0  ;;  %v1326_v37 = vmul.f32 %v3659_v12, %v3318_v10 }
 0x23c   : > { %v3775_v32 = vadd.f32 %v1534_v63, %v1505_v8  ;;  %v3815_v21 = vmul.f32 %v2300_v58, %v3186_v22  ;;  %v1493_v55 = vadd.f32 %v1489_v16, %v1452_v45  ;;  %v1329_v63 = vadd.f32 %v1325_v23, %v1316_v11  ;;  %v4334_v22 = vld [vmem:[#allocation13_spill] sm:$0xff]  ;;  %v2303_v8 = vld [vmem:[#allocation8 + $0x19] ss:$0 sm:$0xff] }
 0x23d   : > { %v1526_v47 = vsel %vm3390_vm11, %v1522_v34, 0.0  ;;  %v1317_v9 = vadd.f32 %v1313_v0, %v3628_v14  ;;  %v1387_v5 = vsel %vm1032_vm8, 0.0, %v1377_v56  ;;  %v1399_v39 = vmul.f32 %v3684_v30, %v1390_v42  ;;  %v4336_v0 = vld [vmem:[#allocation16_spill] sm:$0xff]  ;;  %v3858_v34 = vld [vmem:[#allocation8 + $0x12] ss:$0 sm:$0xff] }
 0x23e   : > { %v3794_v60 = vpop.permute.xlu1 %1463  ;;  %v3828_v10 = vmul.f32 %v3723_v3, %v3370_v20  ;;  %v3832_v12 = vmul.f32 %v3723_v3, %v4334_v22  ;;  %v3835_v33 = vmul.f32 %v2300_v58, %v3212_v28  ;;  %v1350_v14 = vsel %vm3390_vm11, %v1346_v6, 0.0  ;;  %v4338_v6 = vld [vmem:[#allocation25_spill] sm:$0xff] }
 0x23f   : > { %v3802_v15 = vpop.permute.xlu0 %1639  ;;  %v1589_v1 = vmul.f32 %v2297_v25, %v4335_v49  ;;  %v3843_v59 = vmul.f32 %v2300_v58, %v3208_v26  ;;  %v3847_v20 = vmul.f32 %v3817_v46, %v3607_v48  ;;  %v1362_v3 = vadd.f32 %v1358_v24, %v1329_v63  ;;  %v819_v44 = vpop.f32.mrb[2].mxu1 }
 0x240   : > { %v1506_v16 = vadd.f32 %v1502_v19, %v1493_v55  ;;  %v1535_v11 = vmul.f32 %v3732_v53, %v1526_v47  ;;  %v1391_v28 = vsel %vm3365_vm9, %v1387_v5, 0.0  ;;  %v1432_v27 = vsel %vm1081_vm10, %v3719_v52, 0.0  ;;  %v4337_v19 = vld [vmem:[#allocation22_spill] sm:$0xff] }
 0x241   : > { %v3855_v23 = vmul.f32 %v2303_v8, %v4336_v0  ;;  %v1330_v45 = vadd.f32 %v1326_v37, %v1317_v9  ;;  %v1359_v26 = vmul.f32 %v3689_v38, %v1350_v14  ;;  %v1403_v58 = vadd.f32 %v1399_v39, %v1362_v3  ;;  %v4339_v9 = vld [vmem:[#allocation18_spill] sm:$0xff]  ;;  %v4340_v39 = vld [vmem:[#allocation23_spill] sm:$0xff]  ;;  %v4341_v3 = vld [vmem:[#allocation20_spill] sm:$0xff] }
 0x242   : > { %v3824_v7 = vpop.permute.xlu1 %1509  ;;  %v3861_v42 = vmul.f32 %v2297_v25, %v3475_v40  ;;  %v3864_v24 = vmul.f32 %v2297_v25, %v4337_v19  ;;  %v3867_v55 = vmul.f32 %v2303_v8, %v4338_v6  ;;  %v1400_v37 = vmul.f32 %v3684_v30, %v1391_v28  ;;  %v3889_v0 = vld [vmem:[#allocation8 + $0x14] ss:$0 sm:$0xff] }
 0x243   : > { %v3839_v56 = vpop.permute.xlu0 %1685  ;;  %v1436_v38 = vsel %vm3390_vm11, %v1432_v27, 0.0  ;;  %v1473_v47 = vsel %vm1032_vm8, 0.0, %v3737_v35  ;;  %v1824_v5 = vsel %vm1032_vm8, 0.0, %v4339_v9  ;;  %v3882_v22 = vmul.f32 %v2303_v8, %v4340_v39 }
 0x244   : > { %v1539_v14 = vadd.f32 %v1535_v11, %v1506_v16  ;;  %v1870_v30 = vsel %vm1081_vm10, %v4341_v3, 0.0  ;;  %v1363_v28 = vadd.f32 %v1359_v26, %v1330_v45  ;;  %v1433_v27 = vsel %vm1081_vm10, %v3758_v2, 0.0  ;;  %v4343_v45 = vld [vmem:[#allocation17_spill] sm:$0xff] }
 0x245   : > { %v1416_v35 = vadd.f32 %v1412_v50, %v1403_v58  ;;  %v1445_v19 = vmul.f32 %v3704_v36, %v1436_v38  ;;  %v1477_v6 = vsel %vm3365_vm9, %v1473_v47, 0.0  ;;  %v3901_v26 = vmul.f32 %v2297_v25, %v4343_v45 }
 0x246   : > { %v1555_v48 = vpop.permute.xlu1 %1554  ;;  %v1404_v2 = vadd.f32 %v1400_v37, %v1363_v28  ;;  %v1437_v58 = vsel %vm3390_vm11, %v1433_v27, 0.0  ;;  %v1474_v38 = vsel %vm1032_vm8, 0.0, %v3794_v60  ;;  %v1828_v25 = vsel %vm3365_vm9, %v1824_v5, 0.0  ;;  %v3921_v27 = vld [vmem:[#allocation8 + $0x1d] ss:$0 sm:$0xff]  ;;  %v4345_v60 = vld [vmem:[#allocation21_spill] sm:$0xff] }
 0x247   : > { %v1563_v52 = vsel %vm1032_vm8, 0.0, %v1555_v48  ;;  %v3870_v63 = vpop.permute.xlu0 %1726  ;;  %v1874_v37 = vsel %vm3390_vm11, %v1870_v30, 0.0  ;;  %v1486_v3 = vmul.f32 %v3713_v57, %v1477_v6  ;;  %v1446_v45 = vmul.f32 %v3704_v36, %v1437_v58  ;;  %v3932_v6 = vld [vmem:[#allocation8 + $0x15] ss:$0 sm:$0xff] }
 0x248   : > { %v1567_v40 = vsel %vm3365_vm9, %v1563_v52, 0.0  ;;  %v1417_v5 = vadd.f32 %v3789_v43, %v1404_v2  ;;  %v1478_v30 = vsel %vm3365_vm9, %v1474_v38, 0.0  ;;  %v3944_v36 = vmul.f32 %v3921_v27, %v1874_v37 }
 0x249   : > { %v1576_v49 = vmul.f32 %v3858_v34, %v1567_v40  ;;  %v4342_v40 = vld [vmem:[#allocation19_spill] sm:$0xff] }
 0x24a   : > { %v1601_v48 = vpop.permute.xlu1 %1600  ;;  %v3898_v9 = vmul.f32 %v2303_v8, %v4342_v40 }
 0x24b   : > { %v1580_v52 = vadd.f32 %v1576_v49, %v1539_v14  ;;  %v1609_v16 = vsel %vm1081_vm10, %v1601_v48, 0.0  ;;  %v3895_v11 = vpop.permute.xlu0 %1772  ;;  %v4344_v14 = vld [vmem:[#allocation15_spill] sm:$0xff]  ;;  %v1449_v48 = vadd.f32 %v1445_v19, %v1416_v35  ;;  %v3957_v35 = vld [vmem:[#allocation8 + $0x17] ss:$0 sm:$0xff] }
 0x24c   : > { %v1613_v50 = vsel %vm3390_vm11, %v1609_v16, 0.0  ;;  %v3912_v8 = vsel %vm1032_vm8, 0.0, %v4344_v14  ;;  %v3914_v49 = vld [vmem:[#allocation8 + $0x1b] ss:$0 sm:$0xff] }
 0x24d   : > { %v1593_v47 = vadd.f32 %v1589_v1, %v1580_v52  ;;  %v1622_v39 = vmul.f32 %v3889_v0, %v1613_v50  ;;  %v1911_v1 = vsel %vm1032_vm8, 0.0, %v4345_v60  ;;  %v1519_v52 = vsel %vm1081_vm10, %v3766_v54, 0.0 }
 0x24e   : > { %v1642_v28 = vpop.permute.xlu1 %1641  ;;  %v3940_v54 = vmul.f32 %v3914_v49, %v1828_v25  ;;  %v1915_v2 = vsel %vm3365_vm9, %v1911_v1, 0.0  ;;  %v1490_v58 = vadd.f32 %v1486_v3, %v1449_v48  ;;  %v1523_v60 = vsel %vm3390_vm11, %v1519_v52, 0.0 }
 0x24f   : > { %v1650_v16 = vsel %vm1032_vm8, 0.0, %v1642_v28  ;;  %v1549_v40 = vpop.permute.xlu0 %1548  ;;  %v1626_v19 = vadd.f32 %v1622_v39, %v1593_v47  ;;  %v1487_v28 = vmul.f32 %v3713_v57, %v1478_v30  ;;  %v3962_v57 = vld [vmem:[#allocation8 + $0x1e] ss:$0 sm:$0xff] }
 0x250   : > { %v1654_v50 = vsel %vm3365_vm9, %v1650_v16, 0.0  ;;  %v1560_v14 = vsel %vm1032_vm8, 0.0, %v1549_v40  ;;  %v4346_v16 = vld [vmem:[#allocation24_spill] sm:$0xff] }
 0x251   : > { %v1663_v43 = vmul.f32 %v3932_v6, %v1654_v50  ;;  %v3955_v37 = vsel %vm1032_vm8, 0.0, %v4346_v16  ;;  %v1450_v50 = vadd.f32 %v1446_v45, %v1417_v5  ;;  %v1564_v40 = vsel %vm3365_vm9, %v1560_v14, 0.0 }
 0x252   : > { %v1688_v38 = vpop.permute.xlu1 %1687  ;;  %v3971_v5 = vmul.f32 %v3962_v57, %v1915_v2  ;;  %v1503_v45 = vadd.f32 %v3832_v12, %v1490_v58  ;;  %v1649_v14 = vsel %vm1032_vm8, 0.0, %v3802_v15  ;;  %v3984_v12 = vld [vmem:[#allocation8 + $0x18] ss:$0 sm:$0xff]  ;;  %v1695_v15 = vsel %vm1081_vm10, %v3839_v56, 0.0 }
 0x253   : > { %v1667_v25 = vadd.f32 %v1663_v43, %v1626_v19  ;;  %v1696_v47 = vsel %vm1081_vm10, %v1688_v38, 0.0  ;;  %v1553_v39 = vpop.permute.xlu0 %1552  ;;  %v1532_v19 = vmul.f32 %v3732_v53, %v1523_v60 }
 0x254   : > { %v1700_v3 = vsel %vm3390_vm11, %v1696_v47, 0.0  ;;  %v1562_v1 = vsel %vm1032_vm8, 0.0, %v1553_v39  ;;  %v1491_v47 = vadd.f32 %v1487_v28, %v1450_v50  ;;  %v1573_v28 = vmul.f32 %v3858_v34, %v1564_v40 }
 0x255   : > { %v1680_v48 = vadd.f32 %v3815_v21, %v1667_v25  ;;  %v1709_v52 = vmul.f32 %v3957_v35, %v1700_v3  ;;  %v1566_v30 = vsel %vm3365_vm9, %v1562_v1, 0.0  ;;  %v1520_v21 = vsel %vm1081_vm10, %v3824_v7, 0.0  ;;  %v4347_v7 = vld [vmem:[#allocation26_spill] sm:$0xff] }
 0x256   : > { %v1729_v43 = vpop.permute.xlu1 %1728  ;;  %v1575_v38 = vmul.f32 %v3858_v34, %v1566_v30  ;;  %v3992_v16 = vsel %vm1032_vm8, 0.0, %v4347_v7  ;;  %v1524_v1 = vsel %vm3390_vm11, %v1520_v21, 0.0  ;;  %v1536_v30 = vadd.f32 %v1532_v19, %v1503_v45  ;;  %v4008_v21 = vld [vmem:[#allocation8 + $0x1a] ss:$0 sm:$0xff] }
 0x257   : > { %v1737_v25 = vsel %vm1032_vm8, 0.0, %v1729_v43  ;;  %v1595_v39 = vpop.permute.xlu0 %1594  ;;  %v1713_v50 = vadd.f32 %v1709_v52, %v1680_v48  ;;  %v1653_v43 = vsel %vm3365_vm9, %v1649_v14, 0.0  ;;  %v1699_v52 = vsel %vm3390_vm11, %v1695_v15, 0.0 }
 0x258   : > { %v1741_v58 = vsel %vm3365_vm9, %v1737_v25, 0.0  ;;  %v1606_v60 = vsel %vm1081_vm10, %v1595_v39, 0.0  ;;  %v1579_v25 = vadd.f32 %v1575_v38, %v3775_v32  ;;  %v1504_v39 = vadd.f32 %v3828_v10, %v1491_v47 }
 0x259   : > { %v1750_v3 = vmul.f32 %v3984_v12, %v1741_v58  ;;  %v1610_v56 = vsel %vm3390_vm11, %v1606_v60, 0.0  ;;  %v1577_v45 = vadd.f32 %v1573_v28, %v1536_v30  ;;  %v1533_v10 = vmul.f32 %v3732_v53, %v1524_v1 }
 0x25a   : > { %v1775_v40 = vpop.permute.xlu1 %1774  ;;  %v1662_v58 = vmul.f32 %v3932_v6, %v1653_v43  ;;  %v1619_v15 = vmul.f32 %v3889_v0, %v1610_v56  ;;  %v1592_v28 = vadd.f32 %v3861_v42, %v1579_v25  ;;  %v1736_v53 = vsel %vm1032_vm8, 0.0, %v3870_v63 }
 0x25b   : > { %v1754_v7 = vadd.f32 %v1750_v3, %v1713_v50  ;;  %v1783_v2 = vsel %vm1081_vm10, %v1775_v40, 0.0  ;;  %v1599_v48 = vpop.permute.xlu0 %1598  ;;  %v1708_v50 = vmul.f32 %v3957_v35, %v1699_v52  ;;  %v1590_v43 = vadd.f32 %v3901_v26, %v1577_v45 }
 0x25c   : > { %v1787_v19 = vsel %vm3390_vm11, %v1783_v2, 0.0  ;;  %v1608_v32 = vsel %vm1081_vm10, %v1599_v48, 0.0  ;;  %v1537_v42 = vadd.f32 %v1533_v10, %v1504_v39  ;;  %v1740_v48 = vsel %vm3365_vm9, %v1736_v53, 0.0 }
 0x25d   : > { %v1767_v38 = vadd.f32 %v3898_v9, %v1754_v7  ;;  %v1796_v47 = vmul.f32 %v4008_v21, %v1787_v19  ;;  %v1612_v14 = vsel %vm3390_vm11, %v1608_v32, 0.0  ;;  %v1623_v52 = vadd.f32 %v1619_v15, %v1590_v43 }
 0x25e   : > { %v1551_v60 = vpop.permute.xlu1 %1550  ;;  %v1621_v2 = vmul.f32 %v3889_v0, %v1612_v14  ;;  %v1782_v26 = vsel %vm1081_vm10, %v3895_v11, 0.0 }
 0x25f   : > { %v1800_v9 = vadd.f32 %v1796_v47, %v1767_v38  ;;  %v1561_v3 = vsel %vm1032_vm8, 0.0, %v1551_v60  ;;  %v1636_v1 = vpop.permute.xlu0 %1635 }
 0x260   : > { %v1565_v30 = vsel %vm3365_vm9, %v1561_v3, 0.0  ;;  %v1625_v40 = vadd.f32 %v1621_v2, %v1592_v28  ;;  %v1647_v7 = vsel %vm1032_vm8, 0.0, %v1636_v1  ;;  %v1749_v28 = vmul.f32 %v3984_v12, %v1740_v48 }
 0x261   : > { %v1841_v25 = vadd.f32 %v3940_v54, %v1800_v9  ;;  %v1574_v56 = vmul.f32 %v3858_v34, %v1565_v30  ;;  %v1651_v63 = vsel %vm3365_vm9, %v1647_v7, 0.0  ;;  %v1827_v3 = vsel %vm3365_vm9, %v3992_v16, 0.0  ;;  %v4348_v30 = vld [vmem:[#allocation27_spill] sm:$0xff]  ;;  %v4349_v7 = vld [vmem:[#allocation28_spill] sm:$0xff] }
 0x262   : > { %v1597_v19 = vpop.permute.xlu1 %1596  ;;  %v1666_v32 = vadd.f32 %v1662_v58, %v1625_v40  ;;  %v1660_v38 = vmul.f32 %v3932_v6, %v1651_v63  ;;  %v1869_v16 = vsel %vm1081_vm10, %v4349_v7, 0.0 }
 0x263   : > { %v1854_v39 = vadd.f32 %v3745_v29, %v1841_v25  ;;  %v1578_v45 = vadd.f32 %v1574_v56, %v1537_v42  ;;  %v1607_v54 = vsel %vm1081_vm10, %v1597_v19, 0.0  ;;  %v1682_v34 = vpop.permute.xlu0 %1681 }
 0x264   : > { %v1611_v10 = vsel %vm3390_vm11, %v1607_v54, 0.0  ;;  %v1679_v47 = vadd.f32 %v3807_v13, %v1666_v32  ;;  %v1664_v14 = vadd.f32 %v1660_v38, %v1623_v52  ;;  %v1693_v60 = vsel %vm1081_vm10, %v1682_v34, 0.0 }
 0x265   : > { %v1591_v58 = vadd.f32 %v3864_v24, %v1578_v45  ;;  %v1620_v15 = vmul.f32 %v3889_v0, %v1611_v10  ;;  %v1697_v11 = vsel %vm3390_vm11, %v1693_v60, 0.0  ;;  %v1887_v29 = vadd.f32 %v3944_v36, %v1854_v39 }
 0x266   : > { %v1712_v2 = vadd.f32 %v1708_v50, %v1679_v47  ;;  %v1638_v53 = vpop.permute.xlu1 %1637  ;;  %v1677_v9 = vadd.f32 %v3843_v59, %v1664_v14  ;;  %v1706_v13 = vmul.f32 %v3957_v35, %v1697_v11  ;;  %v1786_v24 = vsel %vm3390_vm11, %v1782_v26, 0.0 }
 0x267   : > { %v1648_v0 = vsel %vm1032_vm8, 0.0, %v1638_v53  ;;  %v1723_v1 = vpop.permute.xlu0 %1722  ;;  %v4060_v36 = vadd.f32 %v3971_v5, %v1887_v29  ;;  %v1867_v50 = vsel %vm1081_vm10, %v4348_v30, 0.0  ;;  %v1624_v42 = vadd.f32 %v1620_v15, %v1591_v58  ;;  %v4350_v58 = vld [vmem:[#allocation30_spill] sm:$0xff] }
 0x268   : > { %v1753_v43 = vadd.f32 %v1749_v28, %v1712_v2  ;;  %v1652_v59 = vsel %vm3365_vm9, %v1648_v0, 0.0  ;;  %v1734_v40 = vsel %vm1032_vm8, 0.0, %v1723_v1  ;;  %v1795_v5 = vmul.f32 %v4008_v21, %v1786_v24 }
 0x269   : > { %v1661_v25 = vmul.f32 %v3932_v6, %v1652_v59  ;;  %v1738_v56 = vsel %vm3365_vm9, %v1734_v40, 0.0  ;;  %v1710_v52 = vadd.f32 %v1706_v13, %v1677_v9  ;;  %v1836_v32 = vmul.f32 %v3914_v49, %v1827_v3  ;;  %v4353_v13 = vld [vmem:[#allocation32_spill] sm:$0xff]  ;;  %v4354_v40 = vld [vmem:[#allocation33_spill] sm:$0xff] }
 0x26a   : > { %v1766_v63 = vadd.f32 %v3855_v23, %v1753_v43  ;;  %v1684_v48 = vpop.permute.xlu1 %1683  ;;  %v1747_v19 = vmul.f32 %v3984_v12, %v1738_v56  ;;  %v1871_v38 = vsel %vm3390_vm11, %v1867_v50, 0.0  ;;  %v1873_v10 = vsel %vm3390_vm11, %v1869_v16, 0.0 }
 0x26b   : > { %v1665_v26 = vadd.f32 %v1661_v25, %v1624_v42  ;;  %v1694_v39 = vsel %vm1081_vm10, %v1684_v48, 0.0  ;;  %v1769_v6 = vpop.permute.xlu0 %1768  ;;  %v1822_v15 = vsel %vm1032_vm8, 0.0, %v4350_v58  ;;  %v4351_v53 = vsel %vm3365_vm9, %v3912_v8, 0.0  ;;  %v4357_v58 = vld [vmem:[#allocation37_spill] sm:$0xff] }
 0x26c   : > { %v1698_v45 = vsel %vm3390_vm11, %v1694_v39, 0.0  ;;  %v1751_v54 = vadd.f32 %v1747_v19, %v1710_v52  ;;  %v1780_v34 = vsel %vm1081_vm10, %v1769_v6, 0.0  ;;  %v1799_v23 = vadd.f32 %v1795_v5, %v1766_v63  ;;  %v4355_v5 = vld [vmem:[#allocation35_spill] sm:$0xff] }
 0x26d   : > { %v1678_v47 = vadd.f32 %v3835_v33, %v1665_v26  ;;  %v1707_v14 = vmul.f32 %v3957_v35, %v1698_v45  ;;  %v1784_v60 = vsel %vm3390_vm11, %v1780_v34, 0.0  ;;  %v1923_v33 = vmul.f32 %v3962_v57, %v4351_v53 }
 0x26e   : > { %v1725_v11 = vpop.permute.xlu1 %1724  ;;  %v1764_v29 = vadd.f32 %v3882_v22, %v1751_v54  ;;  %v1793_v28 = vmul.f32 %v4008_v21, %v1784_v60  ;;  %v1840_v2 = vadd.f32 %v1836_v32, %v1799_v23  ;;  %v4352_v35 = vsel %vm3365_vm9, %v3955_v37, 0.0  ;;  %v4356_v23 = vld [vmem:[#allocation36_spill] sm:$0xff] }
 0x26f   : > { %v1834_v9 = vmul.f32 %v3914_v49, %v4352_v35  ;;  %v1908_v3 = vsel %vm1032_vm8, 0.0, %v4353_v13  ;;  %v1735_v22 = vsel %vm1032_vm8, 0.0, %v1725_v11  ;;  %v1947_v24 = vpop.permute.xlu0 %1946  ;;  %v1882_v0 = vmul.f32 %v3921_v27, %v1873_v10 }
 0x270   : > { %v1739_v1 = vsel %vm3365_vm9, %v1735_v22, 0.0  ;;  %v1797_v8 = vadd.f32 %v1793_v28, %v1764_v29  ;;  %v1853_v30 = vadd.f32 %v3769_v31, %v1840_v2  ;;  %v1826_v50 = vsel %vm3365_vm9, %v1822_v15, 0.0  ;;  %v2311_v2 = vld [vmem:[#allocation8 + $0x21] ss:$0 sm:$0xff] }
 0x271   : > { %v1880_v37 = vmul.f32 %v3921_v27, %v1871_v38  ;;  %v1711_v43 = vadd.f32 %v1707_v14, %v1678_v47  ;;  %v1748_v59 = vmul.f32 %v3984_v12, %v1739_v1  ;;  %v1868_v7 = vsel %vm1081_vm10, %v4354_v40, 0.0  ;;  %v2310_v47 = vld [vmem:[#allocation8 + $0x20] ss:$0 sm:$0xff] }
 0x272   : > { %v1912_v16 = vsel %vm3365_vm9, %v1908_v3, 0.0  ;;  %v1771_v42 = vpop.permute.xlu1 %1770  ;;  %v1838_v25 = vadd.f32 %v1834_v9, %v1797_v8  ;;  %v1886_v56 = vadd.f32 %v1882_v0, %v1853_v30  ;;  %v1954_v31 = vsel %vm1081_vm10, %v4355_v5, 0.0 }
 0x273   : > { %v1752_v63 = vadd.f32 %v1748_v59, %v1711_v43  ;;  %v1781_v48 = vsel %vm1081_vm10, %v1771_v42, 0.0  ;;  %v1956_v52 = vsel %vm1081_vm10, %v1947_v24, 0.0  ;;  %v1984_v19 = vpop.permute.xlu0 %1983  ;;  %v1835_v39 = vmul.f32 %v3914_v49, %v1826_v50 }
 0x274   : > { %v1785_v12 = vsel %vm3390_vm11, %v1781_v48, 0.0  ;;  %v1851_v32 = vadd.f32 %v3761_v62, %v1838_v25  ;;  %v1927_v38 = vadd.f32 %v1923_v33, %v1886_v56  ;;  %v1995_v26 = vsel %vm1032_vm8, 0.0, %v1984_v19  ;;  %v2313_v56 = vld [vmem:[#allocation8 + $0x23] ss:$0 sm:$0xff] }
 0x275   : > { %v1921_v6 = vmul.f32 %v3962_v57, %v1912_v16  ;;  %v1765_v45 = vadd.f32 %v3867_v55, %v1752_v63  ;;  %v1794_v54 = vmul.f32 %v4008_v21, %v1785_v12  ;;  %v1872_v34 = vsel %vm3390_vm11, %v1868_v7, 0.0  ;;  %v4358_v16 = vld [vmem:[#allocation29_spill] sm:$0xff] }
 0x276   : > { %v1909_v10 = vsel %vm1032_vm8, 0.0, %v4356_v23  ;;  %v1958_v62 = vsel %vm3390_vm11, %v1954_v31, 0.0  ;;  %v1884_v14 = vadd.f32 %v1880_v37, %v1851_v32  ;;  %v1949_v60 = vpop.permute.xlu1 %1948  ;;  %v1955_v49 = vsel %vm1081_vm10, %v4357_v58, 0.0 }
 0x277   : > { %v1798_v15 = vadd.f32 %v1794_v54, %v1765_v45  ;;  %v1960_v55 = vsel %vm3390_vm11, %v1956_v52, 0.0  ;;  %v1999_v21 = vsel %vm3365_vm9, %v1995_v26, 0.0  ;;  %v1988_v11 = vpop.permute.xlu0 %1987  ;;  %v1957_v29 = vsel %vm1081_vm10, %v1949_v60, 0.0 }
 0x278   : > { %v1940_v28 = vadd.f32 %v3730_v51, %v1927_v38  ;;  %v1925_v53 = vadd.f32 %v1921_v6, %v1884_v14  ;;  %v1997_v33 = vsel %vm1032_vm8, 0.0, %v1988_v11  ;;  %v1881_v35 = vmul.f32 %v3921_v27, %v1872_v34  ;;  %v4360_v11 = vld [vmem:[#allocation34_spill] sm:$0xff] }
 0x279   : > { %v1967_v9 = vmul.f32 %v2310_v47, %v1958_v62  ;;  %v1839_v13 = vadd.f32 %v1835_v39, %v1798_v15  ;;  %v2001_v3 = vsel %vm3365_vm9, %v1997_v33, 0.0  ;;  %v1913_v22 = vsel %vm3365_vm9, %v1909_v10, 0.0 }
 0x27a   : > { %v1969_v24 = vmul.f32 %v2310_v47, %v1960_v55  ;;  %v1986_v0 = vpop.permute.xlu1 %1985  ;;  %v1938_v1 = vadd.f32 %v3785_v61, %v1925_v53  ;;  %v2010_v8 = vmul.f32 %v2311_v2, %v2001_v3  ;;  %v1959_v51 = vsel %vm3390_vm11, %v1955_v49, 0.0 }
 0x27b   : > { %v1852_v30 = vadd.f32 %v3778_v18, %v1839_v13  ;;  %v1961_v27 = vsel %vm3390_vm11, %v1957_v29, 0.0  ;;  %v2008_v50 = vmul.f32 %v2311_v2, %v1999_v21  ;;  %v2030_v37 = vpop.permute.xlu0 %2029  ;;  %v1996_v59 = vsel %vm1032_vm8, 0.0, %v1986_v0 }
 0x27c   : > { %v1973_v43 = vadd.f32 %v1969_v24, %v1940_v28  ;;  %v1971_v40 = vadd.f32 %v1967_v9, %v1938_v1  ;;  %v2041_v7 = vsel %vm1081_vm10, %v2030_v37, 0.0  ;;  %v2023_v61 = vmul.f32 %v3817_v46, %v4358_v16 }
 0x27d   : > { %v1922_v42 = vmul.f32 %v3962_v57, %v1913_v22  ;;  %v1885_v25 = vadd.f32 %v1881_v35, %v1852_v30  ;;  %v2045_v18 = vsel %vm3390_vm11, %v2041_v7, 0.0  ;;  %v1968_v5 = vmul.f32 %v2310_v47, %v1959_v51 }
 0x27e   : > { %v2012_v31 = vadd.f32 %v2008_v50, %v1971_v40  ;;  %v1990_v63 = vpop.permute.xlu1 %1989  ;;  %v2014_v48 = vadd.f32 %v2010_v8, %v1973_v43  ;;  %v1970_v52 = vmul.f32 %v2310_v47, %v1961_v27  ;;  %v2000_v12 = vsel %vm3365_vm9, %v1996_v59, 0.0 }
 0x27f   : > { %v1926_v19 = vadd.f32 %v1922_v42, %v1885_v25  ;;  %v1998_v32 = vsel %vm1032_vm8, 0.0, %v1990_v63  ;;  %v2034_v38 = vpop.permute.xlu0 %2033  ;;  %v2054_v39 = vmul.f32 %v2313_v56, %v2045_v18  ;;  %v1941_v45 = vadd.f32 %v3748_v41, %v4060_v36 }
 0x280   : > { %v2002_v57 = vsel %vm3365_vm9, %v1998_v32, 0.0  ;;  %v2025_v26 = vadd.f32 %v3847_v20, %v2012_v31  ;;  %v2043_v6 = vsel %vm1081_vm10, %v2034_v38, 0.0  ;;  %v2027_v62 = vadd.f32 %v2023_v61, %v2014_v48 }
 0x281   : > { %v1939_v54 = vadd.f32 %v3772_v4, %v1926_v19  ;;  %v2011_v34 = vmul.f32 %v2311_v2, %v2002_v57  ;;  %v2047_v23 = vsel %vm3390_vm11, %v2043_v6, 0.0  ;;  %v1974_v17 = vadd.f32 %v1970_v52, %v1941_v45  ;;  %v4359_v4 = vld [vmem:[#allocation31_spill] sm:$0xff] }
 0x282   : > { %v2032_v10 = vpop.permute.xlu1 %2031  ;;  %v2058_v47 = vadd.f32 %v2054_v39, %v2025_v26  ;;  %v2056_v14 = vmul.f32 %v2313_v56, %v2047_v23  ;;  %v2009_v58 = vmul.f32 %v2311_v2, %v2000_v12  ;;  %v2022_v36 = vmul.f32 %v3817_v46, %v4359_v4 }
 0x283   : > { %v1972_v60 = vadd.f32 %v1968_v5, %v1939_v54  ;;  %v2042_v20 = vsel %vm1081_vm10, %v2032_v10, 0.0  ;;  %v2015_v55 = vadd.f32 %v2011_v34, %v1974_v17  ;;  %v2024_v29 = vmul.f32 %v3817_v46, %v4360_v11  ;;  %v2371_v46 = vpop.f32.mrb[3].mxu1 }
 0x284   : > { %v2046_v49 = vsel %vm3390_vm11, %v2042_v20, 0.0  ;;  %2063 = vst.msk [vmem:[%s4178_s29] sm:$0xff] %vm2062_vm12, %v2058_v47  ;;  %v2060_v41 = vadd.f32 %v2056_v14, %v2027_v62  ;;  %2071 = vrot.lane.b32.xlu0 %v2058_v47, %s2672_s14  ;;  %v909_v22 = vpop.f32.mrb[4].mxu1 }
 0x285   : > { %v2013_v15 = vadd.f32 %v2009_v58, %v1972_v60  ;;  %v2055_v2 = vmul.f32 %v2313_v56, %v2046_v49  ;;  %v2028_v9 = vadd.f32 %v2024_v29, %v2015_v55  ;;  %v2378_v24 = vpop.f32.mrb[5].mxu1 }
 0x286   : > { %v2036_v21 = vpop.permute.xlu1 %2035  ;;  %2065 = vst.msk [vmem:[%s4178_s29 + $0x10] sm:$0xff] %vm2062_vm12, %v2060_v41 }
 0x287   : > { %v2026_v28 = vadd.f32 %v2022_v36, %v2013_v15  ;;  %v2044_v53 = vsel %vm1081_vm10, %v2036_v21, 0.0 }
 0x288   : > { %v2048_v33 = vsel %vm3390_vm11, %v2044_v53, 0.0  ;;  %2075 = vrot.lane.b32.xlu0 %v2060_v41, %s2672_s14 }
 0x289   : > { %v2059_v35 = vadd.f32 %v2055_v2, %v2026_v28  ;;  %v2057_v13 = vmul.f32 %v2313_v56, %v2048_v33 }
 0x28b   : > { %2064 = vst.msk [vmem:[%s4178_s29 + $0x8] sm:$0xff] %vm2062_vm12, %v2059_v35  ;;  %v2061_v3 = vadd.f32 %v2057_v13, %v2028_v9 }
 0x28c   : > { %2088 = vrot.lane.b32.xlu0 %v2058_v47, %s2673_s28 }
 0x28d   : > { %2066 = vst.msk [vmem:[%s4178_s29 + $0x18] sm:$0xff] %vm2062_vm12, %v2061_v3  ;;  %2077 = vrot.lane.b32.xlu1 %v2061_v3, %s2672_s14 }
 0x290   : > { %2092 = vrot.lane.b32.xlu0 %v2060_v41, %s2673_s28 }
 0x291   : > { %2094 = vrot.lane.b32.xlu1 %v2061_v3, %s2673_s28 }
 0x294   : > { %2105 = vrot.lane.b32.xlu0 %v2058_v47, %s2674_s5 }
 0x295   : > { %2073 = vrot.lane.b32.xlu1 %v2059_v35, %s2672_s14 }
 0x298   : > { %2109 = vrot.lane.b32.xlu0 %v2060_v41, %s2674_s5 }
 0x299   : > { %2090 = vrot.lane.b32.xlu1 %v2059_v35, %s2673_s28 }
 0x29d   : > { %2107 = vrot.lane.b32.xlu1 %v2059_v35, %s2674_s5 }
 0x2a1   : > { %2111 = vrot.lane.b32.xlu1 %v2061_v3, %s2674_s5 }
 0x2f6   : > { %v2072_v0 = vpop.permute.xlu0 %2071 }
 0x2f7   : > { %2314 = vst.msk [vmem:[%s4178_s29 + $0x20] sm:$0xff] %vm2062_vm12, %v2072_v0 }
 0x2fa   : > { %v2076_v1 = vpop.permute.xlu0 %2075 }
 0x2fb   : > { %2316 = vst.msk [vmem:[%s4178_s29 + $0x30] sm:$0xff] %vm2062_vm12, %v2076_v1 }
 0x2fe   : > { %v2089_v8 = vpop.permute.xlu0 %2088 }
 0x2ff   : > { %v2078_v51 = vpop.permute.xlu1 %2077  ;;  %2318 = vst.msk [vmem:[%s4178_s29 + $0x40] sm:$0xff] %vm2062_vm12, %v2089_v8 }
 0x300   : > { %2317 = vst.msk [vmem:[%s4178_s29 + $0x38] sm:$0xff] %vm2062_vm12, %v2078_v51 }
 0x302   : > { %v2093_v30 = vpop.permute.xlu0 %2092 }
 0x303   : > { %v2095_v27 = vpop.permute.xlu1 %2094  ;;  %2320 = vst.msk [vmem:[%s4178_s29 + $0x50] sm:$0xff] %vm2062_vm12, %v2093_v30 }
 0x304   : > { %2321 = vst.msk [vmem:[%s4178_s29 + $0x58] sm:$0xff] %vm2062_vm12, %v2095_v27 }
 0x306   : > { %v2106_v50 = vpop.permute.xlu0 %2105 }
 0x307   : > { %v2074_v37 = vpop.permute.xlu1 %2073  ;;  %2322 = vst.msk [vmem:[%s4178_s29 + $0x60] sm:$0xff] %vm2062_vm12, %v2106_v50 }
 0x308   : > { %2315 = vst.msk [vmem:[%s4178_s29 + $0x28] sm:$0xff] %vm2062_vm12, %v2074_v37 }
 0x30a   : > { %v2110_v43 = vpop.permute.xlu0 %2109 }
 0x30b   : > { %v2091_v59 = vpop.permute.xlu1 %2090  ;;  %2324 = vst.msk [vmem:[%s4178_s29 + $0x70] sm:$0xff] %vm2062_vm12, %v2110_v43 }
 0x30c   : > { %2319 = vst.msk [vmem:[%s4178_s29 + $0x48] sm:$0xff] %vm2062_vm12, %v2091_v59 }
 0x30f   : > { %v2108_v40 = vpop.permute.xlu1 %2107 }
 0x310   : > { %2323 = vst.msk [vmem:[%s4178_s29 + $0x68] sm:$0xff] %vm2062_vm12, %v2108_v40 }
 0x313   : > { %v2112_v7 = vpop.permute.xlu1 %2111 }
 0x314   : > { %2325 = vst.msk [vmem:[%s4178_s29 + $0x78] sm:$0xff] %vm2062_vm12, %v2112_v7 }
 0x315   : > { %2586 = shalt.err (!%p2583_p11)
}
 0x316   : > { %s2587_s21 = scalar_lea.hbm %s4222_s24, 2048  ;;  %s2591_s14 = scalar_lea.hbm %s4279_s4, 4096 }
 0x317   : > { %p2588_p0 = scmp.ne.s32.totalorder %s4222_s24, %s2587_s21  ;;  %p2592_p6 = scmp.lt.u32.totalorder %s4222_s24, %s4279_s4 }
 0x318   : > { %p2593_p7 = scmp.lt.u32.totalorder %s2591_s14, %s2587_s21  ;;  %p2595_p8 = scmp.lt.u32.totalorder %s2587_s21, %s4222_s24 }
 0x319   : > { %p2589_p4 = pnand %p2588_p0, %p4361_p12 }
 0x31a   : > { %p2594_p2 = por %p2593_p7, %p2592_p6 }
 0x31b   : > { %p2590_p13 = pneg %p2589_p4 }
 0x31c   : > { %p2596_p1 = por %p2595_p8, %p2594_p2 }
 0x31e   : > { %p2597_p10 = pnand %p2596_p1, %p2590_p13 }
 0x320   : > { %2600 = shalt.err (!%p2597_p10)
}
 0x321   : > { %s2676_s6 = smov 128   ;;  %s2677_s13 = smov 8  }
 0x322   : > { %2401 = dma.vmem_to_hbm [thread:$0]  (%p4361_p12), %s4224_s10, 2048, %s4222_s24, %s2123_s9, %s2676_s6, %s2676_s6, %s2677_s13  }
 0x323 PF: > { %s2153_s12 = sand.u32 1, %s2639_s15   ;;  %p4362_p3 = scmp.ne.s32.totalorder %s4298_s26, 0 }
 0x324   : > { %p4363_p5 = scmp.ge.s32.totalorder %s2659_s20, 2  ;;  %s2154_s23 = scalar_lea.sflag [#allocation5], %s2153_s12 }
 0x326   : > { %p2415_p9 = pnand %p4363_p5, %p4362_p3 }
 0x328   : > { %2634 = dma.done.wait (!%p2415_p9), %s2154_s23, 2048  }
 0x329   : > { %2636 = vsyncadd (!%p2415_p9), %s2154_s23, 4294965248  ;;  %s21_s20 = sadd.s32 1, %s2659_s20   ;;  %s4364_s15 = smov %s2643_s16 }
 0x32a   : > { %p18_p11 = scmp.ge.s32.totalorder %s21_s20, 4   ;;  %s4365_s16 = smov %s2647_s17 }
 0x32b   : > { %s4366_s17 = smov %s2851_s11  ;;  %s4367_s18 = smov %s2655_s19 }
 0x32c   : > { %s4368_s19 = smov %s4370_s30  ;;  %20 = sbr.rel (!%p18_p11) target bundleno = 7 (0x7), region = 98 }
 0x333   :  { %2159 = vsyncpa [#allocation4], 1 }
 0x334   :  { %2161 = vsyncpa [#allocation4 + $0x1], 1 }
 0x335   :  { %2162 = vsyncpa [#allocation7], 1 }
 0x336   :  { %2163 = vsyncpa [#allocation5], 1 }
 0x337   :  { %2165 = vsyncpa [#allocation5 + $0x1], 1 }

</bundles_post_ra>
